<compile_context>
chip_gen: v6e
topology: v6e:2x2x1
jax: 0.10.0
libtpu: 0.0.40
codegen_flags: <defaults>
</compile_context>

<pallas_src>
import math
from functools import partial

import jax
import jax.numpy as jnp
from jax.experimental import pallas as pl
from jax.experimental.pallas import tpu as pltpu

_LN_EPS = 1e-5
_NEG_INF = -1e30
_TOK_ROWS = 8                      # mu/logvar tokens padded to a full sublane
_VMEM_LIMIT = 32 * 1024 * 1024     # fits scoped VMEM budgets on v5e/v6e/v7x


# ----------------------------------------------------------------------------
# In-kernel helpers
# ----------------------------------------------------------------------------
def _gelu_erf(x):
    # exact GELU (PyTorch F.gelu default)
    return 0.5 * x * (1.0 + jax.lax.erf(x * (1.0 / math.sqrt(2.0))))


def _layernorm(x, g, b):
    mu = jnp.mean(x, axis=-1, keepdims=True)
    xc = x - mu
    var = jnp.mean(xc * xc, axis=-1, keepdims=True)
    return xc * jax.lax.rsqrt(var + _LN_EPS) * g + b


# ----------------------------------------------------------------------------
# Fused whole-encoder kernel: grid = (batch, layer)
# ----------------------------------------------------------------------------
def _encoder_stack_kernel(motion_ref, bias_ref, base_ref, skelw_ref,
                          wqkv_ref, bqkv_ref, wouth_ref, bout_ref,
                          g1_ref, b1_ref, wff1_ref, bff1_ref,
                          wff2_ref, bff2_ref, g2_ref, b2_ref,
                          out_ref, carry_ref, *, num_heads):
    f32, bf16 = jnp.float32, jnp.bfloat16
    layer = pl.program_id(1)
    nframes = motion_ref.shape[1]

    # ---- layer-0 prologue: skel_embedding + tokens + positional encoding ----
    # base already holds: row0 = mu_tok + pe[0], row1 = logvar_tok + pe[1],
    # rows [TOK : TOK+T) = pe[2:] + skel_b, padding rows = 0.
    @pl.when(layer == 0)
    def _():
        base = base_ref[...]                                       # (S, D) f32
        carry_ref[...] = base
        emb = jnp.dot(motion_ref[0].astype(bf16), skelw_ref[...],
                      preferred_element_type=f32)                  # (T, D)
        carry_ref[pl.ds(_TOK_ROWS, nframes), :] = (
            base[_TOK_ROWS:_TOK_ROWS + nframes, :] + emb)

    x = carry_ref[...]                                             # (S, D) f32
    seq_len, d_model = x.shape
    dh = d_model // num_heads
    scale = 1.0 / math.sqrt(dh)

    # ---- fused QKV projection (bf16 MXU operands, f32 accumulation) ----
    qkv = jnp.dot(x.astype(bf16), wqkv_ref[0],
                  preferred_element_type=f32) + bqkv_ref[0]        # (S, 3D)
    q = qkv[:, :d_model] * scale          # fold 1/sqrt(dh) into q once
    k = qkv[:, d_model:2 * d_model]
    v = qkv[:, 2 * d_model:]

    # key-padding bias broadcast once (hoisted out of the head loop)
    bias = jnp.broadcast_to(bias_ref[0], (seq_len, seq_len))       # (S, S) f32

    wout_heads = wouth_ref[0]                                      # (H, dh, D) bf16
    qk_dims = (((1,), (1,)), ((), ()))                             # q @ k^T

    # ---- per-head attention with the output projection folded in ----
    attn = jnp.zeros((seq_len, d_model), f32)
    for h in range(num_heads):
        sl = slice(h * dh, (h + 1) * dh)
        s = jax.lax.dot_general(q[:, sl].astype(bf16), k[:, sl].astype(bf16),
                                qk_dims, preferred_element_type=f32) + bias
        s = s - jnp.max(s, axis=-1, keepdims=True)
        p = jnp.exp(s)
        denom = jnp.sum(p, axis=-1, keepdims=True)                 # (S, 1)
        ho = jnp.dot(p.astype(bf16), v[:, sl].astype(bf16),
                     preferred_element_type=f32) / denom           # (S, dh), exact softmax
        attn = attn + jnp.dot(ho.astype(bf16), wout_heads[h],
                              preferred_element_type=f32)          # (S, D)
    attn = attn + bout_ref[0]

    # ---- post-norm 1: LayerNorm(x + attn), f32 VPU math ----
    h1 = _layernorm(x + attn, g1_ref[0], b1_ref[0])

    # ---- feed forward: Linear -> exact GELU -> Linear ----
    f = jnp.dot(h1.astype(bf16), wff1_ref[0],
                preferred_element_type=f32) + bff1_ref[0]
    f = _gelu_erf(f)
    f = jnp.dot(f.astype(bf16), wff2_ref[0],
                preferred_element_type=f32) + bff2_ref[0]

    # ---- post-norm 2, carry to next layer (stays resident in VMEM) ----
    h2 = _layernorm(h1 + f, g2_ref[0], b2_ref[0])
    carry_ref[...] = h2

    # mu/logvar rows; the last layer's value is what lands in HBM
    out_ref[0] = h2[0:2, :]


# ----------------------------------------------------------------------------
# Pallas wrapper
# ----------------------------------------------------------------------------
def _layer_spec(shape):
    n = len(shape)
    return pl.BlockSpec((1,) + tuple(shape),
                        lambda b, l, _n=n: (l,) + (0,) * _n)


def _const_spec(shape):
    n = len(shape)
    return pl.BlockSpec(tuple(shape), lambda b, l, _n=n: (0,) * _n)


def encoder_stack(motion, bias, base, packed, *, num_heads):
    """motion: (B, T, F_in); bias: (B, 1, S_pad) f32; base: (S_pad, D) f32."""
    bs, nframes, nfeats = motion.shape
    num_layers, d, _ = packed["wqkv"].shape
    ff = packed["wff1"].shape[2]
    dh = d // num_heads
    s_pad = base.shape[0]

    return pl.pallas_call(
        partial(_encoder_stack_kernel, num_heads=num_heads),
        out_shape=jax.ShapeDtypeStruct((bs, 2, d), jnp.float32),
        grid=(bs, num_layers),
        in_specs=[
            pl.BlockSpec((1, nframes, nfeats), lambda b, l: (b, 0, 0)),
            pl.BlockSpec((1, 1, s_pad), lambda b, l: (b, 0, 0)),
            _const_spec((s_pad, d)),
            _const_spec((nfeats, d)),
            _layer_spec((d, 3 * d)), _layer_spec((1, 3 * d)),
            _layer_spec((num_heads, dh, d)), _layer_spec((1, d)),
            _layer_spec((1, d)), _layer_spec((1, d)),
            _layer_spec((d, ff)), _layer_spec((1, ff)),
            _layer_spec((ff, d)), _layer_spec((1, d)),
            _layer_spec((1, d)), _layer_spec((1, d)),
        ],
        out_specs=pl.BlockSpec((1, 2, d), lambda b, l: (b, 0, 0)),
        scratch_shapes=[pltpu.VMEM((s_pad, d), jnp.float32)],   # activation carry
        compiler_params=pltpu.CompilerParams(
            dimension_semantics=("parallel", "arbitrary"),
            vmem_limit_bytes=_VMEM_LIMIT,
        ),
    )(motion, bias, base, packed["skel_w"],
      packed["wqkv"], packed["bqkv"], packed["wout_h"], packed["bout"],
      packed["ln1_g"], packed["ln1_b"],
      packed["wff1"], packed["bff1"], packed["wff2"], packed["bff2"],
      packed["ln2_g"], packed["ln2_b"])


# ----------------------------------------------------------------------------
# Parameter init / one-time packing (stack per-layer weights, pre-cast to bf16)
# ----------------------------------------------------------------------------
def _dense_init(key, fan_in, fan_out):
    kw, kb = jax.random.split(key)
    w = jax.random.normal(kw, (fan_in, fan_out), jnp.float32) / math.sqrt(fan_in)
    b = jax.random.normal(kb, (fan_out,), jnp.float32) * 0.01
    return w, b


def init_params(key, nfeats, latent_dim, ff_size, num_layers):
    k_skel, k_mu, k_lv, k_layers = jax.random.split(key, 4)
    skel_w, skel_b = _dense_init(k_skel, nfeats, latent_dim)
    params = dict(
        skel_w=skel_w,
        skel_b=skel_b,
        mu_token=jax.random.normal(k_mu, (latent_dim,), jnp.float32),
        logvar_token=jax.random.normal(k_lv, (latent_dim,), jnp.float32),
        layers=[],
    )
    for lk in jax.random.split(k_layers, num_layers):
        ks = jax.random.split(lk, 4)
        in_w, in_b = _dense_init(ks[0], latent_dim, 3 * latent_dim)  # in_proj (q|k|v)
        out_w, out_b = _dense_init(ks[1], latent_dim, latent_dim)    # out_proj
        ff1_w, ff1_b = _dense_init(ks[2], latent_dim, ff_size)
        ff2_w, ff2_b = _dense_init(ks[3], ff_size, latent_dim)
        params["layers"].append(dict(
            attn_in_w=in_w, attn_in_b=in_b, attn_out_w=out_w, attn_out_b=out_b,
            ff1_w=ff1_w, ff1_b=ff1_b, ff2_w=ff2_w, ff2_b=ff2_b,
            ln1_g=jnp.ones((latent_dim,), jnp.float32),
            ln1_b=jnp.zeros((latent_dim,), jnp.float32),
            ln2_g=jnp.ones((latent_dim,), jnp.float32),
            ln2_b=jnp.zeros((latent_dim,), jnp.float32),
        ))
    return params


def pack_params(params, num_heads):
    """One-time: stack per-layer params with a leading L axis, pre-cast matmul
    weights to bf16, reshape the out-projection to (L, H, dh, D)."""
    bf16 = jnp.bfloat16
    d = params["skel_w"].shape[1]
    dh = d // num_heads
    num_layers = len(params["layers"])

    def stack(name):
        return jnp.stack([lp[name] for lp in params["layers"]], axis=0)

    return dict(
        skel_w=params["skel_w"].astype(bf16),                          # (F_in, D)
        skel_b=params["skel_b"],                                       # (D,)
        mu_token=params["mu_token"],
        logvar_token=params["logvar_token"],
        wqkv=stack("attn_in_w").astype(bf16),                          # (L, D, 3D)
        bqkv=stack("attn_in_b")[:, None, :],                           # (L, 1, 3D)
        wout_h=stack("attn_out_w").reshape(
            num_layers, num_heads, dh, d).astype(bf16),                # (L, H, dh, D)
        bout=stack("attn_out_b")[:, None, :],                          # (L, 1, D)
        ln1_g=stack("ln1_g")[:, None, :], ln1_b=stack("ln1_b")[:, None, :],
        wff1=stack("ff1_w").astype(bf16), bff1=stack("ff1_b")[:, None, :],
        wff2=stack("ff2_w").astype(bf16), bff2=stack("ff2_b")[:, None, :],
        ln2_g=stack("ln2_g")[:, None, :], ln2_b=stack("ln2_b")[:, None, :],
    )


def positional_encoding(seq_len, d_model):
    position = jnp.arange(seq_len, dtype=jnp.float32)[:, None]
    div_term = jnp.exp(jnp.arange(0, d_model, 2, dtype=jnp.float32)
                       * (-math.log(10000.0) / d_model))
    pe = jnp.zeros((seq_len, d_model), jnp.float32)
    pe = pe.at[:, 0::2].set(jnp.sin(position * div_term))
    pe = pe.at[:, 1::2].set(jnp.cos(position * div_term))
    return pe  # (S, D); identical for all batches


# ----------------------------------------------------------------------------
# Forward pass
# ----------------------------------------------------------------------------
def actor_agnostic_encoder_forward(packed, motion, motion_length, *, num_heads):
    """motion: (bs, nframes, nfeats); motion_length: (bs,) int. VAE head: (mu, std)."""
    bs, nframes, nfeats = motion.shape
    d = packed["skel_b"].shape[-1]
    # token slab padded to 8 rows (sublane aligned), total padded to 128 (lane dense)
    s_pad = ((_TOK_ROWS + nframes + 127) // 128) * 128

    # lengths_to_mask + token mask -> additive key-padding bias (bs, 1, S_pad);
    # the padding rows/cols introduced by alignment are masked here as well.
    col = jnp.arange(s_pad)[None, :]
    valid = (col < 2) | ((col >= _TOK_ROWS) &
                         (col < _TOK_ROWS + motion_length[:, None]))
    bias = jnp.where(valid, 0.0, _NEG_INF).astype(jnp.float32)[:, None, :]

    # base slab: tokens + positional encoding (+ skel_embedding bias folded in)
    pe = positional_encoding(nframes + 2, d)
    base = jnp.zeros((s_pad, d), jnp.float32)
    base = base.at[0].set(packed["mu_token"] + pe[0])
    base = base.at[1].set(packed["logvar_token"] + pe[1])
    base = base.at[_TOK_ROWS:_TOK_ROWS + nframes].set(pe[2:] + packed["skel_b"])

    out = encoder_stack(motion, bias, base, packed, num_heads=num_heads)  # (B, 2, D)
    mu = out[:, 0, :]
    std = jnp.exp(0.5 * out[:, 1, :])
    # TODO(synk): torch.distributions.Normal has no Pallas/JAX-array equivalent;
    # we return its parameters (mu, std).
    return mu, std


# ----------------------------------------------------------------------------
# Pure-JAX f32 reference (exact PyTorch semantics, unpadded) for sanity check
# ----------------------------------------------------------------------------
def _reference_forward(params, motion, motion_length, *, num_heads):
    bs, nframes, nfeats = motion.shape
    d = params["skel_w"].shape[1]
    seq_len = nframes + 2
    dh = d // num_heads

    mask = jnp.arange(nframes)[None, :] < motion_length[:, None]
    aug_mask = jnp.concatenate([jnp.ones((bs, 2), dtype=bool), mask], axis=1)
    bias = jnp.where(aug_mask, 0.0, _NEG_INF)[:, None, None, :]

    x = motion.reshape(bs * nframes, nfeats) @ params["skel_w"] + params["skel_b"]
    x = x.reshape(bs, nframes, d)
    tok = jnp.stack([params["mu_token"], params["logvar_token"]], axis=0)
    h = jnp.concatenate([jnp.broadcast_to(tok[None], (bs, 2, d)), x], axis=1)
    h = h + positional_encoding(seq_len, d)[None]

    def ln(y, g, b):
        m = y.mean(-1, keepdims=True)
        v = ((y - m) ** 2).mean(-1, keepdims=True)
        return (y - m) * jax.lax.rsqrt(v + _LN_EPS) * g + b

    for lp in params["layers"]:
        qkv = h @ lp["attn_in_w"] + lp["attn_in_b"]
        q, k, v = jnp.split(qkv, 3, axis=-1)

        def heads(t):
            return t.reshape(bs, seq_len, num_heads, dh).transpose(0, 2, 1, 3)

        s = jnp.einsum('bhqd,bhkd->bhqk', heads(q), heads(k)) / math.sqrt(dh) + bias
        p = jax.nn.softmax(s, axis=-1)
        a = jnp.einsum('bhqk,bhkd->bhqd', p, heads(v))
        a = a.transpose(0, 2, 1, 3).reshape(bs, seq_len, d)
        attn = a @ lp["attn_out_w"] + lp["attn_out_b"]
        h1 = ln(h + attn, lp["ln1_g"], lp["ln1_b"])
        f = h1 @ lp["ff1_w"] + lp["ff1_b"]
        f = 0.5 * f * (1.0 + jax.lax.erf(f / math.sqrt(2.0)))
        f = f @ lp["ff2_w"] + lp["ff2_b"]
        h = ln(h1 + f, lp["ln2_g"], lp["ln2_b"])

    mu = h[:, 0, :]
    std = jnp.exp(0.5 * h[:, 1, :])
    return mu, std


# ----------------------------------------------------------------------------
# Demo
# ----------------------------------------------------------------------------
if __name__ == "__main__":
    key = jax.random.PRNGKey(0)
    k_params, k_motion = jax.random.split(key)

    bs, nframes, nfeats = 2, 8, 16
    latent_dim, ff_size, num_layers, num_heads = 32, 64, 2, 4

    params = init_params(k_params, nfeats, latent_dim, ff_size, num_layers)
    packed = pack_params(params, num_heads)      # one-time stack + bf16 pre-cast
    motion = jax.random.normal(k_motion, (bs, nframes, nfeats), dtype=jnp.float32)
    motion_length = jnp.array([8, 5], dtype=jnp.int32)

    fwd = jax.jit(partial(actor_agnostic_encoder_forward, num_heads=num_heads))
    mu, std = fwd(packed, motion, motion_length)
    jax.block_until_ready((mu, std))

    assert mu.shape == (bs, latent_dim) and std.shape == (bs, latent_dim)
    assert bool(jnp.all(jnp.isfinite(mu))) and bool(jnp.all(std > 0))

    # loose parity check vs f32 pure-JAX reference (kernels use bf16 MXU operands)
    mu_ref, std_ref = _reference_forward(params, motion, motion_length,
                                         num_heads=num_heads)
    assert bool(jnp.all(jnp.abs(mu - mu_ref) < 0.1))
    assert bool(jnp.all(jnp.abs(std - std_ref) < 0.1 + 0.1 * jnp.abs(std_ref)))

    print("KERNEL_OK")
</pallas_src>

<mosaic_0001>
module attributes {stable_mosaic.version = 11 : i64} {
  func.func @_encoder_stack_kernel(%arg0: i32, %arg1: i32, %arg2: memref<1x8x16xf32, #tpu.memory_space<vmem>>, %arg3: memref<1x1x128xf32, #tpu.memory_space<vmem>>, %arg4: memref<128x32xf32, #tpu.memory_space<vmem>>, %arg5: memref<16x32xbf16, #tpu.memory_space<vmem>>, %arg6: memref<1x32x96xbf16, #tpu.memory_space<vmem>>, %arg7: memref<1x1x96xf32, #tpu.memory_space<vmem>>, %arg8: memref<1x4x8x32xbf16, #tpu.memory_space<vmem>>, %arg9: memref<1x1x32xf32, #tpu.memory_space<vmem>>, %arg10: memref<1x1x32xf32, #tpu.memory_space<vmem>>, %arg11: memref<1x1x32xf32, #tpu.memory_space<vmem>>, %arg12: memref<1x32x64xbf16, #tpu.memory_space<vmem>>, %arg13: memref<1x1x64xf32, #tpu.memory_space<vmem>>, %arg14: memref<1x64x32xbf16, #tpu.memory_space<vmem>>, %arg15: memref<1x1x32xf32, #tpu.memory_space<vmem>>, %arg16: memref<1x1x32xf32, #tpu.memory_space<vmem>>, %arg17: memref<1x1x32xf32, #tpu.memory_space<vmem>>, %arg18: memref<1x2x32xf32, #tpu.memory_space<vmem>>, %arg19: memref<128x32xf32, #tpu.memory_space<vmem>>) attributes {dimension_semantics = [#tpu.dimension_semantics<parallel>, #tpu.dimension_semantics<arbitrary>], iteration_bounds = array<i64: 2, 2>, scalar_prefetch = 0 : i64, scratch_operands = 1 : i64, tpu.core_type = #tpu.core_type<tc>, window_params = [{transform_indices = @transform_0, window_bounds = array<i64: 1, 8, 16>}, {transform_indices = @transform_1, window_bounds = array<i64: 1, 1, 128>}, {pipeline_mode = #tpu.pipeline_mode<synchronous>, transform_indices = @transform_2, window_bounds = array<i64: 128, 32>}, {pipeline_mode = #tpu.pipeline_mode<synchronous>, transform_indices = @transform_3, window_bounds = array<i64: 16, 32>}, {transform_indices = @transform_4, window_bounds = array<i64: 1, 32, 96>}, {transform_indices = @transform_5, window_bounds = array<i64: 1, 1, 96>}, {transform_indices = @transform_6, window_bounds = array<i64: 1, 4, 8, 32>}, {transform_indices = @transform_7, window_bounds = array<i64: 1, 1, 32>}, {transform_indices = @transform_8, window_bounds = array<i64: 1, 1, 32>}, {transform_indices = @transform_9, window_bounds = array<i64: 1, 1, 32>}, {transform_indices = @transform_10, window_bounds = array<i64: 1, 32, 64>}, {transform_indices = @transform_11, window_bounds = array<i64: 1, 1, 64>}, {transform_indices = @transform_12, window_bounds = array<i64: 1, 64, 32>}, {transform_indices = @transform_13, window_bounds = array<i64: 1, 1, 32>}, {transform_indices = @transform_14, window_bounds = array<i64: 1, 1, 32>}, {transform_indices = @transform_15, window_bounds = array<i64: 1, 1, 32>}, {transform_indices = @transform_16, window_bounds = array<i64: 1, 2, 32>}]} {
    %c0_i32 = arith.constant 0 : i32
    %0 = arith.cmpi eq, %arg1, %c0_i32 : i32
    %1 = arith.extui %0 : i1 to i32
    %c0_i32_0 = arith.constant 0 : i32
    %2 = arith.cmpi ne, %1, %c0_i32_0 : i32
    scf.if %2 {
      %c0_84 = arith.constant 0 : index
      %c0_85 = arith.constant 0 : index
      %203 = vector.load %arg4[%c0_84, %c0_85] : memref<128x32xf32, #tpu.memory_space<vmem>>, vector<128x32xf32>
      %c0_86 = arith.constant 0 : index
      %c0_87 = arith.constant 0 : index
      %204 = vector.load %arg19[%c0_86, %c0_87] : memref<128x32xf32, #tpu.memory_space<vmem>>, vector<128x32xf32>
      tpu.vector_store %arg19[%c0_86, %c0_87], %203 {strides = array<i32>} : memref<128x32xf32, #tpu.memory_space<vmem>>, vector<128x32xf32>,
      %c0_88 = arith.constant 0 : index
      %c0_89 = arith.constant 0 : index
      %c0_90 = arith.constant 0 : index
      %205 = vector.load %arg2[%c0_88, %c0_89, %c0_90] : memref<1x8x16xf32, #tpu.memory_space<vmem>>, vector<1x8x16xf32>
      %206 = vector.shape_cast %205 : vector<1x8x16xf32> to vector<8x16xf32>
      %207 = arith.truncf %206 : vector<8x16xf32> to vector<8x16xbf16>
      %c0_91 = arith.constant 0 : index
      %c0_92 = arith.constant 0 : index
      %208 = vector.load %arg5[%c0_91, %c0_92] : memref<16x32xbf16, #tpu.memory_space<vmem>>, vector<16x32xbf16>
      %cst_93 = arith.constant dense<0.000000e+00> : vector<8x32xf32>
      %209 = tpu.matmul %207, %208, %cst_93 {dimension_numbers = #tpu.dot_dimension_numbers<[1], [0], [0], [1], [0, 0, 1, 1], [], []>} : vector<8x16xbf16>, vector<16x32xbf16>, vector<8x32xf32> -> vector<8x32xf32>
      %210 = vector.extract_strided_slice %203 {offsets = [8, 0], sizes = [8, 32], strides = [1, 1]} : vector<128x32xf32> to vector<8x32xf32>
      %211 = arith.addf %210, %209 : vector<8x32xf32>
      %c8 = arith.constant 8 : index
      %c0_94 = arith.constant 0 : index
      %212 = vector.load %arg19[%c8, %c0_94] : memref<128x32xf32, #tpu.memory_space<vmem>>, vector<8x32xf32>
      tpu.vector_store %arg19[%c8, %c0_94], %211 {strides = array<i32>} : memref<128x32xf32, #tpu.memory_space<vmem>>, vector<8x32xf32>,
    } else {
    }
    %c0 = arith.constant 0 : index
    %c0_1 = arith.constant 0 : index
    %3 = vector.load %arg19[%c0, %c0_1] : memref<128x32xf32, #tpu.memory_space<vmem>>, vector<128x32xf32>
    %4 = arith.truncf %3 : vector<128x32xf32> to vector<128x32xbf16>
    %c0_2 = arith.constant 0 : index
    %c0_3 = arith.constant 0 : index
    %c0_4 = arith.constant 0 : index
    %5 = vector.load %arg6[%c0_2, %c0_3, %c0_4] : memref<1x32x96xbf16, #tpu.memory_space<vmem>>, vector<1x32x96xbf16>
    %6 = vector.shape_cast %5 : vector<1x32x96xbf16> to vector<32x96xbf16>
    %cst = arith.constant dense<0.000000e+00> : vector<128x96xf32>
    %7 = tpu.matmul %4, %6, %cst {dimension_numbers = #tpu.dot_dimension_numbers<[1], [0], [0], [1], [0, 0, 1, 1], [], []>} : vector<128x32xbf16>, vector<32x96xbf16>, vector<128x96xf32> -> vector<128x96xf32>
    %c0_5 = arith.constant 0 : index
    %c0_6 = arith.constant 0 : index
    %c0_7 = arith.constant 0 : index
    %8 = vector.load %arg7[%c0_5, %c0_6, %c0_7] : memref<1x1x96xf32, #tpu.memory_space<vmem>>, vector<1x1x96xf32>
    %9 = vector.shape_cast %8 : vector<1x1x96xf32> to vector<1x96xf32>
    %10 = vector.broadcast %9 : vector<1x96xf32> to vector<128x96xf32>
    %11 = arith.addf %7, %10 : vector<128x96xf32>
    %12 = vector.extract_strided_slice %11 {offsets = [0, 0], sizes = [128, 32], strides = [1, 1]} : vector<128x96xf32> to vector<128x32xf32>
    %cst_8 = arith.constant 0.353553385 : f32
    %13 = vector.broadcast %cst_8 : f32 to vector<128x32xf32>
    %14 = arith.mulf %12, %13 : vector<128x32xf32>
    %15 = vector.extract_strided_slice %11 {offsets = [0, 32], sizes = [128, 32], strides = [1, 1]} : vector<128x96xf32> to vector<128x32xf32>
    %16 = vector.extract_strided_slice %11 {offsets = [0, 64], sizes = [128, 32], strides = [1, 1]} : vector<128x96xf32> to vector<128x32xf32>
    %c0_9 = arith.constant 0 : index
    %c0_10 = arith.constant 0 : index
    %c0_11 = arith.constant 0 : index
    %17 = vector.load %arg3[%c0_9, %c0_10, %c0_11] : memref<1x1x128xf32, #tpu.memory_space<vmem>>, vector<1x1x128xf32>
    %18 = vector.shape_cast %17 : vector<1x1x128xf32> to vector<1x128xf32>
    %19 = vector.shape_cast %18 : vector<1x128xf32> to vector<1x128xf32>
    %20 = vector.broadcast %19 : vector<1x128xf32> to vector<128x128xf32>
    %c0_12 = arith.constant 0 : index
    %c0_13 = arith.constant 0 : index
    %c0_14 = arith.constant 0 : index
    %c0_15 = arith.constant 0 : index
    %21 = vector.load %arg8[%c0_12, %c0_13, %c0_14, %c0_15] : memref<1x4x8x32xbf16, #tpu.memory_space<vmem>>, vector<1x4x8x32xbf16>
    %22 = vector.shape_cast %21 : vector<1x4x8x32xbf16> to vector<4x8x32xbf16>
    %cst_16 = arith.constant 0.000000e+00 : f32
    %23 = vector.broadcast %cst_16 : f32 to vector<128x32xf32>
    %24 = vector.extract_strided_slice %14 {offsets = [0, 0], sizes = [128, 8], strides = [1, 1]} : vector<128x32xf32> to vector<128x8xf32>
    %25 = arith.truncf %24 : vector<128x8xf32> to vector<128x8xbf16>
    %26 = vector.extract_strided_slice %15 {offsets = [0, 0], sizes = [128, 8], strides = [1, 1]} : vector<128x32xf32> to vector<128x8xf32>
    %27 = arith.truncf %26 : vector<128x8xf32> to vector<128x8xbf16>
    %cst_17 = arith.constant dense<0.000000e+00> : vector<128x128xf32>
    %28 = tpu.matmul %25, %27, %cst_17 {dimension_numbers = #tpu.dot_dimension_numbers<[1], [1], [0], [0], [0, 0, 1, 0], [], []>} : vector<128x8xbf16>, vector<128x8xbf16>, vector<128x128xf32> -> vector<128x128xf32>
    %29 = arith.addf %28, %20 : vector<128x128xf32>
    %cst_18 = arith.constant dense<0xFF800000> : vector<128xf32>
    %30 = vector.multi_reduction <maximumf>, %29, %cst_18 [1] : vector<128x128xf32> to vector<128xf32>
    %31 = vector.shape_cast %30 : vector<128xf32> to vector<128x1xf32>
    %32 = vector.broadcast %31 : vector<128x1xf32> to vector<128x128xf32>
    %33 = arith.subf %29, %32 : vector<128x128xf32>
    %34 = math.exp %33 : vector<128x128xf32>
    %cst_19 = arith.constant dense<0.000000e+00> : vector<128xf32>
    %35 = vector.multi_reduction <add>, %34, %cst_19 [1] : vector<128x128xf32> to vector<128xf32>
    %36 = vector.shape_cast %35 : vector<128xf32> to vector<128x1xf32>
    %37 = arith.truncf %34 : vector<128x128xf32> to vector<128x128xbf16>
    %38 = vector.extract_strided_slice %16 {offsets = [0, 0], sizes = [128, 8], strides = [1, 1]} : vector<128x32xf32> to vector<128x8xf32>
    %39 = arith.truncf %38 : vector<128x8xf32> to vector<128x8xbf16>
    %cst_20 = arith.constant dense<0.000000e+00> : vector<128x8xf32>
    %40 = tpu.matmul %37, %39, %cst_20 {dimension_numbers = #tpu.dot_dimension_numbers<[1], [0], [0], [1], [0, 0, 1, 1], [], []>} : vector<128x128xbf16>, vector<128x8xbf16>, vector<128x8xf32> -> vector<128x8xf32>
    %41 = vector.broadcast %36 : vector<128x1xf32> to vector<128x8xf32>
    %42 = arith.divf %40, %41 : vector<128x8xf32>
    %43 = arith.truncf %42 : vector<128x8xf32> to vector<128x8xbf16>
    %44 = vector.extract_strided_slice %22 {offsets = [0, 0, 0], sizes = [1, 8, 32], strides = [1, 1, 1]} : vector<4x8x32xbf16> to vector<1x8x32xbf16>
    %45 = vector.shape_cast %44 : vector<1x8x32xbf16> to vector<8x32xbf16>
    %cst_21 = arith.constant dense<0.000000e+00> : vector<128x32xf32>
    %46 = tpu.matmul %43, %45, %cst_21 {dimension_numbers = #tpu.dot_dimension_numbers<[1], [0], [0], [1], [0, 0, 1, 1], [], []>} : vector<128x8xbf16>, vector<8x32xbf16>, vector<128x32xf32> -> vector<128x32xf32>
    %47 = arith.addf %23, %46 : vector<128x32xf32>
    %48 = vector.extract_strided_slice %14 {offsets = [0, 8], sizes = [128, 8], strides = [1, 1]} : vector<128x32xf32> to vector<128x8xf32>
    %49 = arith.truncf %48 : vector<128x8xf32> to vector<128x8xbf16>
    %50 = vector.extract_strided_slice %15 {offsets = [0, 8], sizes = [128, 8], strides = [1, 1]} : vector<128x32xf32> to vector<128x8xf32>
    %51 = arith.truncf %50 : vector<128x8xf32> to vector<128x8xbf16>
    %cst_22 = arith.constant dense<0.000000e+00> : vector<128x128xf32>
    %52 = tpu.matmul %49, %51, %cst_22 {dimension_numbers = #tpu.dot_dimension_numbers<[1], [1], [0], [0], [0, 0, 1, 0], [], []>} : vector<128x8xbf16>, vector<128x8xbf16>, vector<128x128xf32> -> vector<128x128xf32>
    %53 = arith.addf %52, %20 : vector<128x128xf32>
    %cst_23 = arith.constant dense<0xFF800000> : vector<128xf32>
    %54 = vector.multi_reduction <maximumf>, %53, %cst_23 [1] : vector<128x128xf32> to vector<128xf32>
    %55 = vector.shape_cast %54 : vector<128xf32> to vector<128x1xf32>
    %56 = vector.broadcast %55 : vector<128x1xf32> to vector<128x128xf32>
    %57 = arith.subf %53, %56 : vector<128x128xf32>
    %58 = math.exp %57 : vector<128x128xf32>
    %cst_24 = arith.constant dense<0.000000e+00> : vector<128xf32>
    %59 = vector.multi_reduction <add>, %58, %cst_24 [1] : vector<128x128xf32> to vector<128xf32>
    %60 = vector.shape_cast %59 : vector<128xf32> to vector<128x1xf32>
    %61 = arith.truncf %58 : vector<128x128xf32> to vector<128x128xbf16>
    %62 = vector.extract_strided_slice %16 {offsets = [0, 8], sizes = [128, 8], strides = [1, 1]} : vector<128x32xf32> to vector<128x8xf32>
    %63 = arith.truncf %62 : vector<128x8xf32> to vector<128x8xbf16>
    %cst_25 = arith.constant dense<0.000000e+00> : vector<128x8xf32>
    %64 = tpu.matmul %61, %63, %cst_25 {dimension_numbers = #tpu.dot_dimension_numbers<[1], [0], [0], [1], [0, 0, 1, 1], [], []>} : vector<128x128xbf16>, vector<128x8xbf16>, vector<128x8xf32> -> vector<128x8xf32>
    %65 = vector.broadcast %60 : vector<128x1xf32> to vector<128x8xf32>
    %66 = arith.divf %64, %65 : vector<128x8xf32>
    %67 = arith.truncf %66 : vector<128x8xf32> to vector<128x8xbf16>
    %68 = vector.extract_strided_slice %22 {offsets = [1, 0, 0], sizes = [1, 8, 32], strides = [1, 1, 1]} : vector<4x8x32xbf16> to vector<1x8x32xbf16>
    %69 = vector.shape_cast %68 : vector<1x8x32xbf16> to vector<8x32xbf16>
    %cst_26 = arith.constant dense<0.000000e+00> : vector<128x32xf32>
    %70 = tpu.matmul %67, %69, %cst_26 {dimension_numbers = #tpu.dot_dimension_numbers<[1], [0], [0], [1], [0, 0, 1, 1], [], []>} : vector<128x8xbf16>, vector<8x32xbf16>, vector<128x32xf32> -> vector<128x32xf32>
    %71 = arith.addf %47, %70 : vector<128x32xf32>
    %72 = vector.extract_strided_slice %14 {offsets = [0, 16], sizes = [128, 8], strides = [1, 1]} : vector<128x32xf32> to vector<128x8xf32>
    %73 = arith.truncf %72 : vector<128x8xf32> to vector<128x8xbf16>
    %74 = vector.extract_strided_slice %15 {offsets = [0, 16], sizes = [128, 8], strides = [1, 1]} : vector<128x32xf32> to vector<128x8xf32>
    %75 = arith.truncf %74 : vector<128x8xf32> to vector<128x8xbf16>
    %cst_27 = arith.constant dense<0.000000e+00> : vector<128x128xf32>
    %76 = tpu.matmul %73, %75, %cst_27 {dimension_numbers = #tpu.dot_dimension_numbers<[1], [1], [0], [0], [0, 0, 1, 0], [], []>} : vector<128x8xbf16>, vector<128x8xbf16>, vector<128x128xf32> -> vector<128x128xf32>
    %77 = arith.addf %76, %20 : vector<128x128xf32>
    %cst_28 = arith.constant dense<0xFF800000> : vector<128xf32>
    %78 = vector.multi_reduction <maximumf>, %77, %cst_28 [1] : vector<128x128xf32> to vector<128xf32>
    %79 = vector.shape_cast %78 : vector<128xf32> to vector<128x1xf32>
    %80 = vector.broadcast %79 : vector<128x1xf32> to vector<128x128xf32>
    %81 = arith.subf %77, %80 : vector<128x128xf32>
    %82 = math.exp %81 : vector<128x128xf32>
    %cst_29 = arith.constant dense<0.000000e+00> : vector<128xf32>
    %83 = vector.multi_reduction <add>, %82, %cst_29 [1] : vector<128x128xf32> to vector<128xf32>
    %84 = vector.shape_cast %83 : vector<128xf32> to vector<128x1xf32>
    %85 = arith.truncf %82 : vector<128x128xf32> to vector<128x128xbf16>
    %86 = vector.extract_strided_slice %16 {offsets = [0, 16], sizes = [128, 8], strides = [1, 1]} : vector<128x32xf32> to vector<128x8xf32>
    %87 = arith.truncf %86 : vector<128x8xf32> to vector<128x8xbf16>
    %cst_30 = arith.constant dense<0.000000e+00> : vector<128x8xf32>
    %88 = tpu.matmul %85, %87, %cst_30 {dimension_numbers = #tpu.dot_dimension_numbers<[1], [0], [0], [1], [0, 0, 1, 1], [], []>} : vector<128x128xbf16>, vector<128x8xbf16>, vector<128x8xf32> -> vector<128x8xf32>
    %89 = vector.broadcast %84 : vector<128x1xf32> to vector<128x8xf32>
    %90 = arith.divf %88, %89 : vector<128x8xf32>
    %91 = arith.truncf %90 : vector<128x8xf32> to vector<128x8xbf16>
    %92 = vector.extract_strided_slice %22 {offsets = [2, 0, 0], sizes = [1, 8, 32], strides = [1, 1, 1]} : vector<4x8x32xbf16> to vector<1x8x32xbf16>
    %93 = vector.shape_cast %92 : vector<1x8x32xbf16> to vector<8x32xbf16>
    %cst_31 = arith.constant dense<0.000000e+00> : vector<128x32xf32>
    %94 = tpu.matmul %91, %93, %cst_31 {dimension_numbers = #tpu.dot_dimension_numbers<[1], [0], [0], [1], [0, 0, 1, 1], [], []>} : vector<128x8xbf16>, vector<8x32xbf16>, vector<128x32xf32> -> vector<128x32xf32>
    %95 = arith.addf %71, %94 : vector<128x32xf32>
    %96 = vector.extract_strided_slice %14 {offsets = [0, 24], sizes = [128, 8], strides = [1, 1]} : vector<128x32xf32> to vector<128x8xf32>
    %97 = arith.truncf %96 : vector<128x8xf32> to vector<128x8xbf16>
    %98 = vector.extract_strided_slice %15 {offsets = [0, 24], sizes = [128, 8], strides = [1, 1]} : vector<128x32xf32> to vector<128x8xf32>
    %99 = arith.truncf %98 : vector<128x8xf32> to vector<128x8xbf16>
    %cst_32 = arith.constant dense<0.000000e+00> : vector<128x128xf32>
    %100 = tpu.matmul %97, %99, %cst_32 {dimension_numbers = #tpu.dot_dimension_numbers<[1], [1], [0], [0], [0, 0, 1, 0], [], []>} : vector<128x8xbf16>, vector<128x8xbf16>, vector<128x128xf32> -> vector<128x128xf32>
    %101 = arith.addf %100, %20 : vector<128x128xf32>
    %cst_33 = arith.constant dense<0xFF800000> : vector<128xf32>
    %102 = vector.multi_reduction <maximumf>, %101, %cst_33 [1] : vector<128x128xf32> to vector<128xf32>
    %103 = vector.shape_cast %102 : vector<128xf32> to vector<128x1xf32>
    %104 = vector.broadcast %103 : vector<128x1xf32> to vector<128x128xf32>
    %105 = arith.subf %101, %104 : vector<128x128xf32>
    %106 = math.exp %105 : vector<128x128xf32>
    %cst_34 = arith.constant dense<0.000000e+00> : vector<128xf32>
    %107 = vector.multi_reduction <add>, %106, %cst_34 [1] : vector<128x128xf32> to vector<128xf32>
    %108 = vector.shape_cast %107 : vector<128xf32> to vector<128x1xf32>
    %109 = arith.truncf %106 : vector<128x128xf32> to vector<128x128xbf16>
    %110 = vector.extract_strided_slice %16 {offsets = [0, 24], sizes = [128, 8], strides = [1, 1]} : vector<128x32xf32> to vector<128x8xf32>
    %111 = arith.truncf %110 : vector<128x8xf32> to vector<128x8xbf16>
    %cst_35 = arith.constant dense<0.000000e+00> : vector<128x8xf32>
    %112 = tpu.matmul %109, %111, %cst_35 {dimension_numbers = #tpu.dot_dimension_numbers<[1], [0], [0], [1], [0, 0, 1, 1], [], []>} : vector<128x128xbf16>, vector<128x8xbf16>, vector<128x8xf32> -> vector<128x8xf32>
    %113 = vector.broadcast %108 : vector<128x1xf32> to vector<128x8xf32>
    %114 = arith.divf %112, %113 : vector<128x8xf32>
    %115 = arith.truncf %114 : vector<128x8xf32> to vector<128x8xbf16>
    %116 = vector.extract_strided_slice %22 {offsets = [3, 0, 0], sizes = [1, 8, 32], strides = [1, 1, 1]} : vector<4x8x32xbf16> to vector<1x8x32xbf16>
    %117 = vector.shape_cast %116 : vector<1x8x32xbf16> to vector<8x32xbf16>
    %cst_36 = arith.constant dense<0.000000e+00> : vector<128x32xf32>
    %118 = tpu.matmul %115, %117, %cst_36 {dimension_numbers = #tpu.dot_dimension_numbers<[1], [0], [0], [1], [0, 0, 1, 1], [], []>} : vector<128x8xbf16>, vector<8x32xbf16>, vector<128x32xf32> -> vector<128x32xf32>
    %119 = arith.addf %95, %118 : vector<128x32xf32>
    %c0_37 = arith.constant 0 : index
    %c0_38 = arith.constant 0 : index
    %c0_39 = arith.constant 0 : index
    %120 = vector.load %arg9[%c0_37, %c0_38, %c0_39] : memref<1x1x32xf32, #tpu.memory_space<vmem>>, vector<1x1x32xf32>
    %121 = vector.shape_cast %120 : vector<1x1x32xf32> to vector<1x32xf32>
    %122 = vector.broadcast %121 : vector<1x32xf32> to vector<128x32xf32>
    %123 = arith.addf %119, %122 : vector<128x32xf32>
    %124 = arith.addf %3, %123 : vector<128x32xf32>
    %c0_40 = arith.constant 0 : index
    %c0_41 = arith.constant 0 : index
    %c0_42 = arith.constant 0 : index
    %125 = vector.load %arg10[%c0_40, %c0_41, %c0_42] : memref<1x1x32xf32, #tpu.memory_space<vmem>>, vector<1x1x32xf32>
    %126 = vector.shape_cast %125 : vector<1x1x32xf32> to vector<1x32xf32>
    %c0_43 = arith.constant 0 : index
    %c0_44 = arith.constant 0 : index
    %c0_45 = arith.constant 0 : index
    %127 = vector.load %arg11[%c0_43, %c0_44, %c0_45] : memref<1x1x32xf32, #tpu.memory_space<vmem>>, vector<1x1x32xf32>
    %128 = vector.shape_cast %127 : vector<1x1x32xf32> to vector<1x32xf32>
    %cst_46 = arith.constant dense<0.000000e+00> : vector<128xf32>
    %129 = vector.multi_reduction <add>, %124, %cst_46 [1] : vector<128x32xf32> to vector<128xf32>
    %130 = vector.shape_cast %129 : vector<128xf32> to vector<128x1xf32>
    %cst_47 = arith.constant 3.200000e+01 : f32
    %131 = vector.broadcast %cst_47 : f32 to vector<128x1xf32>
    %132 = arith.divf %130, %131 : vector<128x1xf32>
    %133 = vector.broadcast %132 : vector<128x1xf32> to vector<128x32xf32>
    %134 = arith.subf %124, %133 : vector<128x32xf32>
    %135 = arith.mulf %134, %134 : vector<128x32xf32>
    %cst_48 = arith.constant dense<0.000000e+00> : vector<128xf32>
    %136 = vector.multi_reduction <add>, %135, %cst_48 [1] : vector<128x32xf32> to vector<128xf32>
    %137 = vector.shape_cast %136 : vector<128xf32> to vector<128x1xf32>
    %cst_49 = arith.constant 3.200000e+01 : f32
    %138 = vector.broadcast %cst_49 : f32 to vector<128x1xf32>
    %139 = arith.divf %137, %138 : vector<128x1xf32>
    %cst_50 = arith.constant 9.99999974E-6 : f32
    %140 = vector.broadcast %cst_50 : f32 to vector<128x1xf32>
    %141 = arith.addf %139, %140 : vector<128x1xf32>
    %142 = math.rsqrt %141 : vector<128x1xf32>
    %143 = vector.broadcast %142 : vector<128x1xf32> to vector<128x32xf32>
    %144 = arith.mulf %134, %143 : vector<128x32xf32>
    %145 = vector.broadcast %126 : vector<1x32xf32> to vector<128x32xf32>
    %146 = arith.mulf %144, %145 : vector<128x32xf32>
    %147 = vector.broadcast %128 : vector<1x32xf32> to vector<128x32xf32>
    %148 = arith.addf %146, %147 : vector<128x32xf32>
    %149 = arith.truncf %148 : vector<128x32xf32> to vector<128x32xbf16>
    %c0_51 = arith.constant 0 : index
    %c0_52 = arith.constant 0 : index
    %c0_53 = arith.constant 0 : index
    %150 = vector.load %arg12[%c0_51, %c0_52, %c0_53] : memref<1x32x64xbf16, #tpu.memory_space<vmem>>, vector<1x32x64xbf16>
    %151 = vector.shape_cast %150 : vector<1x32x64xbf16> to vector<32x64xbf16>
    %cst_54 = arith.constant dense<0.000000e+00> : vector<128x64xf32>
    %152 = tpu.matmul %149, %151, %cst_54 {dimension_numbers = #tpu.dot_dimension_numbers<[1], [0], [0], [1], [0, 0, 1, 1], [], []>} : vector<128x32xbf16>, vector<32x64xbf16>, vector<128x64xf32> -> vector<128x64xf32>
    %c0_55 = arith.constant 0 : index
    %c0_56 = arith.constant 0 : index
    %c0_57 = arith.constant 0 : index
    %153 = vector.load %arg13[%c0_55, %c0_56, %c0_57] : memref<1x1x64xf32, #tpu.memory_space<vmem>>, vector<1x1x64xf32>
    %154 = vector.shape_cast %153 : vector<1x1x64xf32> to vector<1x64xf32>
    %155 = vector.broadcast %154 : vector<1x64xf32> to vector<128x64xf32>
    %156 = arith.addf %152, %155 : vector<128x64xf32>
    %cst_58 = arith.constant 5.000000e-01 : f32
    %157 = vector.broadcast %cst_58 : f32 to vector<128x64xf32>
    %158 = arith.mulf %157, %156 : vector<128x64xf32>
    %cst_59 = arith.constant 0.707106769 : f32
    %159 = vector.broadcast %cst_59 : f32 to vector<128x64xf32>
    %160 = arith.mulf %156, %159 : vector<128x64xf32>
    %161 = math.erf %160 : vector<128x64xf32>
    %cst_60 = arith.constant 1.000000e+00 : f32
    %162 = vector.broadcast %cst_60 : f32 to vector<128x64xf32>
    %163 = arith.addf %162, %161 : vector<128x64xf32>
    %164 = arith.mulf %158, %163 : vector<128x64xf32>
    %165 = arith.truncf %164 : vector<128x64xf32> to vector<128x64xbf16>
    %c0_61 = arith.constant 0 : index
    %c0_62 = arith.constant 0 : index
    %c0_63 = arith.constant 0 : index
    %166 = vector.load %arg14[%c0_61, %c0_62, %c0_63] : memref<1x64x32xbf16, #tpu.memory_space<vmem>>, vector<1x64x32xbf16>
    %167 = vector.shape_cast %166 : vector<1x64x32xbf16> to vector<64x32xbf16>
    %cst_64 = arith.constant dense<0.000000e+00> : vector<128x32xf32>
    %168 = tpu.matmul %165, %167, %cst_64 {dimension_numbers = #tpu.dot_dimension_numbers<[1], [0], [0], [1], [0, 0, 1, 1], [], []>} : vector<128x64xbf16>, vector<64x32xbf16>, vector<128x32xf32> -> vector<128x32xf32>
    %c0_65 = arith.constant 0 : index
    %c0_66 = arith.constant 0 : index
    %c0_67 = arith.constant 0 : index
    %169 = vector.load %arg15[%c0_65, %c0_66, %c0_67] : memref<1x1x32xf32, #tpu.memory_space<vmem>>, vector<1x1x32xf32>
    %170 = vector.shape_cast %169 : vector<1x1x32xf32> to vector<1x32xf32>
    %171 = vector.broadcast %170 : vector<1x32xf32> to vector<128x32xf32>
    %172 = arith.addf %168, %171 : vector<128x32xf32>
    %173 = arith.addf %148, %172 : vector<128x32xf32>
    %c0_68 = arith.constant 0 : index
    %c0_69 = arith.constant 0 : index
    %c0_70 = arith.constant 0 : index
    %174 = vector.load %arg16[%c0_68, %c0_69, %c0_70] : memref<1x1x32xf32, #tpu.memory_space<vmem>>, vector<1x1x32xf32>
    %175 = vector.shape_cast %174 : vector<1x1x32xf32> to vector<1x32xf32>
    %c0_71 = arith.constant 0 : index
    %c0_72 = arith.constant 0 : index
    %c0_73 = arith.constant 0 : index
    %176 = vector.load %arg17[%c0_71, %c0_72, %c0_73] : memref<1x1x32xf32, #tpu.memory_space<vmem>>, vector<1x1x32xf32>
    %177 = vector.shape_cast %176 : vector<1x1x32xf32> to vector<1x32xf32>
    %cst_74 = arith.constant dense<0.000000e+00> : vector<128xf32>
    %178 = vector.multi_reduction <add>, %173, %cst_74 [1] : vector<128x32xf32> to vector<128xf32>
    %179 = vector.shape_cast %178 : vector<128xf32> to vector<128x1xf32>
    %cst_75 = arith.constant 3.200000e+01 : f32
    %180 = vector.broadcast %cst_75 : f32 to vector<128x1xf32>
    %181 = arith.divf %179, %180 : vector<128x1xf32>
    %182 = vector.broadcast %181 : vector<128x1xf32> to vector<128x32xf32>
    %183 = arith.subf %173, %182 : vector<128x32xf32>
    %184 = arith.mulf %183, %183 : vector<128x32xf32>
    %cst_76 = arith.constant dense<0.000000e+00> : vector<128xf32>
    %185 = vector.multi_reduction <add>, %184, %cst_76 [1] : vector<128x32xf32> to vector<128xf32>
    %186 = vector.shape_cast %185 : vector<128xf32> to vector<128x1xf32>
    %cst_77 = arith.constant 3.200000e+01 : f32
    %187 = vector.broadcast %cst_77 : f32 to vector<128x1xf32>
    %188 = arith.divf %186, %187 : vector<128x1xf32>
    %cst_78 = arith.constant 9.99999974E-6 : f32
    %189 = vector.broadcast %cst_78 : f32 to vector<128x1xf32>
    %190 = arith.addf %188, %189 : vector<128x1xf32>
    %191 = math.rsqrt %190 : vector<128x1xf32>
    %192 = vector.broadcast %191 : vector<128x1xf32> to vector<128x32xf32>
    %193 = arith.mulf %183, %192 : vector<128x32xf32>
    %194 = vector.broadcast %175 : vector<1x32xf32> to vector<128x32xf32>
    %195 = arith.mulf %193, %194 : vector<128x32xf32>
    %196 = vector.broadcast %177 : vector<1x32xf32> to vector<128x32xf32>
    %197 = arith.addf %195, %196 : vector<128x32xf32>
    %c0_79 = arith.constant 0 : index
    %c0_80 = arith.constant 0 : index
    %198 = vector.load %arg19[%c0_79, %c0_80] : memref<128x32xf32, #tpu.memory_space<vmem>>, vector<128x32xf32>
    tpu.vector_store %arg19[%c0_79, %c0_80], %197 {strides = array<i32>} : memref<128x32xf32, #tpu.memory_space<vmem>>, vector<128x32xf32>,
    %199 = vector.extract_strided_slice %197 {offsets = [0, 0], sizes = [2, 32], strides = [1, 1]} : vector<128x32xf32> to vector<2x32xf32>
    %c0_81 = arith.constant 0 : index
    %c0_82 = arith.constant 0 : index
    %c0_83 = arith.constant 0 : index
    %200 = vector.load %arg18[%c0_81, %c0_82, %c0_83] : memref<1x2x32xf32, #tpu.memory_space<vmem>>, vector<1x2x32xf32>
    %201 = vector.shape_cast %200 : vector<1x2x32xf32> to vector<2x32xf32>
    %202 = vector.shape_cast %199 : vector<2x32xf32> to vector<1x2x32xf32>
    tpu.vector_store %arg18[%c0_81, %c0_82, %c0_83], %202 {strides = array<i32>} : memref<1x2x32xf32, #tpu.memory_space<vmem>>, vector<1x2x32xf32>,
    return
  }
  func.func @transform_0(%arg0: i32, %arg1: i32) -> (i32, i32, i32) {
    %c0_i32 = arith.constant 0 : i32
    %c0_i32_0 = arith.constant 0 : i32
    %c0_i32_1 = arith.constant 0 : i32
    return %arg0, %c0_i32, %c0_i32_0 : i32, i32, i32
  }
  func.func @transform_1(%arg0: i32, %arg1: i32) -> (i32, i32, i32) {
    %c0_i32 = arith.constant 0 : i32
    %c0_i32_0 = arith.constant 0 : i32
    %c0_i32_1 = arith.constant 0 : i32
    return %arg0, %c0_i32, %c0_i32_0 : i32, i32, i32
  }
  func.func @transform_2(%arg0: i32, %arg1: i32) -> (i32, i32) {
    %c0_i32 = arith.constant 0 : i32
    %c0_i32_0 = arith.constant 0 : i32
    %c0_i32_1 = arith.constant 0 : i32
    return %c0_i32, %c0_i32_0 : i32, i32
  }
  func.func @transform_3(%arg0: i32, %arg1: i32) -> (i32, i32) {
    %c0_i32 = arith.constant 0 : i32
    %c0_i32_0 = arith.constant 0 : i32
    %c0_i32_1 = arith.constant 0 : i32
    return %c0_i32, %c0_i32_0 : i32, i32
  }
  func.func @transform_4(%arg0: i32, %arg1: i32) -> (i32, i32, i32) {
    %c0_i32 = arith.constant 0 : i32
    %c0_i32_0 = arith.constant 0 : i32
    %c0_i32_1 = arith.constant 0 : i32
    return %arg1, %c0_i32, %c0_i32_0 : i32, i32, i32
  }
  func.func @transform_5(%arg0: i32, %arg1: i32) -> (i32, i32, i32) {
    %c0_i32 = arith.constant 0 : i32
    %c0_i32_0 = arith.constant 0 : i32
    %c0_i32_1 = arith.constant 0 : i32
    return %arg1, %c0_i32, %c0_i32_0 : i32, i32, i32
  }
  func.func @transform_6(%arg0: i32, %arg1: i32) -> (i32, i32, i32, i32) {
    %c0_i32 = arith.constant 0 : i32
    %c0_i32_0 = arith.constant 0 : i32
    %c0_i32_1 = arith.constant 0 : i32
    %c0_i32_2 = arith.constant 0 : i32
    return %arg1, %c0_i32, %c0_i32_0, %c0_i32_1 : i32, i32, i32, i32
  }
  func.func @transform_7(%arg0: i32, %arg1: i32) -> (i32, i32, i32) {
    %c0_i32 = arith.constant 0 : i32
    %c0_i32_0 = arith.constant 0 : i32
    %c0_i32_1 = arith.constant 0 : i32
    return %arg1, %c0_i32, %c0_i32_0 : i32, i32, i32
  }
  func.func @transform_8(%arg0: i32, %arg1: i32) -> (i32, i32, i32) {
    %c0_i32 = arith.constant 0 : i32
    %c0_i32_0 = arith.constant 0 : i32
    %c0_i32_1 = arith.constant 0 : i32
    return %arg1, %c0_i32, %c0_i32_0 : i32, i32, i32
  }
  func.func @transform_9(%arg0: i32, %arg1: i32) -> (i32, i32, i32) {
    %c0_i32 = arith.constant 0 : i32
    %c0_i32_0 = arith.constant 0 : i32
    %c0_i32_1 = arith.constant 0 : i32
    return %arg1, %c0_i32, %c0_i32_0 : i32, i32, i32
  }
  func.func @transform_10(%arg0: i32, %arg1: i32) -> (i32, i32, i32) {
    %c0_i32 = arith.constant 0 : i32
    %c0_i32_0 = arith.constant 0 : i32
    %c0_i32_1 = arith.constant 0 : i32
    return %arg1, %c0_i32, %c0_i32_0 : i32, i32, i32
  }
  func.func @transform_11(%arg0: i32, %arg1: i32) -> (i32, i32, i32) {
    %c0_i32 = arith.constant 0 : i32
    %c0_i32_0 = arith.constant 0 : i32
    %c0_i32_1 = arith.constant 0 : i32
    return %arg1, %c0_i32, %c0_i32_0 : i32, i32, i32
  }
  func.func @transform_12(%arg0: i32, %arg1: i32) -> (i32, i32, i32) {
    %c0_i32 = arith.constant 0 : i32
    %c0_i32_0 = arith.constant 0 : i32
    %c0_i32_1 = arith.constant 0 : i32
    return %arg1, %c0_i32, %c0_i32_0 : i32, i32, i32
  }
  func.func @transform_13(%arg0: i32, %arg1: i32) -> (i32, i32, i32) {
    %c0_i32 = arith.constant 0 : i32
    %c0_i32_0 = arith.constant 0 : i32
    %c0_i32_1 = arith.constant 0 : i32
    return %arg1, %c0_i32, %c0_i32_0 : i32, i32, i32
  }
  func.func @transform_14(%arg0: i32, %arg1: i32) -> (i32, i32, i32) {
    %c0_i32 = arith.constant 0 : i32
    %c0_i32_0 = arith.constant 0 : i32
    %c0_i32_1 = arith.constant 0 : i32
    return %arg1, %c0_i32, %c0_i32_0 : i32, i32, i32
  }
  func.func @transform_15(%arg0: i32, %arg1: i32) -> (i32, i32, i32) {
    %c0_i32 = arith.constant 0 : i32
    %c0_i32_0 = arith.constant 0 : i32
    %c0_i32_1 = arith.constant 0 : i32
    return %arg1, %c0_i32, %c0_i32_0 : i32, i32, i32
  }
  func.func @transform_16(%arg0: i32, %arg1: i32) -> (i32, i32, i32) {
    %c0_i32 = arith.constant 0 : i32
    %c0_i32_0 = arith.constant 0 : i32
    %c0_i32_1 = arith.constant 0 : i32
    return %arg0, %c0_i32, %c0_i32_0 : i32, i32, i32
  }
}

</mosaic_0001>

<bundles_post_ra>
// kernel: actor_agnostic_encoder_forward.1
= control target key start
LH: loop header
LB: loop body
LE: loop exit
PB: predicated region body
PF: predicated region fallthrough
CT: control target
= control target key end

     0   :  { %s5909_s21 = smov 0   ;;  %s5911_s22 = smov 0   ;;  %s7897_s0 = inlined_call_operand.vmem [shape: f32[2,8,16], index: 0, kind: input, shape index: {}]   ;;  %s7898_s1 = inlined_call_operand.vmem [shape: f32[2,1,128], index: 1, kind: input, shape index: {}]   ;;  %s7899_s2 = inlined_call_operand.vmem [shape: f32[128,32], index: 2, kind: input, shape index: {}]   ;;  %s7900_s3 = inlined_call_operand.vmem [shape: bf16[16,32], index: 3, kind: input, shape index: {}]   ;;  %s7901_s4 = inlined_call_operand.vmem [shape: bf16[2,32,96], index: 4, kind: input, shape index: {}]   ;;  %s7902_s5 = inlined_call_operand.vmem [shape: f32[2,1,96], index: 5, kind: input, shape index: {}]   ;;  %s7903_s6 = inlined_call_operand.vmem [shape: bf16[2,4,8,32], index: 6, kind: input, shape index: {}]   ;;  %s7904_s7 = inlined_call_operand.vmem [shape: f32[2,1,32], index: 7, kind: input, shape index: {}]   ;;  %s7905_s8 = inlined_call_operand.vmem [shape: f32[2,1,32], index: 8, kind: input, shape index: {}]   ;;  %s7906_s9 = inlined_call_operand.vmem [shape: f32[2,1,32], index: 9, kind: input, shape index: {}]   ;;  %s7907_s10 = inlined_call_operand.vmem [shape: bf16[2,32,64], index: 10, kind: input, shape index: {}]   ;;  %s7908_s11 = inlined_call_operand.vmem [shape: f32[2,1,64], index: 11, kind: input, shape index: {}]   ;;  %s7909_s12 = inlined_call_operand.vmem [shape: bf16[2,64,32], index: 12, kind: input, shape index: {}]   ;;  %s7910_s13 = inlined_call_operand.vmem [shape: f32[2,1,32], index: 13, kind: input, shape index: {}]   ;;  %s7911_s14 = inlined_call_operand.vmem [shape: f32[2,1,32], index: 14, kind: input, shape index: {}]   ;;  %s7912_s15 = inlined_call_operand.vmem [shape: f32[2,1,32], index: 15, kind: input, shape index: {}]   ;;  %s7913_s16 = inlined_call_operand.vmem [shape: f32[2,2,32], index: 16, kind: output, shape index: {}]  }
   0x1   :  { %7926 = sst [smem:[#allocation25_spill]] %s7897_s0  ;;  %s5913_s23 = smov 0  }
   0x2   :  { %7927 = sst [smem:[#allocation26_spill]] %s7898_s1  ;;  %s5915_s24 = smov 0  }
   0x3   :  { %7928 = sst [smem:[#allocation27_spill]] %s7899_s2  ;;  %s5917_s25 = smov 0  }
   0x4   :  { %7929 = sst [smem:[#allocation28_spill]] %s7900_s3 }
   0x5   :  { %7930 = sst [smem:[#allocation29_spill]] %s7901_s4 }
   0x6   :  { %7931 = sst [smem:[#allocation30_spill]] %s7903_s6 }
   0x7   :  { %7932 = sst [smem:[#allocation31_spill]] %s7906_s9 }
   0x8   :  { %7933 = sst [smem:[#allocation32_spill]] %s7907_s10 }
   0x9   :  { %7934 = sst [smem:[#allocation33_spill]] %s7908_s11 }
   0xa   :  { %7935 = sst [smem:[#allocation34_spill]] %s7912_s15 }
   0xb   :  { %7936 = sst [smem:[#allocation35_spill]] %s7913_s16 }
   0xc LB: > { %7937 = sst [smem:[#allocation3_spill]] %s5793_s21  ;;  %s35_s26 = sadd.s32 1, %s5801_s23  ;;  %s5809_s25 = sphi %s5917_s25, %s26_s25   ;;  %s5805_s24 = sphi %s5915_s24, %s8034_s24   ;;  %s5801_s23 = sphi %s5913_s23, %s8033_s23   ;;  %s5797_s22 = sphi %s5911_s22, %s8032_s22   ;;  %s5793_s21 = sphi %s5909_s21, %s8031_s21  }
   0xd   : > { %7938 = sst [smem:[#allocation4_spill]] %s5801_s23  ;;  %s38_s27 = sadd.s32 1, %s5805_s24 }
   0xe   : > { %7939 = sst [smem:[#allocation5_spill]] %s5805_s24  ;;  %p36_p0 = scmp.ge.s32.totalorder %s35_s26, 2 }
   0xf   : > { %7940 = sst [smem:[#allocation6_spill]] %s5809_s25  ;;  %p4583_p1 = scmp.ge.s32.totalorder %s5809_s25, 1 }
  0x10   : > { %p585_p2 = scmp.lt.s32.totalorder %s5809_s25, 5  ;;  %s8036_s26 = smov (%p36_p0, %s35_s26), 0 }
  0x11   : > { %7941 = sst [smem:[#allocation7_spill]] %s8036_s26  ;;  %s8038_s27 = smov (!%p36_p0, %s38_s27), %s5805_s24 }
  0x12   : > { %p586_p3 = pnand %p4583_p1, %p585_p2  ;;  %p40_p4 = scmp.ge.s32.totalorder %s8038_s27, 2 }
  0x14   : > { %s8040_s27 = smov (%p40_p4, %s8038_s27), 0  ;;  %589 = sbr.rel (%p586_p3) target bundleno = 3864 (0xf18), region = 84 }
  0x15   : > { %7942 = sst [smem:[#allocation8_spill]] %s8040_s27 }
  0x19   : > { %p680_p5 = scmp.lt.s32.totalorder %s5797_s22, 1  ;;  %p687_p6 = scmp.lt.s32.totalorder %s5793_s21, 1 }
  0x1a   : > { %s7943_s1 = sld [smem:[#allocation26_spill]] }
  0x1b   : > { %s8042_s22 = smov (!%p680_p5, %s5797_s22), 1  ;;  %s7945_s20 = sld [smem:[#allocation25_spill]] }
  0x1c   : > { %s5943_s28 = scalar_select %p687_p6, %s5793_s21, 1 }
  0x1d   : > { %s4584_s29 = sshll.u32 %s8042_s22, 3  ;;  %s7946_s4 = sld [smem:[#allocation29_spill]] }
  0x1e   : > { %s4704_s26 = sshll.u32 %s5943_s28, 4  ;;  %s7947_s6 = sld [smem:[#allocation30_spill]] }
  0x1f   : > { %s7949_s10 = sld [smem:[#allocation32_spill]]  ;;  %s724_s18 = scalar_lea.vmem %s7910_s13, %s5943_s28 }
  0x20   : > { %s5948_s17 = scalar_lea.vmem %s7943_s1, %s8042_s22  ;;  %s4593_s15 = sshll.u32 %s8042_s22, 1 }
  0x21   : > { %7944 = sst [smem:[#allocation9_spill]] %s5948_s17  ;;  %s683_s27 = scalar_lea.vmem %s7945_s20, %s4584_s29 }
  0x22   : > { %s727_s17 = scalar_lea.vmem %s7911_s14, %s5943_s28  ;;  %s7952_s11 = sld [smem:[#allocation35_spill]] }
  0x23   : > { %s5957_s25 = scalar_lea.vmem %s7946_s4, %s4704_s26  ;;  %s7951_s4 = sld [smem:[#allocation34_spill]] }
  0x24   : > { %s5966_s30 = scalar_lea.vmem %s7947_s6, %s4704_s26  ;;  %s4707_s6 = sshll.u32 %s5943_s28, 5 }
  0x25   : > { %s5983_s3 = scalar_lea.vmem %s7949_s10, %s4704_s26  ;;  %s5997_s20 = scalar_lea.vmem %s7909_s12, %s4707_s6 }
  0x26   : > { %s7953_s1 = sld [smem:[#allocation3_spill]] }
  0x28   : > { %s6010_s9 = scalar_lea.vmem %s7952_s11, %s4593_s15 }
  0x29   : > { %s730_s10 = scalar_lea.vmem %s7951_s4, %s5943_s28 }
  0x2c   : > { %p4594_p7 = scmp.ne.s32.totalorder %s7953_s1, 0 }
  0x2d   : > { %s7954_s29 = sld [smem:[#allocation28_spill]] (!%p4594_p7) }
  0x2e   : > { %739 = sbr.rel (%p4594_p7) target bundleno = 255 (0xff), region = 88  ;;  %s7955_s24 = sld [smem:[#allocation27_spill]] (!%p4594_p7) }
  0x33   : > { %v5393_v0 = vld [vmem:[%s7954_s29] sm:$0xff]   ;;  %v5811_v1 = vmov 0.0   ;;  %vm756_vm0 = vcmask 261120   ;;  %vm5812_vm1 = vmmov 0   ;;  %vm783_vm2 = vcmask 130048  }
  0x34   : > { %4906 = vmatprep.subr.bf16.mxu0 %v5811_v1  ;;  %v773_v2 = vld [vmem:[%s683_s27] sm:$0xff]  ;;  %s7956_s26 = smov %s7955_s24  ;;  %4908 = vmatprep.mubr.msk.bf16.mxu0 %vm5812_vm1, %v5811_v1 }
  0x35   : > { %v740_v3 = vld [vmem:[%s7955_s24] sm:$0xff]  ;;  %v741_v4 = vld [vmem:[%s7956_s26 + $0x8] sm:$0xff]  ;;  %4907 = vmatpush3.bf16.msra.mxu0 %v5393_v0  ;;  %v774_v5 = vpack.c.bf16 %v773_v2, %v773_v2  ;;  %v742_v6 = vld [vmem:[%s7956_s26 + $0x10] sm:$0xff] }
  0x36   : > { %v743_v7 = vld [vmem:[%s7956_s26 + $0x18] sm:$0xff]  ;;  %v744_v8 = vld [vmem:[%s7956_s26 + $0x20] sm:$0xff]  ;;  %757 = vst.msk [vmem:[#allocation2] sm:$0xff] %vm756_vm0, %v740_v3  ;;  %758 = vst.msk [vmem:[#allocation2 + $0x8] sm:$0xff] %vm756_vm0, %v741_v4 }
  0x37   : > { %v745_v9 = vld [vmem:[%s7956_s26 + $0x28] sm:$0xff]  ;;  %v746_v10 = vld [vmem:[%s7956_s26 + $0x30] sm:$0xff]  ;;  %v747_v11 = vld [vmem:[%s7956_s26 + $0x38] sm:$0xff]  ;;  %759 = vst.msk [vmem:[#allocation2 + $0x10] sm:$0xff] %vm756_vm0, %v742_v6 }
  0x38   : > { %760 = vst.msk [vmem:[#allocation2 + $0x18] sm:$0xff] %vm756_vm0, %v743_v7  ;;  %761 = vst.msk [vmem:[#allocation2 + $0x20] sm:$0xff] %vm756_vm0, %v744_v8  ;;  %v748_v12 = vld [vmem:[%s7956_s26 + $0x40] sm:$0xff]  ;;  %v749_v13 = vld [vmem:[%s7956_s26 + $0x48] sm:$0xff]  ;;  %4909 = vmatmul.mubr.msk.bf16.vlgmr.msra.gmra.mxu0 %vm783_vm2, %v774_v5 }
  0x39   : > { %v750_v14 = vld [vmem:[%s7956_s26 + $0x50] sm:$0xff]  ;;  %762 = vst.msk [vmem:[#allocation2 + $0x28] sm:$0xff] %vm756_vm0, %v745_v9  ;;  %763 = vst.msk [vmem:[#allocation2 + $0x30] sm:$0xff] %vm756_vm0, %v746_v10  ;;  %v751_v15 = vld [vmem:[%s7956_s26 + $0x58] sm:$0xff] }
  0x3a   : > { %764 = vst.msk [vmem:[#allocation2 + $0x38] sm:$0xff] %vm756_vm0, %v747_v11  ;;  %v752_v16 = vld [vmem:[%s7956_s26 + $0x60] sm:$0xff]  ;;  %v753_v17 = vld [vmem:[%s7956_s26 + $0x68] sm:$0xff]  ;;  %765 = vst.msk [vmem:[#allocation2 + $0x40] sm:$0xff] %vm756_vm0, %v748_v12 }
  0x3b   : > { %766 = vst.msk [vmem:[#allocation2 + $0x48] sm:$0xff] %vm756_vm0, %v749_v13  ;;  %767 = vst.msk [vmem:[#allocation2 + $0x50] sm:$0xff] %vm756_vm0, %v750_v14  ;;  %v754_v18 = vld [vmem:[%s7956_s26 + $0x70] sm:$0xff]  ;;  %v755_v19 = vld [vmem:[%s7956_s26 + $0x78] sm:$0xff] }
  0x3c   : > { %768 = vst.msk [vmem:[#allocation2 + $0x58] sm:$0xff] %vm756_vm0, %v751_v15  ;;  %769 = vst.msk [vmem:[#allocation2 + $0x60] sm:$0xff] %vm756_vm0, %v752_v16 }
  0x3d   : > { %770 = vst.msk [vmem:[#allocation2 + $0x68] sm:$0xff] %vm756_vm0, %v753_v17  ;;  %771 = vst.msk [vmem:[#allocation2 + $0x70] sm:$0xff] %vm756_vm0, %v754_v18 }
  0x3e   : > { %772 = vst.msk [vmem:[#allocation2 + $0x78] sm:$0xff] %vm756_vm0, %v755_v19 }
  0xf8   : > { %v821_v20 = vpop.f32.mrf.mxu0 }
  0xf9   : > { %v827_v21 = vadd.f32 %v821_v20, %v741_v4 }
  0xfa   : > { %v4910_v22 = vpop.f32.mrf.mxu0 }
  0xfb   : > { %828 = vst.msk [vmem:[#allocation2 + $0x8] sm:$0xff] %vm756_vm0, %v827_v21 }
  0xfc   : > { %v824_v23 = vpop.f32.mrf.mxu0 }
  0xfe   : > { %v4911_v24 = vpop.f32.mrf.mxu0 }
  0xff PF: > { %v5394_v25 = vld [vmem:[%s5957_s25 + $0x8] sm:$0xff]   ;;  %v5395_v26 = vld [vmem:[%s5957_s25] sm:$0xff]   ;;  %vm876_vm3 = vcmask 261120   ;;  %v831_v30 = vld [vmem:[#allocation2 + $0x10] sm:$0xff]  ;;  %s7957_s22 = scalar_lea.vmem %s7902_s5, %s5943_s28  ;;  %vm1065_vm4 = vcmask 64512   ;;  %s5813_s11 = smov 96  }
 0x100   : > { %4912 = vmatprep.subr.bf16.mxu0 %v5394_v25  ;;  %v829_v27 = vld [vmem:[#allocation2] sm:$0xff]  ;;  %v832_v31 = vld [vmem:[#allocation2 + $0x18] sm:$0xff]  ;;  %v834_v33 = vld [vmem:[#allocation2 + $0x28] sm:$0xff]  ;;  %s5814_s21 = smov 64   ;;  %s5815_s2 = smov 88   ;;  %vm1982_vm5 = vcmask 1043456  }
 0x101   : > { %4913 = vmatpush3.bf16.msra.mxu0 %v5394_v25  ;;  %v833_v32 = vld [vmem:[#allocation2 + $0x20] sm:$0xff]  ;;  %v846_v34 = vpack.c.bf16 %v832_v31, %v831_v30  ;;  %v835_v36 = vld [vmem:[#allocation2 + $0x30] sm:$0xff]  ;;  %v836_v37 = vld [vmem:[#allocation2 + $0x38] sm:$0xff]  ;;  %s7961_s27 = sld [smem:[#allocation9_spill]]  ;;  %s5816_s15 = smov 120   ;;  %vm3976_vm6 = vcmask 523264  }
 0x102   : > { %v830_v28 = vld [vmem:[#allocation2 + $0x8] sm:$0xff]  ;;  %4914 = vmatprep.subr.bf16.mxu0 %v5395_v26  ;;  %v847_v35 = vpack.c.bf16 %v834_v33, %v833_v32  ;;  %v837_v38 = vld [vmem:[#allocation2 + $0x40] sm:$0xff]  ;;  %v848_v40 = vpack.c.bf16 %v836_v37, %v835_v36  ;;  %v839_v42 = vld [vmem:[#allocation2 + $0x50] sm:$0xff]  ;;  %s5817_s16 = smov 56   ;;  %s5818_s1 = smov 80   ;;  %vm4384_vm7 = vcmask 254976  }
 0x103   : > { %v845_v29 = vpack.c.bf16 %v830_v28, %v829_v27  ;;  %v838_v39 = vld [vmem:[#allocation2 + $0x48] sm:$0xff]  ;;  %v840_v43 = vld [vmem:[#allocation2 + $0x58] sm:$0xff]  ;;  %v841_v44 = vld [vmem:[#allocation2 + $0x60] sm:$0xff]  ;;  %s5819_s0 = smov 112   ;;  %s5820_s6 = smov 72  }
 0x104   : > { %v849_v41 = vpack.c.bf16 %v838_v39, %v837_v38  ;;  %v842_v45 = vld [vmem:[#allocation2 + $0x68] sm:$0xff]  ;;  %v850_v46 = vpack.c.bf16 %v840_v43, %v839_v42  ;;  %v843_v48 = vld [vmem:[#allocation2 + $0x70] sm:$0xff]  ;;  %v844_v49 = vld [vmem:[#allocation2 + $0x78] sm:$0xff]  ;;  %s5821_s29 = smov 104   ;;  %s5822_s19 = smov 48  }
 0x105   : > { %4916 = vmatprep.mubr.msk.bf16.mxu0 %vm876_vm3, %v845_v29  ;;  %4915 = vmatpush3.bf16.msra.mxu0 %v5395_v26  ;;  %v851_v47 = vpack.c.bf16 %v842_v45, %v841_v44  ;;  %v852_v50 = vpack.c.bf16 %v844_v49, %v843_v48  ;;  %v4597_v52 = vld [vmem:[%s7957_s22] ss:$0 sm:$0xff]  ;;  %s5823_s23 = smov 40   ;;  %s8021_s25 = scalar_lea.vmem %s7904_s7, %s5943_s28 }
 0x106   : > { %s8024_s22 = scalar_lea.vmem %s7905_s8, %s5943_s28 }
 0x108   : > { %4917 = vmatmul.mubr.msk.bf16.vlgmr.msra.gmra.mxu0 %vm876_vm3, %v846_v34 }
 0x109   : > { %4920 = vmatprep.mubr.msk.bf16.mxu0 %vm876_vm3, %v847_v35 }
 0x110   : > { %4921 = vmatmul.mubr.msk.bf16.gmra.mxu0 %vm876_vm3, %v848_v40 }
 0x111   : > { %4924 = vmatprep.mubr.msk.bf16.mxu0 %vm876_vm3, %v849_v41 }
 0x118   : > { %4925 = vmatmul.mubr.msk.bf16.gmra.mxu0 %vm876_vm3, %v850_v46 }
 0x119   : > { %4928 = vmatprep.mubr.msk.bf16.mxu0 %vm876_vm3, %v851_v47 }
 0x120   : > { %4929 = vmatmul.mubr.msk.bf16.gmra.mxu0 %vm876_vm3, %v852_v50 }
 0x1c8   : > { %v4918_v51 = vpop.f32.mrf.mxu0 }
 0x1c9   : > { %v6097_v54 = vadd.f32 %v4918_v51, %v4597_v52 }
 0x1ca   : > { %v935_v53 = vpop.f32.mrf.mxu0 }
 0x1cb   : > { %v936_v56 = vadd.f32 %v4597_v52, %v935_v53  ;;  %v1000_v59 = vmul.f32 0.35355338, %v6097_v54 }
 0x1cc   : > { %v4919_v55 = vpop.f32.mrf.mxu0 }
 0x1cd   : > { %v6099_v57 = vadd.f32 %v4919_v55, %v4597_v52  ;;  %v998_v63 = vmul.f32 0.35355338, %v936_v56 }
 0x1ce   : > { %v938_v58 = vpop.f32.mrf.mxu0 }
 0x1cf   : > { %v1001_v60 = vmul.f32 0.35355338, %v6099_v57  ;;  %v939_v61 = vadd.f32 %v4597_v52, %v938_v58  ;;  %v6152_v51 = vpack.c.bf16 %v6099_v57, %v6097_v54 }
 0x1d0   : > { %v4922_v62 = vpop.f32.mrf.mxu0 }
 0x1d1   : > { %v6103_v0 = vpack.c.bf16 %v1001_v60, %v1000_v59  ;;  %v999_v1 = vmul.f32 0.35355338, %v939_v61  ;;  %v960_v4 = vadd.f32 %v4922_v62, %v4597_v52  ;;  %v6135_v47 = vpack.c.bf16 %v939_v61, %v936_v56  ;;  %7960 = vst [vmem:[#allocation12_spill] sm:$0xff] %v6152_v51 }
 0x1d2   : > { %v951_v2 = vpop.f32.mrf.mxu0 }
 0x1d3   : > { %v6105_v3 = vpack.c.bf16 %v999_v1, %v998_v63  ;;  %v952_v6 = vadd.f32 %v4597_v52, %v951_v2  ;;  %v1004_v9 = vmul.f32 0.35355338, %v960_v4  ;;  %7958 = vst [vmem:[#allocation10_spill] sm:$0xff] %v6135_v47 }
 0x1d4   : > { %v4923_v5 = vpop.f32.mrf.mxu0 }
 0x1d5   : > { %v963_v7 = vadd.f32 %v4923_v5, %v4597_v52  ;;  %4948 = vmatprep.mubr.msk.bf16.mxu1 %vm1065_vm4, %v6105_v3  ;;  %v1002_v13 = vmul.f32 0.35355338, %v952_v6 }
 0x1d6   : > { %v954_v8 = vpop.f32.mrf.mxu0 }
 0x1d7   : > { %v1005_v10 = vmul.f32 0.35355338, %v963_v7  ;;  %v955_v11 = vadd.f32 %v4597_v52, %v954_v8  ;;  %v6145_v50 = vpack.c.bf16 %v963_v7, %v960_v4 }
 0x1d8   : > { %v4926_v12 = vpop.f32.mrf.mxu0 }
 0x1d9   : > { %v6109_v14 = vpack.c.bf16 %v1005_v10, %v1004_v9  ;;  %v1003_v15 = vmul.f32 0.35355338, %v955_v11  ;;  %v976_v18 = vadd.f32 %v4926_v12, %v4597_v52  ;;  %v6125_v38 = vpack.c.bf16 %v955_v11, %v952_v6  ;;  %7959 = vst [vmem:[#allocation11_spill] sm:$0xff] %v6145_v50 }
 0x1da   : > { %v967_v16 = vpop.f32.mrf.mxu0 }
 0x1db   : > { %v6111_v17 = vpack.c.bf16 %v1003_v15, %v1002_v13  ;;  %v968_v20 = vadd.f32 %v4597_v52, %v967_v16  ;;  %v1008_v23 = vmul.f32 0.35355338, %v976_v18 }
 0x1dc   : > { %v4927_v19 = vpop.f32.mrf.mxu0 }
 0x1dd   : > { %v979_v21 = vadd.f32 %v4927_v19, %v4597_v52  ;;  %v1006_v28 = vmul.f32 0.35355338, %v968_v20 }
 0x1de   : > { %v970_v22 = vpop.f32.mrf.mxu0 }
 0x1df   : > { %v1009_v24 = vmul.f32 0.35355338, %v979_v21  ;;  %v6113_v25 = vpack.c.bf16 %v979_v21, %v976_v18  ;;  %v971_v26 = vadd.f32 %v4597_v52, %v970_v22  ;;  %v6208_v18 = vld [vmem:[%s7961_s27] ss:$0 sm:$0xff] }
 0x1e0   : > { %v4930_v27 = vpop.f32.mrf.mxu0 }
 0x1e1   : > { %v6115_v29 = vpack.c.bf16 %v1009_v24, %v1008_v23  ;;  %v1007_v30 = vmul.f32 0.35355338, %v971_v26  ;;  %1059 = vrot.lane.b32.xlu1 %v6113_v25, %s5813_s11  ;;  %v6121_v33 = vpack.c.bf16 %v971_v26, %v968_v20  ;;  %v992_v34 = vadd.f32 %v4930_v27, %v4597_v52 }
 0x1e2   : > { %v983_v31 = vpop.f32.mrf.mxu0 }
 0x1e3   : > { %v6119_v32 = vpack.c.bf16 %v1007_v30, %v1006_v28  ;;  %v984_v36 = vadd.f32 %v4597_v52, %v983_v31  ;;  %v1012_v40 = vmul.f32 0.35355338, %v992_v34 }
 0x1e4   : > { %v4931_v35 = vpop.f32.mrf.mxu0 }
 0x1e5   : > { %v995_v37 = vadd.f32 %v4931_v35, %v4597_v52  ;;  %1057 = vrot.lane.b32.xlu1 %v6121_v33, %s5813_s11  ;;  %v1010_v44 = vmul.f32 0.35355338, %v984_v36 }
 0x1e6   : > { %v986_v39 = vpop.f32.mrf.mxu0 }
 0x1e7   : > { %v1013_v41 = vmul.f32 0.35355338, %v995_v37  ;;  %v6127_v42 = vpack.c.bf16 %v995_v37, %v992_v34  ;;  %v987_v43 = vadd.f32 %v4597_v52, %v986_v39 }
 0x1e9   : > { %v6129_v45 = vpack.c.bf16 %v1013_v41, %v1012_v40  ;;  %v1011_v46 = vmul.f32 0.35355338, %v987_v43  ;;  %1063 = vrot.lane.b32.xlu0 %v6127_v42, %s5813_s11  ;;  %1053 = vrot.lane.b32.xlu1 %v6125_v38, %s5813_s11  ;;  %v6139_v49 = vpack.c.bf16 %v987_v43, %v984_v36 }
 0x1eb   : > { %v6137_v48 = vpack.c.bf16 %v1011_v46, %v1010_v44 }
 0x1ed   : > { %1061 = vrot.lane.b32.xlu0 %v6139_v49, %s5813_s11  ;;  %1049 = vrot.lane.b32.xlu1 %v6135_v47, %s5813_s11 }
 0x1f1   : > { %1055 = vrot.lane.b32.xlu0 %v6145_v50, %s5813_s11  ;;  %1335 = vrot.lane.b32.xlu1 %v6125_v38, %s5814_s21 }
 0x1f5   : > { %1051 = vrot.lane.b32.xlu0 %v6152_v51, %s5813_s11  ;;  %1331 = vrot.lane.b32.xlu1 %v6135_v47, %s5814_s21 }
 0x1f9   : > { %1345 = vrot.lane.b32.xlu0 %v6127_v42, %s5814_s21  ;;  %1526 = vrot.lane.b32.xlu1 %v6113_v25, %s5815_s2 }
 0x1fd   : > { %1341 = vrot.lane.b32.xlu0 %v6113_v25, %s5814_s21  ;;  %1343 = vrot.lane.b32.xlu1 %v6139_v49, %s5814_s21 }
 0x201   : > { %1339 = vrot.lane.b32.xlu0 %v6121_v33, %s5814_s21 }
 0x205   : > { %1337 = vrot.lane.b32.xlu0 %v6145_v50, %s5814_s21 }
 0x209   : > { %1333 = vrot.lane.b32.xlu0 %v6152_v51, %s5814_s21 }
 0x20d   : > { %1530 = vrot.lane.b32.xlu0 %v6127_v42, %s5815_s2 }
 0x211   : > { %1524 = vrot.lane.b32.xlu0 %v6121_v33, %s5815_s2 }
 0x215   : > { %1528 = vrot.lane.b32.xlu0 %v6139_v49, %s5815_s2 }
 0x253   : > { %v1060_v52 = vpop.permute.xlu1 %1059 }
 0x254   : > { %v1106_v4 = vsel %vm1065_vm4, %v1060_v52, 0 }
 0x257   : > { %v1058_v53 = vpop.permute.xlu1 %1057 }
 0x258   : > { %v1103_v8 = vsel %vm1065_vm4, %v1058_v53, 0 }
 0x25b   : > { %v1064_v54 = vpop.permute.xlu0 %1063  ;;  %v1054_v55 = vpop.permute.xlu1 %1053 }
 0x25c   : > { %5304 = vmatprep.subr.msk.bf16.mxu1 %vm1065_vm4, %v1064_v54  ;;  %v1112_v56 = vsel %vm1065_vm4, %v1064_v54, 0  ;;  %v1097_v12 = vsel %vm1065_vm4, %v1054_v55, 0 }
 0x25d   : > { %4933 = vmatpush3.bf16.xpose.msra.mxu1 %v1112_v56 }
 0x25f   : > { %v1062_v57 = vpop.permute.xlu0 %1061  ;;  %v1050_v58 = vpop.permute.xlu1 %1049 }
 0x260   : > { %5305 = vmatprep.subr.msk.bf16.mxu1 %vm1065_vm4, %v1062_v57  ;;  %v1109_v61 = vsel %vm1065_vm4, %v1062_v57, 0  ;;  %v1091_v16 = vsel %vm1065_vm4, %v1050_v58, 0 }
 0x263   : > { %v1056_v59 = vpop.permute.xlu0 %1055  ;;  %v1336_v60 = vpop.permute.xlu1 %1335 }
 0x264   : > { %v1100_v10 = vsel %vm1065_vm4, %v1056_v59, 0 }
 0x265   : > { %4935 = vmatpush3.bf16.xpose.msra.mxu1 %v1109_v61 }
 0x266   : > { %5306 = vmatprep.subr.msk.bf16.mxu1 %vm1065_vm4, %v1060_v52 }
 0x267   : > { %v1052_v62 = vpop.permute.xlu0 %1051  ;;  %v1332_v63 = vpop.permute.xlu1 %1331 }
 0x268   : > { %v1094_v15 = vsel %vm1065_vm4, %v1052_v62, 0 }
 0x26b   : > { %v1346_v1 = vpop.permute.xlu0 %1345  ;;  %v6176_v2 = vpop.permute.xlu1 %1526 }
 0x26c   : > { %4964 = vmatprep.subr.bf16.mxu0 %v1346_v1 }
 0x26d   : > { %4937 = vmatpush3.bf16.xpose.msra.mxu1 %v1106_v4  ;;  %4965 = vmatpush3.bf16.msra.mxu0 %v1346_v1 }
 0x26e   : > { %5307 = vmatprep.subr.msk.bf16.mxu1 %vm1065_vm4, %v1058_v53 }
 0x26f   : > { %v1342_v5 = vpop.permute.xlu0 %1341  ;;  %v1344_v6 = vpop.permute.xlu1 %1343 }
 0x270   : > { %4966 = vmatprep.subr.bf16.mxu0 %v1344_v6 }
 0x271   : > { %4967 = vmatpush3.bf16.msra.mxu0 %v1344_v6 }
 0x272   : > { %4968 = vmatprep.subr.bf16.mxu0 %v1342_v5 }
 0x273   : > { %v1340_v7 = vpop.permute.xlu0 %1339 }
 0x275   : > { %4939 = vmatpush3.bf16.xpose.msra.mxu1 %v1103_v8  ;;  %4969 = vmatpush3.bf16.msra.mxu0 %v1342_v5 }
 0x276   : > { %5308 = vmatprep.subr.msk.bf16.mxu1 %vm1065_vm4, %v1056_v59  ;;  %4970 = vmatprep.subr.bf16.mxu0 %v1340_v7 }
 0x277   : > { %v1338_v9 = vpop.permute.xlu0 %1337 }
 0x279   : > { %4971 = vmatpush3.bf16.msra.mxu0 %v1340_v7 }
 0x27a   : > { %4972 = vmatprep.subr.bf16.mxu0 %v1338_v9 }
 0x27b   : > { %v1334_v11 = vpop.permute.xlu0 %1333 }
 0x27d   : > { %4941 = vmatpush3.bf16.xpose.msra.mxu1 %v1100_v10  ;;  %4973 = vmatpush3.bf16.msra.mxu0 %v1338_v9 }
 0x27e   : > { %5309 = vmatprep.subr.msk.bf16.mxu1 %vm1065_vm4, %v1054_v55  ;;  %4974 = vmatprep.subr.bf16.mxu0 %v1336_v60 }
 0x27f   : > { %v6186_v13 = vpop.permute.xlu0 %1530 }
 0x281   : > { %4975 = vmatpush3.bf16.msra.mxu0 %v1336_v60 }
 0x282   : > { %4976 = vmatprep.subr.bf16.mxu0 %v1334_v11 }
 0x285   : > { %4943 = vmatpush3.bf16.xpose.msra.mxu1 %v1097_v12  ;;  %4977 = vmatpush3.bf16.msra.mxu0 %v1334_v11 }
 0x286   : > { %5310 = vmatprep.subr.msk.bf16.mxu1 %vm1065_vm4, %v1052_v62  ;;  %4978 = vmatprep.subr.bf16.mxu0 %v1332_v63 }
 0x289   : > { %4979 = vmatpush3.bf16.msra.mxu0 %v1332_v63  ;;  %v6298_v63 = vpop.permute.xlu0 %1524 }
 0x28a   : > { %5312 = vmatprep.subr.msk.bf16.mxu0 %vm1065_vm4, %v6186_v13 }
 0x28d   : > { %4945 = vmatpush3.bf16.xpose.msra.mxu1 %v1094_v15  ;;  %v6304_v1 = vpop.permute.xlu0 %1528 }
 0x28e   : > { %5311 = vmatprep.subr.msk.bf16.mxu1 %vm1065_vm4, %v1050_v58 }
 0x295   : > { %4947 = vmatpush3.bf16.xpose.msra.mxu1 %v1091_v16 }
 0x29c   : > { %4949 = vmatmul.mubr.msk.bf16.vlgmr.msra.gmra.mxu1 %vm1065_vm4, %v6103_v0 }
 0x29d   : > { %4952 = vmatprep.mubr.msk.bf16.mxu1 %vm1065_vm4, %v6111_v17 }
 0x2a4   : > { %4953 = vmatmul.mubr.msk.bf16.gmra.mxu1 %vm1065_vm4, %v6109_v14 }
 0x2a5   : > { %4956 = vmatprep.mubr.msk.bf16.mxu1 %vm1065_vm4, %v6119_v32 }
 0x2ac   : > { %4957 = vmatmul.mubr.msk.bf16.gmra.mxu1 %vm1065_vm4, %v6115_v29 }
 0x2ad   : > { %4960 = vmatprep.mubr.msk.bf16.mxu1 %vm1065_vm4, %v6137_v48 }
 0x2b4   : > { %4961 = vmatmul.mubr.msk.bf16.gmra.mxu1 %vm1065_vm4, %v6129_v45 }
 0x35c   : > { %v4950_v19 = vpop.f32.mrf.mxu1 }
 0x35d   : > { %v6211_v20 = vadd.f32 %v4950_v19, %v6208_v18 }
 0x35e   : > { %v1148_v21 = vpop.f32.mrf.mxu1 }
 0x35f   : > { %v6214_v22 = vadd.f32 %v6208_v18, %v1148_v21  ;;  %1215 = vmax.xlane.f32.xlu1 %v6211_v20 }
 0x360   : > { %v4951_v23 = vpop.f32.mrf.mxu1 }
 0x361   : > { %v6218_v24 = vadd.f32 %v4951_v23, %v6208_v18  ;;  %1211 = vmax.xlane.f32.xlu0 %v6214_v22 }
 0x362   : > { %v1151_v26 = vpop.f32.mrf.mxu1 }
 0x363   : > { %1217 = vmax.xlane.f32.xlu1 %v6218_v24  ;;  %v6223_v28 = vadd.f32 %v6208_v18, %v1151_v26 }
 0x364   : > { %v4954_v27 = vpop.f32.mrf.mxu1 }
 0x365   : > { %v6226_v30 = vadd.f32 %v4954_v27, %v6208_v18 }
 0x366   : > { %v1164_v31 = vpop.f32.mrf.mxu1 }
 0x367   : > { %1213 = vmax.xlane.f32.xlu1 %v6223_v28  ;;  %1223 = vmax.xlane.f32.xlu0 %v6226_v30  ;;  %v6231_v35 = vadd.f32 %v6208_v18, %v1164_v31 }
 0x368   : > { %v4955_v34 = vpop.f32.mrf.mxu1 }
 0x369   : > { %v6238_v39 = vadd.f32 %v4955_v34, %v6208_v18 }
 0x36a   : > { %v1167_v36 = vpop.f32.mrf.mxu1 }
 0x36b   : > { %v6234_v37 = vadd.f32 %v6208_v18, %v1167_v36  ;;  %1219 = vmax.xlane.f32.xlu1 %v6231_v35 }
 0x36c   : > { %v4958_v40 = vpop.f32.mrf.mxu1 }
 0x36d   : > { %1221 = vmax.xlane.f32.xlu0 %v6234_v37  ;;  %v6243_v41 = vadd.f32 %v4958_v40, %v6208_v18 }
 0x36e   : > { %v1180_v43 = vpop.f32.mrf.mxu1 }
 0x36f   : > { %1225 = vmax.xlane.f32.xlu1 %v6238_v39  ;;  %v6247_v44 = vadd.f32 %v6208_v18, %v1180_v43 }
 0x370   : > { %v4959_v46 = vpop.f32.mrf.mxu1 }
 0x371   : > { %v6251_v52 = vadd.f32 %v4959_v46, %v6208_v18 }
 0x372   : > { %v1183_v53 = vpop.f32.mrf.mxu1 }
 0x373   : > { %1231 = vmax.xlane.f32.xlu1 %v6243_v41  ;;  %v6255_v54 = vadd.f32 %v6208_v18, %v1183_v53 }
 0x374   : > { %v4962_v55 = vpop.f32.mrf.mxu1 }
 0x375   : > { %v6263_v56 = vadd.f32 %v4962_v55, %v6208_v18 }
 0x376   : > { %v1196_v57 = vpop.f32.mrf.mxu1 }
 0x377   : > { %1227 = vmax.xlane.f32.xlu1 %v6247_v44  ;;  %v6267_v58 = vadd.f32 %v6208_v18, %v1196_v57 }
 0x378   : > { %v4963_v59 = vpop.f32.mrf.mxu1 }
 0x379   : > { %v6271_v60 = vadd.f32 %v4963_v59, %v6208_v18 }
 0x37a   : > { %v1199_v61 = vpop.f32.mrf.mxu1 }
 0x37b   : > { %1233 = vmax.xlane.f32.xlu1 %v6251_v52  ;;  %v6275_v62 = vadd.f32 %v6208_v18, %v1199_v61 }
 0x37f   : > { %1229 = vmax.xlane.f32.xlu1 %v6255_v54 }
 0x383   : > { %1520 = vrot.lane.b32.xlu0 %v6125_v38, %s5815_s2 }
 0x390   : > { %1522 = vrot.lane.b32.xlu1 %v6145_v50, %s5815_s2 }
 0x3a2   : > { %1239 = vmax.xlane.f32.xlu0 %v6263_v56 }
 0x3a6   : > { %1235 = vmax.xlane.f32.xlu0 %v6267_v58 }
 0x3aa   : > { %1241 = vmax.xlane.f32.xlu0 %v6271_v60 }
 0x3b4   : > { %1237 = vmax.xlane.f32.xlu1 %v6275_v62 }
 0x3c0   : > { %1518 = vrot.lane.b32.xlu0 %v6152_v51, %s5815_s2 }
 0x3c4   : > { %1500 = vrot.lane.b32.xlu0 %v6105_v3, %s5816_s15 }
 0x3c5   : > { %1516 = vrot.lane.b32.xlu1 %v6135_v47, %s5815_s2  ;;  %s8025_s2 = sld [smem:[#allocation31_spill]] }
 0x3c8   : > { %1504 = vrot.lane.b32.xlu0 %v6111_v17, %s5816_s15 }
 0x3c9   : > { %1502 = vrot.lane.b32.xlu1 %v6103_v0, %s5816_s15 }
 0x3cc   : > { %1508 = vrot.lane.b32.xlu0 %v6119_v32, %s5816_s15 }
 0x3cd   : > { %1506 = vrot.lane.b32.xlu1 %v6109_v14, %s5816_s15 }
 0x3d0   : > { %1512 = vrot.lane.b32.xlu0 %v6137_v48, %s5816_s15 }
 0x3d1   : > { %1510 = vrot.lane.b32.xlu1 %v6115_v29, %s5816_s15 }
 0x3d4   : > { %1809 = vrot.lane.b32.xlu0 %v6139_v49, %s5817_s16 }
 0x3d5   : > { %1514 = vrot.lane.b32.xlu1 %v6129_v45, %s5816_s15 }
 0x3d8   : > { %1803 = vrot.lane.b32.xlu0 %v6145_v50, %s5817_s16 }
 0x3d9   : > { %1811 = vrot.lane.b32.xlu1 %v6127_v42, %s5817_s16 }
 0x3dd   : > { %1807 = vrot.lane.b32.xlu1 %v6113_v25, %s5817_s16 }
 0x3e1   : > { %1805 = vrot.lane.b32.xlu1 %v6121_v33, %s5817_s16 }
 0x3e5   : > { %1801 = vrot.lane.b32.xlu1 %v6125_v38, %s5817_s16 }
 0x3e8   : > { %v1216_v4 = vpop.xlane.xlu1 %1215 }
 0x3e9   : > { %v1245_v9 = vsub.f32 %v6211_v20, %v1216_v4 }
 0x3ea   : > { %v1212_v5 = vpop.xlane.xlu0 %1211 }
 0x3eb   : > { %v1243_v6 = vsub.f32 %v6214_v22, %v1212_v5  ;;  %v1263_v19 = vmul.f32 1.442695, %v1245_v9  ;;  %v1578_v5 = vsel %vm1065_vm4, %v6186_v13, 0 }
 0x3ec   : > { %v1218_v7 = vpop.xlane.xlu1 %1217 }
 0x3ed   : > { %v1246_v8 = vsub.f32 %v6218_v24, %v1218_v7  ;;  %v1259_v10 = vmul.f32 1.442695, %v1243_v6 }
 0x3ef   : > { %v1265_v11 = vmul.f32 1.442695, %v1246_v8  ;;  %5402 = vpow2.f32 %v1259_v10 }
 0x3f0   : > { %v1214_v12 = vpop.xlane.xlu1 %1213  ;;  %v1224_v16 = vpop.xlane.xlu0 %1223 }
 0x3f1   : > { %v1244_v15 = vsub.f32 %v6223_v28, %v1214_v12  ;;  %5404 = vpow2.f32 %v1265_v11  ;;  %v1249_v23 = vsub.f32 %v6226_v30, %v1224_v16  ;;  %v1575_v16 = vsel %vm1065_vm4, %v6304_v1, 0 }
 0x3f3   : > { %v1261_v21 = vmul.f32 1.442695, %v1244_v15  ;;  %v1271_v31 = vmul.f32 1.442695, %v1249_v23 }
 0x3f4   : > { %v1220_v26 = vpop.xlane.xlu1 %1219 }
 0x3f5   : > { %5406 = vpow2.f32 %v1261_v21  ;;  %v1247_v22 = vsub.f32 %v6231_v35, %v1220_v26 }
 0x3f6   : > { %5408 = vpow2.f32 %v1263_v19  ;;  %v1222_v24 = vpop.xlane.xlu0 %1221 }
 0x3f7   : > { %v1267_v27 = vmul.f32 1.442695, %v1247_v22  ;;  %v1248_v20 = vsub.f32 %v6234_v37, %v1222_v24 }
 0x3f8   : > { %v1226_v34 = vpop.xlane.xlu1 %1225 }
 0x3f9   : > { %v1269_v36 = vmul.f32 1.442695, %v1248_v20  ;;  %v1250_v28 = vsub.f32 %v6238_v39, %v1226_v34  ;;  %5410 = vpow2.f32 %v1267_v27 }
 0x3fa   : > { %v1521_v20 = vpop.permute.xlu0 %1520 }
 0x3fb   : > { %5412 = vpow2.f32 %v1269_v36  ;;  %v1273_v40 = vmul.f32 1.442695, %v1250_v28  ;;  %v1563_v34 = vsel %vm1065_vm4, %v1521_v20, 0 }
 0x3fc   : > { %5414 = vpow2.f32 %v1271_v31  ;;  %v1232_v43 = vpop.xlane.xlu1 %1231  ;;  %v6314_v30 = vpop.eup %5402 }
 0x3fd   : > { %5416 = vpow2.f32 %v1273_v40  ;;  %v1253_v4 = vsub.f32 %v6243_v41, %v1232_v43 }
 0x3fe   : > { %v6316_v35 = vpop.eup %5404 }
 0x3ff   : > { %v1279_v13 = vmul.f32 1.442695, %v1253_v4 }
 0x400   : > { %v1228_v46 = vpop.xlane.xlu1 %1227 }
 0x401   : > { %v1251_v37 = vsub.f32 %v6247_v44, %v1228_v46 }
 0x402   : > { %v6318_v53 = vpop.eup %5406 }
 0x403   : > { %v6320_v55 = vpop.eup %5408  ;;  %v1323_v39 = vpack.c.bf16 %v6318_v53, %v6314_v30  ;;  %v1275_v7 = vmul.f32 1.442695, %v1251_v37 }
 0x404   : > { %v1234_v57 = vpop.xlane.xlu1 %1233  ;;  %v1324_v59 = vpack.c.bf16 %v6316_v35, %v6320_v55 }
 0x405   : > { %v1254_v61 = vsub.f32 %v6251_v52, %v1234_v57  ;;  %4980 = vmatprep.mubr.bf16.mxu0 %v1323_v39  ;;  %5418 = vpow2.f32 %v1275_v7 }
 0x406   : > { %4981 = vmatmul.mubr.bf16.vlgmr.msra.gmra.mxu0 %v1324_v59  ;;  %v6331_v6 = vpop.eup %5410 }
 0x407   : > { %4997 = vmatpush3.bf16.xpose.msra.mxu0 %v1578_v5  ;;  %v1281_v8 = vmul.f32 1.442695, %v1254_v61 }
 0x408   : > { %v6333_v44 = vpop.eup %5412  ;;  %5313 = vmatprep.subr.msk.bf16.mxu0 %vm1065_vm4, %v6304_v1  ;;  %v1230_v9 = vpop.xlane.xlu1 %1229 }
 0x409   : > { %v6337_v10 = vpop.eup %5414  ;;  %v1252_v52 = vsub.f32 %v6255_v54, %v1230_v9  ;;  %v1325_v41 = vpack.c.bf16 %v6333_v44, %v6331_v6  ;;  %5420 = vpow2.f32 %v1281_v8  ;;  %v1572_v54 = vsel %vm1065_vm4, %v6176_v2, 0 }
 0x40a   : > { %v6342_v11 = vpop.eup %5416 }
 0x40b   : > { %v1277_v12 = vmul.f32 1.442695, %v1252_v52  ;;  %4984 = vmatprep.mubr.bf16.mxu0 %v1325_v41  ;;  %v1326_v15 = vpack.c.bf16 %v6342_v11, %v6337_v10 }
 0x40c   : > { %v1523_v24 = vpop.permute.xlu1 %1522 }
 0x40d   : > { %5422 = vpow2.f32 %v1277_v12  ;;  %v1566_v27 = vsel %vm1065_vm4, %v1523_v24, 0 }
 0x40e   : > { %5424 = vpow2.f32 %v1279_v13  ;;  %4985 = vmatmul.mubr.bf16.gmra.mxu0 %v1326_v15 }
 0x40f   : > { %4999 = vmatpush3.bf16.xpose.msra.mxu0 %v1575_v16 }
 0x410   : > { %5314 = vmatprep.subr.msk.bf16.mxu0 %vm1065_vm4, %v6176_v2  ;;  %v1569_v2 = vsel %vm1065_vm4, %v6298_v63, 0 }
 0x412   : > { %v6352_v19 = vpop.eup %5418 }
 0x416   : > { %v6356_v21 = vpop.eup %5420 }
 0x417   : > { %5001 = vmatpush3.bf16.xpose.msra.mxu0 %v1572_v54 }
 0x418   : > { %5315 = vmatprep.subr.msk.bf16.mxu0 %vm1065_vm4, %v6298_v63 }
 0x41a   : > { %v6358_v23 = vpop.eup %5422 }
 0x41b   : > { %v6360_v26 = vpop.eup %5424  ;;  %v1327_v1 = vpack.c.bf16 %v6358_v23, %v6352_v19 }
 0x41c   : > { %v1328_v22 = vpack.c.bf16 %v6356_v21, %v6360_v26 }
 0x41d   : > { %4988 = vmatprep.mubr.bf16.mxu0 %v1327_v1 }
 0x41e   : > { %4989 = vmatmul.mubr.bf16.gmra.mxu0 %v1328_v22 }
 0x41f   : > { %5003 = vmatpush3.bf16.xpose.msra.mxu0 %v1569_v2 }
 0x420   : > { %5316 = vmatprep.subr.msk.bf16.mxu0 %vm1065_vm4, %v1523_v24 }
 0x427   : > { %5005 = vmatpush3.bf16.xpose.msra.mxu0 %v1566_v27 }
 0x428   : > { %5317 = vmatprep.subr.msk.bf16.mxu0 %vm1065_vm4, %v1521_v20 }
 0x42b   : > { %v1240_v31 = vpop.xlane.xlu0 %1239 }
 0x42c   : > { %v1257_v37 = vsub.f32 %v6263_v56, %v1240_v31 }
 0x42e   : > { %v1287_v4 = vmul.f32 1.442695, %v1257_v37 }
 0x42f   : > { %5007 = vmatpush3.bf16.xpose.msra.mxu0 %v1563_v34  ;;  %v1236_v36 = vpop.xlane.xlu0 %1235 }
 0x430   : > { %v1255_v43 = vsub.f32 %v6267_v58, %v1236_v36 }
 0x432   : > { %v1283_v39 = vmul.f32 1.442695, %v1255_v43 }
 0x433   : > { %v1242_v28 = vpop.xlane.xlu0 %1241 }
 0x434   : > { %v1258_v46 = vsub.f32 %v6271_v60, %v1242_v28  ;;  %5426 = vpow2.f32 %v1283_v39 }
 0x436   : > { %v1289_v57 = vmul.f32 1.442695, %v1258_v46 }
 0x437   : > { %v1519_v40 = vpop.permute.xlu0 %1518 }
 0x438   : > { %5318 = vmatprep.subr.msk.bf16.mxu0 %vm1065_vm4, %v1519_v40  ;;  %v1560_v63 = vsel %vm1065_vm4, %v1519_v40, 0  ;;  %5428 = vpow2.f32 %v1289_v57 }
 0x439   : > { %5009 = vmatpush3.bf16.xpose.msra.mxu0 %v1560_v63 }
 0x43b   : > { %v1501_v5 = vpop.permute.xlu0 %1500 }
 0x43d   : > { %v1238_v59 = vpop.xlane.xlu1 %1237 }
 0x43e   : > { %v1256_v61 = vsub.f32 %v6275_v62, %v1238_v59 }
 0x43f   : > { %v1505_v60 = vpop.permute.xlu0 %1504 }
 0x440   : > { %v1285_v7 = vmul.f32 1.442695, %v1256_v61 }
 0x441   : > { %v1517_v58 = vpop.permute.xlu1 %1516  ;;  %v6380_v41 = vpop.eup %5426 }
 0x442   : > { %5430 = vpow2.f32 %v1285_v7  ;;  %5319 = vmatprep.subr.msk.bf16.mxu0 %vm1065_vm4, %v1517_v58  ;;  %v1557_v8 = vsel %vm1065_vm4, %v1517_v58, 0 }
 0x443   : > { %5432 = vpow2.f32 %v1287_v4  ;;  %5011 = vmatpush3.bf16.xpose.msra.mxu0 %v1557_v8  ;;  %v1509_v52 = vpop.permute.xlu0 %1508 }
 0x445   : > { %v1503_v56 = vpop.permute.xlu1 %1502  ;;  %v6382_v13 = vpop.eup %5428 }
 0x447   : > { %v1513_v54 = vpop.permute.xlu0 %1512 }
 0x449   : > { %v1507_v9 = vpop.permute.xlu1 %1506 }
 0x44b   : > { %v1810_v24 = vpop.permute.xlu0 %1809 }
 0x44d   : > { %v1511_v62 = vpop.permute.xlu1 %1510 }
 0x44f   : > { %v6384_v12 = vpop.eup %5430  ;;  %v1804_v31 = vpop.permute.xlu0 %1803 }
 0x450   : > { %v6386_v15 = vpop.eup %5432  ;;  %v1329_v16 = vpack.c.bf16 %v6384_v12, %v6380_v41 }
 0x451   : > { %v1515_v1 = vpop.permute.xlu1 %1514  ;;  %v1330_v22 = vpack.c.bf16 %v6382_v13, %v6386_v15 }
 0x452   : > { %4992 = vmatprep.mubr.bf16.mxu0 %v1329_v16 }
 0x453   : > { %4993 = vmatmul.mubr.bf16.gmra.mxu0 %v1330_v22 }
 0x454   : > { %5012 = vmatprep.mubr.msk.bf16.mxu0 %vm1065_vm4, %v1501_v5 }
 0x455   : > { %v1812_v2 = vpop.permute.xlu1 %1811 }
 0x456   : > { %5028 = vmatprep.subr.bf16.mxu1 %v1812_v2 }
 0x457   : > { %5029 = vmatpush3.bf16.msra.mxu1 %v1812_v2 }
 0x458   : > { %5030 = vmatprep.subr.bf16.mxu1 %v1810_v24 }
 0x459   : > { %v1808_v27 = vpop.permute.xlu1 %1807 }
 0x45b   : > { %5013 = vmatmul.mubr.msk.bf16.vlgmr.msra.gmra.mxu0 %vm1065_vm4, %v1503_v56  ;;  %5031 = vmatpush3.bf16.msra.mxu1 %v1810_v24 }
 0x45c   : > { %5016 = vmatprep.mubr.msk.bf16.mxu0 %vm1065_vm4, %v1505_v60  ;;  %5032 = vmatprep.subr.bf16.mxu1 %v1808_v27 }
 0x45d   : > { %v1806_v20 = vpop.permute.xlu1 %1805 }
 0x45f   : > { %5033 = vmatpush3.bf16.msra.mxu1 %v1808_v27 }
 0x460   : > { %5034 = vmatprep.subr.bf16.mxu1 %v1806_v20 }
 0x461   : > { %v1802_v34 = vpop.permute.xlu1 %1801 }
 0x463   : > { %5017 = vmatmul.mubr.msk.bf16.gmra.mxu0 %vm1065_vm4, %v1507_v9  ;;  %5035 = vmatpush3.bf16.msra.mxu1 %v1806_v20 }
 0x464   : > { %5020 = vmatprep.mubr.msk.bf16.mxu0 %vm1065_vm4, %v1509_v52  ;;  %5036 = vmatprep.subr.bf16.mxu1 %v1804_v31 }
 0x467   : > { %5037 = vmatpush3.bf16.msra.mxu1 %v1804_v31 }
 0x468   : > { %5038 = vmatprep.subr.bf16.mxu1 %v1802_v34 }
 0x46b   : > { %5021 = vmatmul.mubr.msk.bf16.gmra.mxu0 %vm1065_vm4, %v1511_v62  ;;  %5039 = vmatpush3.bf16.msra.mxu1 %v1802_v34 }
 0x46c   : > { %5024 = vmatprep.mubr.msk.bf16.mxu0 %vm1065_vm4, %v1513_v54 }
 0x473   : > { %5025 = vmatmul.mubr.msk.bf16.gmra.mxu0 %vm1065_vm4, %v1515_v1 }
 0x4c6   : > { %v6400_v36 = vpop.f32.mrf.mxu0 }
 0x4c8   : > { %v6402_v28 = vpop.f32.mrf.mxu0 }
 0x4ca   : > { %v6404_v40 = vpop.f32.mrf.mxu0 }
 0x4cc   : > { %v6406_v43 = vpop.f32.mrf.mxu0 }
 0x4ce   : > { %v6408_v63 = vpop.f32.mrf.mxu0 }
 0x4cf   : > { %7962 = vst [vmem:[#allocation13_spill] sm:$0xff] %v6408_v63 }
 0x4d0   : > { %v6410_v46 = vpop.f32.mrf.mxu0 }
 0x4d1   : > { %7963 = vst [vmem:[#allocation14_spill] sm:$0xff] %v6410_v46 }
 0x4d2   : > { %v6412_v37 = vpop.f32.mrf.mxu0 }
 0x4d3   : > { %7964 = vst [vmem:[#allocation15_spill] sm:$0xff] %v6412_v37 }
 0x4d4   : > { %v6414_v39 = vpop.f32.mrf.mxu0 }
 0x4d5   : > { %7965 = vst [vmem:[#allocation16_spill] sm:$0xff] %v6414_v39 }
 0x4de   : > { %v6416_v57 = vpop.f32.mrf.mxu0 }
 0x4df   : > { %7966 = vst [vmem:[#allocation17_spill] sm:$0xff] %v6416_v57 }
 0x4e0   : > { %v6418_v59 = vpop.f32.mrf.mxu0 }
 0x4e1   : > { %7967 = vst [vmem:[#allocation18_spill] sm:$0xff] %v6418_v59 }
 0x4e2   : > { %v6420_v61 = vpop.f32.mrf.mxu0 }
 0x4e3   : > { %7968 = vst [vmem:[#allocation19_spill] sm:$0xff] %v6420_v61 }
 0x4e4   : > { %v6422_v4 = vpop.f32.mrf.mxu0 }
 0x4e5   : > { %7969 = vst [vmem:[#allocation20_spill] sm:$0xff] %v6422_v4 }
 0x513   : > { %v6424_v5 = vpop.f32.mrf.mxu0 }
 0x514   : > { %7970 = vst [vmem:[#allocation21_spill] sm:$0xff] %v6424_v5 }
 0x515   : > { %v6426_v7 = vpop.f32.mrf.mxu0 }
 0x516   : > { %7971 = vst [vmem:[#allocation22_spill] sm:$0xff] %v6426_v7 }
 0x517   : > { %v6428_v58 = vpop.f32.mrf.mxu0 }
 0x518   : > { %7972 = vst [vmem:[#allocation23_spill] sm:$0xff] %v6428_v58 }
 0x519   : > { %v6430_v8 = vpop.f32.mrf.mxu0 }
 0x51a   : > { %7973 = vst [vmem:[#allocation24_spill] sm:$0xff] %v6430_v8 }
 0x51b   : > { %v5014_v60 = vpop.f32.mrf.mxu0 }
 0x51c   : > { %v6433_v56 = vadd.f32 %v5014_v60, %v6208_v18 }
 0x51d   : > { %v1614_v9 = vpop.f32.mrf.mxu0 }
 0x51e   : > { %1681 = vmax.xlane.f32.xlu0 %v6433_v56  ;;  %v6437_v62 = vadd.f32 %v6208_v18, %v1614_v9 }
 0x51f   : > { %v5015_v52 = vpop.f32.mrf.mxu0 }
 0x520   : > { %v6444_v1 = vadd.f32 %v5015_v52, %v6208_v18 }
 0x521   : > { %v1617_v16 = vpop.f32.mrf.mxu0 }
 0x522   : > { %v6440_v54 = vadd.f32 %v6208_v18, %v1617_v16  ;;  %1677 = vmax.xlane.f32.xlu0 %v6437_v62 }
 0x523   : > { %v5018_v22 = vpop.f32.mrf.mxu0 }
 0x524   : > { %1679 = vmax.xlane.f32.xlu1 %v6440_v54  ;;  %v6464_v5 = vadd.f32 %v5018_v22, %v6208_v18 }
 0x525   : > { %v1630_v2 = vpop.f32.mrf.mxu0 }
 0x526   : > { %1683 = vmax.xlane.f32.xlu0 %v6444_v1  ;;  %v6456_v52 = vadd.f32 %v6208_v18, %v1630_v2 }
 0x527   : > { %v5019_v24 = vpop.f32.mrf.mxu0 }
 0x528   : > { %v6472_v8 = vadd.f32 %v5019_v24, %v6208_v18 }
 0x529   : > { %v1633_v27 = vpop.f32.mrf.mxu0 }
 0x52a   : > { %v6453_v60 = vadd.f32 %v6208_v18, %v1633_v27 }
 0x52b   : > { %v5022_v20 = vpop.f32.mrf.mxu0 }
 0x52c   : > { %v6468_v27 = vadd.f32 %v5022_v20, %v6208_v18 }
 0x52d   : > { %v1646_v31 = vpop.f32.mrf.mxu0 }
 0x52e   : > { %v6460_v16 = vadd.f32 %v6208_v18, %v1646_v31 }
 0x52f   : > { %v5023_v34 = vpop.f32.mrf.mxu0 }
 0x530   : > { %v6488_v24 = vadd.f32 %v5023_v34, %v6208_v18 }
 0x531   : > { %v1649_v9 = vpop.f32.mrf.mxu0 }
 0x532   : > { %v6480_v22 = vadd.f32 %v6208_v18, %v1649_v9 }
 0x533   : > { %v5026_v58 = vpop.f32.mrf.mxu0 }
 0x534   : > { %v6484_v7 = vadd.f32 %v5026_v58, %v6208_v18 }
 0x535   : > { %1797 = vrot.lane.b32.xlu1 %v6135_v47, %s5817_s16  ;;  %v1662_v2 = vpop.f32.mrf.mxu0 }
 0x536   : > { %v6476_v31 = vadd.f32 %v6208_v18, %v1662_v2 }
 0x537   : > { %v5027_v20 = vpop.f32.mrf.mxu0 }
 0x538   : > { %v6497_v9 = vadd.f32 %v5027_v20, %v6208_v18 }
 0x539   : > { %v1665_v2 = vpop.f32.mrf.mxu0 }
 0x53a   : > { %v6493_v61 = vadd.f32 %v6208_v18, %v1665_v2 }
 0x53c   : > { %1799 = vrot.lane.b32.xlu0 %v6152_v51, %s5817_s16 }
 0x559   : > { %1687 = vmax.xlane.f32.xlu1 %v6453_v60 }
 0x55b   : > { %1685 = vmax.xlane.f32.xlu0 %v6456_v52 }
 0x55d   : > { %1693 = vmax.xlane.f32.xlu1 %v6460_v16 }
 0x55f   : > { %1689 = vmax.xlane.f32.xlu0 %v6464_v5 }
 0x561   : > { %1697 = vmax.xlane.f32.xlu1 %v6468_v27 }
 0x563   : > { %1691 = vmax.xlane.f32.xlu0 %v6472_v8 }
 0x565   : > { %1701 = vmax.xlane.f32.xlu1 %v6476_v31 }
 0x567   : > { %1695 = vmax.xlane.f32.xlu0 %v6480_v22 }
 0x569   : > { %1705 = vmax.xlane.f32.xlu1 %v6484_v7 }
 0x56b   : > { %1699 = vmax.xlane.f32.xlu0 %v6488_v24 }
 0x56f   : > { %1703 = vmax.xlane.f32.xlu0 %v6493_v61 }
 0x573   : > { %1707 = vmax.xlane.f32.xlu0 %v6497_v9 }
 0x57a   : > { %2237 = vrot.lane.b32.xlu1 %v6127_v42, %s5818_s1 }
 0x57e   : > { %2233 = vrot.lane.b32.xlu1 %v6113_v25, %s5818_s1 }
 0x582   : > { %2231 = vrot.lane.b32.xlu1 %v6121_v33, %s5818_s1 }
 0x586   : > { %2223 = vrot.lane.b32.xlu1 %v6135_v47, %s5818_s1 }
 0x589   : > { %2235 = vrot.lane.b32.xlu0 %v6139_v49, %s5818_s1 }
 0x58a   : > { %2215 = vrot.lane.b32.xlu1 %v6119_v32, %s5819_s0 }
 0x58d   : > { %2229 = vrot.lane.b32.xlu0 %v6145_v50, %s5818_s1 }
 0x58e   : > { %2219 = vrot.lane.b32.xlu1 %v6137_v48, %s5819_s0 }
 0x591   : > { %2227 = vrot.lane.b32.xlu0 %v6125_v38, %s5818_s1 }
 0x592   : > { %2835 = vrot.lane.b32.xlu1 %v6127_v42, %s5820_s6 }
 0x595   : > { %2225 = vrot.lane.b32.xlu0 %v6152_v51, %s5818_s1  ;;  %s8027_s1 = sld [smem:[#allocation33_spill]] }
 0x596   : > { %2831 = vrot.lane.b32.xlu1 %v6113_v25, %s5820_s6 }
 0x599   : > { %2207 = vrot.lane.b32.xlu0 %v6105_v3, %s5819_s0 }
 0x59d   : > { %2209 = vrot.lane.b32.xlu0 %v6103_v0, %s5819_s0 }
 0x5a1   : > { %2211 = vrot.lane.b32.xlu0 %v6111_v17, %s5819_s0 }
 0x5a5   : > { %2213 = vrot.lane.b32.xlu0 %v6109_v14, %s5819_s0 }
 0x5a7   : > { %v1682_v18 = vpop.xlane.xlu0 %1681 }
 0x5a8   : > { %v1711_v58 = vsub.f32 %v6433_v56, %v1682_v18 }
 0x5a9   : > { %2217 = vrot.lane.b32.xlu0 %v6115_v29, %s5819_s0 }
 0x5aa   : > { %v1729_v34 = vmul.f32 1.442695, %v1711_v58 }
 0x5ab   : > { %v1678_v20 = vpop.xlane.xlu0 %1677 }
 0x5ac   : > { %5434 = vpow2.f32 %v1729_v34  ;;  %v1709_v2 = vsub.f32 %v6437_v62, %v1678_v20 }
 0x5ad   : > { %v1680_v57 = vpop.xlane.xlu1 %1679  ;;  %2221 = vrot.lane.b32.xlu0 %v6129_v45, %s5819_s0  ;;  %s8028_s0 = scalar_lea.vmem %s8027_s1, %s5943_s28 }
 0x5ae   : > { %v1725_v4 = vmul.f32 1.442695, %v1709_v2  ;;  %v1710_v59 = vsub.f32 %v6440_v54, %v1680_v57  ;;  %v1022_v57 = vld [vmem:[%s5966_s30 + $0x4] sm:$0xf] }
 0x5af   : > { %v1684_v37 = vpop.xlane.xlu0 %1683 }
 0x5b0   : > { %5436 = vpow2.f32 %v1725_v4  ;;  %v1727_v63 = vmul.f32 1.442695, %v1710_v59  ;;  %v1712_v39 = vsub.f32 %v6444_v1, %v1684_v37  ;;  %v1984_v1 = vsel %vm1982_vm5, %v1022_v57, 0 }
 0x5b1   : > { %2833 = vrot.lane.b32.xlu0 %v6139_v49, %s5820_s6  ;;  %v1798_v62 = vpop.permute.xlu1 %1797 }
 0x5b2   : > { %5438 = vpow2.f32 %v1727_v63  ;;  %v1731_v56 = vmul.f32 1.442695, %v1712_v39 }
 0x5b3   : > { %v1800_v18 = vpop.permute.xlu0 %1799 }
 0x5b4   : > { %5440 = vpow2.f32 %v1731_v56  ;;  %5040 = vmatprep.subr.bf16.mxu1 %v1800_v18 }
 0x5b5   : > { %2829 = vrot.lane.b32.xlu0 %v6121_v33, %s5820_s6  ;;  %5041 = vmatpush3.bf16.msra.mxu1 %v1800_v18 }
 0x5b6   : > { %5042 = vmatprep.subr.bf16.mxu1 %v1798_v62 }
 0x5b9   : > { %v5435_v4 = vpop.eup %5434  ;;  %2825 = vrot.lane.b32.xlu0 %v6125_v38, %s5820_s6  ;;  %5043 = vmatpush3.bf16.msra.mxu1 %v1798_v62 }
 0x5ba   : > { %1761 = vadd.xlane.f32.xlu1 %v5435_v4  ;;  %5320 = vmatprep.subr.msk.bf16.mxu1 %vm1982_vm5, %v1022_v57 }
 0x5bd   : > { %v5437_v63 = vpop.eup %5436 }
 0x5be   : > { %1757 = vadd.xlane.f32.xlu1 %v5437_v63 }
 0x5bf   : > { %v5439_v37 = vpop.eup %5438 }
 0x5c0   : > { %v1789_v39 = vpack.c.bf16 %v5439_v37, %v5437_v63 }
 0x5c1   : > { %v5441_v59 = vpop.eup %5440 }
 0x5c2   : > { %5044 = vmatprep.mubr.bf16.mxu1 %v1789_v39  ;;  %v1790_v54 = vpack.c.bf16 %v5441_v59, %v5435_v4 }
 0x5c4   : > { %5045 = vmatmul.mubr.bf16.vlgmr.msra.gmra.mxu1 %v1790_v54 }
 0x5c5   : > { %5061 = vmatpush3.bf16.msra.mxu1 %v1984_v1 }
 0x5cf   : > { %2827 = vrot.lane.b32.xlu1 %v6145_v50, %s5820_s6 }
 0x5d8   : > { %1763 = vadd.xlane.f32.xlu0 %v5441_v59 }
 0x5dc   : > { %1759 = vadd.xlane.f32.xlu0 %v5439_v37 }
 0x5e2   : > { %v1688_v58 = vpop.xlane.xlu1 %1687 }
 0x5e3   : > { %v1714_v34 = vsub.f32 %v6453_v60, %v1688_v58 }
 0x5e4   : > { %v1686_v20 = vpop.xlane.xlu0 %1685 }
 0x5e5   : > { %v1735_v2 = vmul.f32 1.442695, %v1714_v34  ;;  %v1713_v56 = vsub.f32 %v6456_v52, %v1686_v20 }
 0x5e6   : > { %v1694_v18 = vpop.xlane.xlu1 %1693 }
 0x5e7   : > { %v1733_v62 = vmul.f32 1.442695, %v1713_v56  ;;  %5442 = vpow2.f32 %v1735_v2  ;;  %v1717_v54 = vsub.f32 %v6460_v16, %v1694_v18 }
 0x5e8   : > { %v1690_v4 = vpop.xlane.xlu0 %1689 }
 0x5e9   : > { %5444 = vpow2.f32 %v1733_v62  ;;  %v1715_v57 = vsub.f32 %v6464_v5, %v1690_v4  ;;  %v1741_v58 = vmul.f32 1.442695, %v1717_v54 }
 0x5ea   : > { %v1698_v63 = vpop.xlane.xlu1 %1697 }
 0x5eb   : > { %v1737_v39 = vmul.f32 1.442695, %v1715_v57  ;;  %v1719_v52 = vsub.f32 %v6468_v27, %v1698_v63 }
 0x5ec   : > { %v1692_v59 = vpop.xlane.xlu0 %1691 }
 0x5ed   : > { %5446 = vpow2.f32 %v1737_v39  ;;  %v1716_v37 = vsub.f32 %v6472_v8, %v1692_v59  ;;  %v1745_v5 = vmul.f32 1.442695, %v1719_v52 }
 0x5ee   : > { %v1702_v60 = vpop.xlane.xlu1 %1701 }
 0x5ef   : > { %v1739_v1 = vmul.f32 1.442695, %v1716_v37  ;;  %v1721_v62 = vsub.f32 %v6476_v31, %v1702_v60 }
 0x5f0   : > { %v1696_v34 = vpop.xlane.xlu0 %1695 }
 0x5f1   : > { %5448 = vpow2.f32 %v1739_v1  ;;  %v1718_v20 = vsub.f32 %v6480_v22, %v1696_v34  ;;  %v1749_v22 = vmul.f32 1.442695, %v1721_v62 }
 0x5f2   : > { %v1706_v2 = vpop.xlane.xlu1 %1705  ;;  %5450 = vpow2.f32 %v1741_v58 }
 0x5f3   : > { %v1743_v56 = vmul.f32 1.442695, %v1718_v20  ;;  %v1723_v63 = vsub.f32 %v6484_v7, %v1706_v2 }
 0x5f4   : > { %v1700_v16 = vpop.xlane.xlu0 %1699  ;;  %v5443_v18 = vpop.eup %5442 }
 0x5f5   : > { %5452 = vpow2.f32 %v1743_v56  ;;  %v1720_v8 = vsub.f32 %v6488_v24, %v1700_v16  ;;  %v1753_v24 = vmul.f32 1.442695, %v1723_v63 }
 0x5f6   : > { %v5445_v4 = vpop.eup %5444  ;;  %v6544_v57 = vpop.permute.xlu1 %2237  ;;  %5454 = vpow2.f32 %v1745_v5 }
 0x5f7   : > { %v1747_v39 = vmul.f32 1.442695, %v1720_v8  ;;  %5322 = vmatprep.subr.msk.bf16.mxu1 %vm1065_vm4, %v6544_v57  ;;  %v1791_v27 = vpack.c.bf16 %v5443_v18, %v5445_v4 }
 0x5f8   : > { %v1704_v54 = vpop.xlane.xlu0 %1703 }
 0x5f9   : > { %5456 = vpow2.f32 %v1747_v39  ;;  %v1722_v31 = vsub.f32 %v6493_v61, %v1704_v54  ;;  %5048 = vmatprep.mubr.bf16.mxu1 %v1791_v27 }
 0x5fa   : > { %v5447_v59 = vpop.eup %5446  ;;  %5458 = vpow2.f32 %v1749_v22 }
 0x5fb   : > { %v1751_v37 = vmul.f32 1.442695, %v1722_v31  ;;  %1769 = vadd.xlane.f32.xlu1 %v5447_v59 }
 0x5fc   : > { %v1708_v60 = vpop.xlane.xlu0 %1707 }
 0x5fd   : > { %5460 = vpow2.f32 %v1751_v37  ;;  %v1724_v1 = vsub.f32 %v6497_v9, %v1708_v60 }
 0x5fe   : > { %v5449_v58 = vpop.eup %5448  ;;  %5462 = vpow2.f32 %v1753_v24 }
 0x5ff   : > { %v1755_v52 = vmul.f32 1.442695, %v1724_v1  ;;  %1765 = vadd.xlane.f32.xlu1 %v5445_v4  ;;  %1771 = vadd.xlane.f32.xlu0 %v5449_v58  ;;  %v1792_v34 = vpack.c.bf16 %v5449_v58, %v5447_v59  ;;  %v5451_v7 = vpop.eup %5450  ;;  %v2234_v59 = vpop.permute.xlu1 %2233 }
 0x601   : > { %5464 = vpow2.f32 %v1755_v52  ;;  %5049 = vmatmul.mubr.bf16.gmra.mxu1 %v1792_v34 }
 0x602   : > { %v5453_v61 = vpop.eup %5452 }
 0x603   : > { %1767 = vadd.xlane.f32.xlu0 %v5443_v18  ;;  %v1793_v20 = vpack.c.bf16 %v5453_v61, %v5451_v7  ;;  %v5455_v2 = vpop.eup %5454  ;;  %v6553_v18 = vpop.permute.xlu0 %2235 }
 0x604   : > { %v6571_v24 = vpop.permute.xlu1 %2231 }
 0x605   : > { %5052 = vmatprep.mubr.bf16.mxu1 %v1793_v20 }
 0x606   : > { %v5457_v56 = vpop.eup %5456 }
 0x607   : > { %1777 = vadd.xlane.f32.xlu0 %v5455_v2  ;;  %v1794_v5 = vpack.c.bf16 %v5457_v56, %v5455_v2  ;;  %v5459_v62 = vpop.eup %5458  ;;  %v6555_v27 = vpop.permute.xlu0 %2229 }
 0x608   : > { %v6578_v1 = vpop.permute.xlu1 %2223 }
 0x609   : > { %5053 = vmatmul.mubr.bf16.gmra.mxu1 %v1794_v5 }
 0x60a   : > { %v5461_v9 = vpop.eup %5460 }
 0x60b   : > { %1773 = vadd.xlane.f32.xlu0 %v5451_v7  ;;  %1783 = vadd.xlane.f32.xlu1 %v5461_v9  ;;  %v1795_v16 = vpack.c.bf16 %v5461_v9, %v5459_v62  ;;  %v5463_v8 = vpop.eup %5462  ;;  %v6557_v22 = vpop.permute.xlu0 %2227 }
 0x60d   : > { %5056 = vmatprep.mubr.bf16.mxu1 %v1795_v16 }
 0x60e   : > { %v5465_v4 = vpop.eup %5464 }
 0x60f   : > { %1779 = vadd.xlane.f32.xlu0 %v5457_v56  ;;  %v1796_v39 = vpack.c.bf16 %v5465_v4, %v5463_v8  ;;  %v6561_v63 = vpop.permute.xlu0 %2225 }
 0x611   : > { %5057 = vmatmul.mubr.bf16.gmra.mxu1 %v1796_v39 }
 0x613   : > { %1775 = vadd.xlane.f32.xlu0 %v5453_v61  ;;  %v6563_v54 = vpop.permute.xlu0 %2207 }
 0x617   : > { %1785 = vadd.xlane.f32.xlu0 %v5463_v8  ;;  %v6567_v31 = vpop.permute.xlu0 %2209 }
 0x61b   : > { %1781 = vadd.xlane.f32.xlu0 %v5459_v62  ;;  %v6569_v37 = vpop.permute.xlu0 %2211 }
 0x61c   : > { %2823 = vrot.lane.b32.xlu1 %v6152_v51, %s5820_s6 }
 0x61f   : > { %1787 = vadd.xlane.f32.xlu0 %v5465_v4  ;;  %v6573_v60 = vpop.permute.xlu0 %2213 }
 0x635   : > { %2821 = vrot.lane.b32.xlu0 %v6135_v47, %s5820_s6 }
 0x640   : > { %1291 = vadd.xlane.f32.xlu1 %v6314_v30  ;;  %v6580_v30 = vpop.permute.xlu0 %2217 }
 0x644   : > { %1297 = vadd.xlane.f32.xlu1 %v6316_v35  ;;  %v6583_v35 = vpop.permute.xlu1 %2215  ;;  %v6585_v58 = vpop.permute.xlu0 %2221 }
 0x648   : > { %v6587_v52 = vpop.permute.xlu1 %2219  ;;  %v6589_v34 = vpop.permute.xlu0 %2833 }
 0x64c   : > { %v6591_v7 = vpop.permute.xlu1 %2835 }
 0x650   : > { %v6595_v61 = vpop.permute.xlu1 %2831 }
 0x654   : > { %1293 = vadd.xlane.f32.xlu0 %v6318_v53  ;;  %v6593_v53 = vpop.permute.xlu0 %2829  ;;  %v1762_v2 = vpop.xlane.xlu1 %1761 }
 0x655   : > { %2807 = vrot.lane.b32.xlu1 %v6103_v0, %s5821_s29 }
 0x658   : > { %1295 = vadd.xlane.f32.xlu0 %v6320_v55  ;;  %v6599_v0 = vpop.permute.xlu0 %2825  ;;  %v1021_v55 = vld [vmem:[%s5966_s30] sm:$0xf]  ;;  %v1758_v5 = vpop.xlane.xlu1 %1757 }
 0x659   : > { %5321 = vmatprep.subr.msk.bf16.mxu0 %vm1982_vm5, %v1021_v55  ;;  %v2108_v20 = vsel %vm1982_vm5, %v1021_v55, 0  ;;  %5466 = vrcp.f32 %v1758_v5 }
 0x65a   : > { %5079 = vmatpush3.bf16.msra.mxu0 %v2108_v20 }
 0x661   : > { %v1764_v56 = vpop.xlane.xlu0 %1763 }
 0x662   : > { %5468 = vrcp.f32 %v1764_v56 }
 0x665   : > { %v1760_v62 = vpop.xlane.xlu0 %1759 }
 0x666   : > { %5470 = vrcp.f32 %v1760_v62  ;;  %v5467_v16 = vpop.eup %5466 }
 0x667   : > { %5472 = vrcp.f32 %v1762_v2  ;;  %v2273_v2 = vsel %vm1065_vm4, %v6555_v27, 0 }
 0x66e   : > { %2805 = vrot.lane.b32.xlu0 %v6105_v3, %s5821_s29 }
 0x66f   : > { %v5469_v4 = vpop.eup %5468 }
 0x673   : > { %v5471_v39 = vpop.eup %5470 }
 0x674   : > { %v5473_v20 = vpop.eup %5472 }
 0x679   : > { %1299 = vadd.xlane.f32.xlu1 %v6331_v6 }
 0x67d   : > { %1305 = vadd.xlane.f32.xlu1 %v6342_v11  ;;  %v2285_v11 = vsel %vm1065_vm4, %v6544_v57, 0  ;;  %v6628_v57 = vpop.permute.xlu1 %2827 }
 0x684   : > { %v5046_v3 = vpop.f32.mrf.mxu1 }
 0x685   : > { %v1923_v46 = vmul.f32 %v5473_v20, %v5046_v3 }
 0x686   : > { %v1855_v9 = vpop.f32.mrf.mxu1 }
 0x687   : > { %v1919_v47 = vmul.f32 %v5467_v16, %v1855_v9 }
 0x688   : > { %v5047_v8 = vpop.f32.mrf.mxu1 }
 0x689   : > { %v1925_v55 = vmul.f32 %v5469_v4, %v5047_v8 }
 0x68a   : > { %v1858_v51 = vpop.f32.mrf.mxu1 }
 0x68b   : > { %v1921_v50 = vmul.f32 %v5471_v39, %v1858_v51  ;;  %v1951_v56 = vpack.c.bf16 %v1925_v55, %v1923_v46  ;;  %v2279_v51 = vsel %vm1065_vm4, %v2234_v59, 0  ;;  %v2276_v46 = vsel %vm1065_vm4, %v6571_v24, 0 }
 0x68d   : > { %v1950_v6 = vpack.c.bf16 %v1921_v50, %v1919_v47  ;;  %1301 = vadd.xlane.f32.xlu0 %v6333_v44  ;;  %v1772_v47 = vpop.xlane.xlu0 %1771  ;;  %v2282_v50 = vsel %vm1065_vm4, %v6553_v18, 0 }
 0x68e   : > { %2811 = vrot.lane.b32.xlu1 %v6109_v14, %s5821_s29 }
 0x68f   : > { %5062 = vmatprep.mubr.msk.bf16.mxu1 %vm1065_vm4, %v1950_v6 }
 0x690   : > { %5063 = vmatmul.mubr.msk.bf16.vlgmr.msra.gmra.mxu1 %vm1065_vm4, %v1951_v56 }
 0x691   : > { %5097 = vmatpush3.bf16.xpose.msra.mxu1 %v2285_v11  ;;  %1303 = vadd.xlane.f32.xlu0 %v6337_v10  ;;  %v1768_v14 = vpop.xlane.xlu0 %1767  ;;  %v2264_v11 = vsel %vm1065_vm4, %v6578_v1, 0 }
 0x692   : > { %5323 = vmatprep.subr.msk.bf16.mxu1 %vm1065_vm4, %v6553_v18 }
 0x695   : > { %v1778_v44 = vpop.xlane.xlu0 %1777 }
 0x699   : > { %5099 = vmatpush3.bf16.xpose.msra.mxu1 %v2282_v50  ;;  %v1774_v10 = vpop.xlane.xlu0 %1773 }
 0x69a   : > { %5324 = vmatprep.subr.msk.bf16.mxu1 %vm1065_vm4, %v2234_v59  ;;  %v1770_v59 = vpop.xlane.xlu1 %1769 }
 0x69d   : > { %v1780_v18 = vpop.xlane.xlu0 %1779 }
 0x69e   : > { %v1766_v5 = vpop.xlane.xlu1 %1765 }
 0x69f   : > { %5474 = vrcp.f32 %v1766_v5 }
 0x6a0   : > { %5476 = vrcp.f32 %v1772_v47 }
 0x6a1   : > { %5101 = vmatpush3.bf16.xpose.msra.mxu1 %v2279_v51  ;;  %5478 = vrcp.f32 %v1768_v14 }
 0x6a2   : > { %5325 = vmatprep.subr.msk.bf16.mxu1 %vm1065_vm4, %v6571_v24  ;;  %v2270_v24 = vsel %vm1065_vm4, %v6557_v22, 0  ;;  %5480 = vrcp.f32 %v1770_v59  ;;  %v1784_v9 = vpop.xlane.xlu1 %1783 }
 0x6a3   : > { %5482 = vrcp.f32 %v1774_v10 }
 0x6a4   : > { %5484 = vrcp.f32 %v1780_v18 }
 0x6a7   : > { %2809 = vrot.lane.b32.xlu0 %v6111_v17, %s5821_s29  ;;  %v1776_v17 = vpop.xlane.xlu0 %1775 }
 0x6a8   : > { %5486 = vrcp.f32 %v1776_v17 }
 0x6a9   : > { %5103 = vmatpush3.bf16.xpose.msra.mxu1 %v2276_v46  ;;  %5488 = vrcp.f32 %v1778_v44 }
 0x6aa   : > { %5326 = vmatprep.subr.msk.bf16.mxu1 %vm1065_vm4, %v6555_v27  ;;  %5490 = vrcp.f32 %v1784_v9 }
 0x6ab   : > { %v1786_v62 = vpop.xlane.xlu0 %1785 }
 0x6ac   : > { %v5475_v3 = vpop.eup %5474 }
 0x6ad   : > { %v5477_v8 = vpop.eup %5476 }
 0x6ae   : > { %v5479_v39 = vpop.eup %5478 }
 0x6af   : > { %v1782_v27 = vpop.xlane.xlu0 %1781 }
 0x6b1   : > { %5105 = vmatpush3.bf16.xpose.msra.mxu1 %v2273_v2 }
 0x6b2   : > { %5327 = vmatprep.subr.msk.bf16.mxu1 %vm1065_vm4, %v6557_v22  ;;  %1307 = vadd.xlane.f32.xlu1 %v6352_v19  ;;  %v2267_v19 = vsel %vm1065_vm4, %v6561_v63, 0 }
 0x6b3   : > { %v1788_v4 = vpop.xlane.xlu0 %1787 }
 0x6b4   : > { %5492 = vrcp.f32 %v1788_v4 }
 0x6b5   : > { %5494 = vrcp.f32 %v1782_v27 }
 0x6b6   : > { %1313 = vadd.xlane.f32.xlu1 %v6356_v21  ;;  %5496 = vrcp.f32 %v1786_v62 }
 0x6b9   : > { %5107 = vmatpush3.bf16.xpose.msra.mxu1 %v2270_v24 }
 0x6ba   : > { %5328 = vmatprep.subr.msk.bf16.mxu1 %vm1065_vm4, %v6561_v63  ;;  %v5481_v63 = vpop.eup %5480 }
 0x6bb   : > { %v5483_v51 = vpop.eup %5482 }
 0x6c1   : > { %5109 = vmatpush3.bf16.xpose.msra.mxu1 %v2267_v19  ;;  %v5050_v21 = vpop.f32.mrf.mxu1 }
 0x6c2   : > { %5329 = vmatprep.subr.msk.bf16.mxu1 %vm1065_vm4, %v6578_v1  ;;  %v1931_v47 = vmul.f32 %v5481_v63, %v5050_v21  ;;  %v5485_v1 = vpop.eup %5484  ;;  %v6658_v63 = vpop.permute.xlu0 %2821 }
 0x6c3   : > { %v1871_v22 = vpop.f32.mrf.mxu1  ;;  %v5487_v10 = vpop.eup %5486 }
 0x6c4   : > { %v1927_v6 = vmul.f32 %v5475_v3, %v1871_v22  ;;  %v5489_v59 = vpop.eup %5488 }
 0x6c5   : > { %v5051_v16 = vpop.f32.mrf.mxu1  ;;  %v5491_v21 = vpop.eup %5490 }
 0x6c6   : > { %1309 = vadd.xlane.f32.xlu0 %v6358_v23  ;;  %v1933_v55 = vmul.f32 %v5477_v8, %v5051_v16  ;;  %v5493_v3 = vpop.eup %5492 }
 0x6c7   : > { %v1874_v20 = vpop.f32.mrf.mxu1  ;;  %2815 = vrot.lane.b32.xlu1 %v6115_v29, %s5821_s29  ;;  %v5495_v9 = vpop.eup %5494 }
 0x6c8   : > { %v1929_v56 = vmul.f32 %v5479_v39, %v1874_v20  ;;  %v1953_v29 = vpack.c.bf16 %v1933_v55, %v1931_v47  ;;  %v5497_v39 = vpop.eup %5496 }
 0x6c9   : > { %5111 = vmatpush3.bf16.xpose.msra.mxu1 %v2264_v11  ;;  %v5054_v50 = vpop.f32.mrf.mxu1 }
 0x6ca   : > { %v1952_v14 = vpack.c.bf16 %v1929_v56, %v1927_v6  ;;  %5331 = vmatprep.subr.msk.bf16.mxu1 %vm1065_vm4, %v6591_v7  ;;  %1311 = vadd.xlane.f32.xlu0 %v6360_v26  ;;  %v1939_v5 = vmul.f32 %v5489_v59, %v5054_v50  ;;  %v6654_v26 = vpop.permute.xlu1 %2823 }
 0x6cb   : > { %v1887_v23 = vpop.f32.mrf.mxu1 }
 0x6cc   : > { %5066 = vmatprep.mubr.msk.bf16.mxu1 %vm1065_vm4, %v1952_v14  ;;  %v1935_v2 = vmul.f32 %v5483_v51, %v1887_v23 }
 0x6cd   : > { %v5055_v44 = vpop.f32.mrf.mxu1  ;;  %5067 = vmatmul.mubr.msk.bf16.gmra.mxu1 %vm1065_vm4, %v1953_v29  ;;  %v2883_v29 = vsel %vm1065_vm4, %v6591_v7, 0 }
 0x6ce   : > { %v1941_v46 = vmul.f32 %v5485_v1, %v5055_v44  ;;  %v1292_v16 = vpop.xlane.xlu1 %1291 }
 0x6cf   : > { %v1890_v18 = vpop.f32.mrf.mxu1  ;;  %5498 = vrcp.f32 %v1292_v16 }
 0x6d0   : > { %v1937_v17 = vmul.f32 %v5487_v10, %v1890_v18  ;;  %v1955_v62 = vpack.c.bf16 %v1941_v46, %v1939_v5  ;;  %v7975_v10 = vld [vmem:[#allocation16_spill] sm:$0xff] }
 0x6d1   : > { %v5058_v24 = vpop.f32.mrf.mxu1 }
 0x6d2   : > { %v1954_v27 = vpack.c.bf16 %v1937_v17, %v1935_v2  ;;  %v1947_v6 = vmul.f32 %v5497_v39, %v5058_v24  ;;  %v1298_v47 = vpop.xlane.xlu1 %1297  ;;  %v7976_v2 = vld [vmem:[#allocation11_spill] sm:$0xff]  ;;  %v7977_v17 = vld [vmem:[#allocation13_spill] sm:$0xff]  ;;  %v7979_v39 = vld [vmem:[#allocation18_spill] sm:$0xff] }
 0x6d3   : > { %v1903_v19 = vpop.f32.mrf.mxu1  ;;  %v7978_v24 = vld [vmem:[#allocation15_spill] sm:$0xff] }
 0x6d4   : > { %5070 = vmatprep.mubr.msk.bf16.mxu1 %vm1065_vm4, %v1954_v27  ;;  %v1943_v55 = vmul.f32 %v5495_v9, %v1903_v19 }
 0x6d5   : > { %v5059_v22 = vpop.f32.mrf.mxu1  ;;  %5071 = vmatmul.mubr.msk.bf16.gmra.mxu1 %vm1065_vm4, %v1955_v62 }
 0x6d6   : > { %v1949_v8 = vmul.f32 %v5493_v3, %v5059_v22 }
 0x6d7   : > { %v1906_v4 = vpop.f32.mrf.mxu1 }
 0x6d8   : > { %v1945_v20 = vmul.f32 %v5491_v21, %v1906_v4  ;;  %v1957_v11 = vpack.c.bf16 %v1949_v8, %v1947_v6 }
 0x6da   : > { %v1956_v56 = vpack.c.bf16 %v1945_v20, %v1943_v55  ;;  %v7980_v20 = vld [vmem:[#allocation20_spill] sm:$0xff] }
 0x6dc   : > { %5074 = vmatprep.mubr.msk.bf16.mxu1 %vm1065_vm4, %v1956_v56 }
 0x6dd   : > { %5075 = vmatmul.mubr.msk.bf16.gmra.mxu1 %vm1065_vm4, %v1957_v11  ;;  %v1294_v50 = vpop.xlane.xlu0 %1293 }
 0x6de   : > { %5500 = vrcp.f32 %v1294_v50  ;;  %5112 = vmatprep.mubr.msk.bf16.mxu1 %vm1065_vm4, %v6563_v54  ;;  %v5499_v54 = vpop.eup %5498 }
 0x6df   : > { %5502 = vrcp.f32 %v1298_v47  ;;  %v7981_v47 = vld [vmem:[#allocation17_spill] sm:$0xff] }
 0x6e0   : > { %2813 = vrot.lane.b32.xlu0 %v6119_v32, %s5821_s29  ;;  %v1453_v32 = vmul.f32 %v5499_v54, %v6402_v28 }
 0x6e1   : > { %v1296_v14 = vpop.xlane.xlu0 %1295 }
 0x6e2   : > { %5504 = vrcp.f32 %v1296_v14  ;;  %v7982_v14 = vld [vmem:[#allocation19_spill] sm:$0xff] }
 0x6e5   : > { %5113 = vmatmul.mubr.msk.bf16.vlgmr.msra.gmra.mxu1 %vm1065_vm4, %v6567_v31  ;;  %v2880_v31 = vsel %vm1065_vm4, %v6589_v34, 0 }
 0x6e6   : > { %5179 = vmatpush3.bf16.xpose.msra.mxu1 %v2883_v29  ;;  %5116 = vmatprep.mubr.msk.bf16.mxu1 %vm1065_vm4, %v6569_v37 }
 0x6e7   : > { %5332 = vmatprep.subr.msk.bf16.mxu1 %vm1065_vm4, %v6589_v34 }
 0x6eb   : > { %v5501_v23 = vpop.eup %5500  ;;  %1315 = vadd.xlane.f32.xlu1 %v6380_v41 }
 0x6ec   : > { %v1455_v51 = vmul.f32 %v5501_v23, %v6406_v43  ;;  %v5503_v44 = vpop.eup %5502 }
 0x6ed   : > { %5117 = vmatmul.mubr.msk.bf16.gmra.mxu1 %vm1065_vm4, %v6573_v60  ;;  %v1459_v41 = vmul.f32 %v5503_v44, %v6404_v40  ;;  %v2877_v60 = vsel %vm1065_vm4, %v6595_v61, 0  ;;  %v2871_v40 = vsel %vm1065_vm4, %v6628_v57, 0 }
 0x6ee   : > { %5181 = vmatpush3.bf16.xpose.msra.mxu1 %v2880_v31  ;;  %5120 = vmatprep.mubr.msk.bf16.mxu1 %vm1065_vm4, %v6583_v35  ;;  %v1484_v37 = vpack.c.bf16 %v1455_v51, %v1453_v32  ;;  %v2865_v35 = vsel %vm1065_vm4, %v6654_v26, 0 }
 0x6ef   : > { %v5505_v7 = vpop.eup %5504  ;;  %5333 = vmatprep.subr.msk.bf16.mxu1 %vm1065_vm4, %v6595_v61  ;;  %1321 = vadd.xlane.f32.xlu1 %v6382_v13  ;;  %v2806_v13 = vpop.permute.xlu0 %2805 }
 0x6f0   : > { %v1457_v28 = vmul.f32 %v5505_v7, %v6400_v36  ;;  %5080 = vmatprep.mubr.msk.bf16.mxu0 %vm1065_vm4, %v1484_v37  ;;  %v2874_v36 = vsel %vm1065_vm4, %v6593_v53, 0 }
 0x6f2   : > { %v1485_v43 = vpack.c.bf16 %v1459_v41, %v1457_v28 }
 0x6f4   : > { %5081 = vmatmul.mubr.msk.bf16.vlgmr.msra.gmra.mxu0 %vm1065_vm4, %v1485_v43 }
 0x6f5   : > { %5121 = vmatmul.mubr.msk.bf16.gmra.mxu1 %vm1065_vm4, %v6580_v30  ;;  %v2868_v30 = vsel %vm1065_vm4, %v6599_v0, 0 }
 0x6f6   : > { %5183 = vmatpush3.bf16.xpose.msra.mxu1 %v2877_v60  ;;  %5124 = vmatprep.mubr.msk.bf16.mxu1 %vm1065_vm4, %v6587_v52 }
 0x6f7   : > { %5334 = vmatprep.subr.msk.bf16.mxu1 %vm1065_vm4, %v6593_v53  ;;  %v2862_v53 = vsel %vm1065_vm4, %v6658_v63, 0 }
 0x6fd   : > { %5125 = vmatmul.mubr.msk.bf16.gmra.mxu1 %vm1065_vm4, %v6585_v58 }
 0x6fe   : > { %5185 = vmatpush3.bf16.xpose.msra.mxu1 %v2874_v36  ;;  %5194 = vmatprep.mubr.msk.bf16.mxu1 %vm1065_vm4, %v2806_v13 }
 0x6ff   : > { %5335 = vmatprep.subr.msk.bf16.mxu1 %vm1065_vm4, %v6628_v57  ;;  %1317 = vadd.xlane.f32.xlu0 %v6384_v12  ;;  %v2808_v12 = vpop.permute.xlu1 %2807 }
 0x700   : > { %2518 = vrot.lane.b32.xlu1 %v6127_v42, %s5822_s19 }
 0x703   : > { %1319 = vadd.xlane.f32.xlu0 %v6386_v15  ;;  %v1300_v15 = vpop.xlane.xlu1 %1299 }
 0x704   : > { %2512 = vrot.lane.b32.xlu1 %v6121_v33, %s5822_s19  ;;  %5506 = vrcp.f32 %v1300_v15 }
 0x706   : > { %5187 = vmatpush3.bf16.xpose.msra.mxu1 %v2871_v40 }
 0x707   : > { %5336 = vmatprep.subr.msk.bf16.mxu1 %vm1065_vm4, %v6599_v0  ;;  %v1306_v58 = vpop.xlane.xlu1 %1305 }
 0x708   : > { %2508 = vrot.lane.b32.xlu1 %v6125_v38, %s5822_s19 }
 0x70b   : > { %v2812_v62 = vpop.permute.xlu1 %2811 }
 0x70e   : > { %5189 = vmatpush3.bf16.xpose.msra.mxu1 %v2868_v30 }
 0x70f   : > { %5337 = vmatprep.subr.msk.bf16.mxu1 %vm1065_vm4, %v6654_v26 }
 0x711   : > { %v5507_v61 = vpop.eup %5506 }
 0x716   : > { %5191 = vmatpush3.bf16.xpose.msra.mxu1 %v2865_v35  ;;  %v1302_v52 = vpop.xlane.xlu0 %1301 }
 0x717   : > { %5338 = vmatprep.subr.msk.bf16.mxu1 %vm1065_vm4, %v6658_v63  ;;  %5508 = vrcp.f32 %v1302_v52  ;;  %v7983_v52 = vld [vmem:[#allocation22_spill] sm:$0xff] }
 0x718   : > { %5510 = vrcp.f32 %v1306_v58 }
 0x719   : > { %2817 = vrot.lane.b32.xlu0 %v6137_v48, %s5821_s29  ;;  %v7974_v48 = vld [vmem:[#allocation14_spill] sm:$0xff] }
 0x71a   : > { %v1304_v34 = vpop.xlane.xlu0 %1303  ;;  %v1461_v1 = vmul.f32 %v5507_v61, %v7974_v48 }
 0x71b   : > { %5512 = vrcp.f32 %v1304_v34 }
 0x71d   : > { %2819 = vrot.lane.b32.xlu0 %v6129_v45, %s5821_s29 }
 0x71e   : > { %5193 = vmatpush3.bf16.xpose.msra.mxu1 %v2862_v53  ;;  %v2810_v57 = vpop.permute.xlu0 %2809  ;;  %v7984_v53 = vld [vmem:[#allocation24_spill] sm:$0xff] }
 0x721   : > { %2516 = vrot.lane.b32.xlu0 %v6139_v49, %s5822_s19 }
 0x724   : > { %v5509_v0 = vpop.eup %5508 }
 0x725   : > { %5195 = vmatmul.mubr.msk.bf16.vlgmr.msra.gmra.mxu1 %vm1065_vm4, %v2808_v12  ;;  %2514 = vrot.lane.b32.xlu0 %v6113_v25, %s5822_s19  ;;  %v1463_v46 = vmul.f32 %v5509_v0, %v7975_v10  ;;  %v5511_v45 = vpop.eup %5510 }
 0x726   : > { %5198 = vmatprep.mubr.msk.bf16.mxu1 %vm1065_vm4, %v2810_v57  ;;  %v1467_v27 = vmul.f32 %v5511_v45, %v7978_v24  ;;  %v7987_v45 = vld [vmem:[#allocation21_spill] sm:$0xff] }
 0x727   : > { %v1486_v18 = vpack.c.bf16 %v1463_v46, %v1461_v1 }
 0x728   : > { %v5513_v59 = vpop.eup %5512 }
 0x729   : > { %2510 = vrot.lane.b32.xlu0 %v7976_v2, %s5822_s19  ;;  %5084 = vmatprep.mubr.msk.bf16.mxu0 %vm1065_vm4, %v1486_v18  ;;  %v1465_v5 = vmul.f32 %v5513_v59, %v7977_v17  ;;  %v7988_v59 = vld [vmem:[#allocation23_spill] sm:$0xff] }
 0x72b   : > { %v1487_v26 = vpack.c.bf16 %v1467_v27, %v1465_v5 }
 0x72d   : > { %5199 = vmatmul.mubr.msk.bf16.gmra.mxu1 %vm1065_vm4, %v2812_v62  ;;  %5085 = vmatmul.mubr.msk.bf16.gmra.mxu0 %vm1065_vm4, %v1487_v26 }
 0x73b   : > { %v1308_v19 = vpop.xlane.xlu1 %1307 }
 0x73c   : > { %5514 = vrcp.f32 %v1308_v19 }
 0x73f   : > { %v1314_v21 = vpop.xlane.xlu1 %1313 }
 0x743   : > { %v2816_v16 = vpop.permute.xlu1 %2815 }
 0x749   : > { %v5515_v8 = vpop.eup %5514 }
 0x74a   : > { %v1469_v55 = vmul.f32 %v5515_v8, %v7979_v39 }
 0x74f   : > { %v1310_v22 = vpop.xlane.xlu0 %1309 }
 0x750   : > { %5516 = vrcp.f32 %v1310_v22  ;;  %v6754_v44 = vpop.f32.mrf.mxu1 }
 0x751   : > { %5518 = vrcp.f32 %v1314_v21 }
 0x752   : > { %v6756_v31 = vpop.f32.mrf.mxu1 }
 0x753   : > { %v1312_v3 = vpop.xlane.xlu0 %1311 }
 0x754   : > { %5520 = vrcp.f32 %v1312_v3  ;;  %v6758_v37 = vpop.f32.mrf.mxu1 }
 0x756   : > { %v6760_v41 = vpop.f32.mrf.mxu1 }
 0x757   : > { %v2814_v9 = vpop.permute.xlu0 %2813 }
 0x758   : > { %5202 = vmatprep.mubr.msk.bf16.mxu1 %vm1065_vm4, %v2814_v9 }
 0x759   : > { %5203 = vmatmul.mubr.msk.bf16.gmra.mxu1 %vm1065_vm4, %v2816_v16  ;;  %v6795_v16 = vld [vmem:[%s7961_s27] ss:$0 sm:$0xff]  ;;  %s8026_s27 = scalar_lea.vmem %s8025_s2, %s5943_s28 }
 0x75d   : > { %v5517_v4 = vpop.eup %5516 }
 0x75e   : > { %v1471_v63 = vmul.f32 %v5517_v4, %v7980_v20  ;;  %v5519_v6 = vpop.eup %5518 }
 0x75f   : > { %v1475_v29 = vmul.f32 %v5519_v6, %v7982_v14 }
 0x760   : > { %v1488_v56 = vpack.c.bf16 %v1471_v63, %v1469_v55 }
 0x761   : > { %v5521_v11 = vpop.eup %5520 }
 0x762   : > { %5088 = vmatprep.mubr.msk.bf16.mxu0 %vm1065_vm4, %v1488_v56  ;;  %v1473_v50 = vmul.f32 %v5521_v11, %v7981_v47 }
 0x764   : > { %v1489_v54 = vpack.c.bf16 %v1475_v29, %v1473_v50 }
 0x766   : > { %5089 = vmatmul.mubr.msk.bf16.gmra.mxu0 %vm1065_vm4, %v1489_v54 }
 0x774   : > { %v1316_v23 = vpop.xlane.xlu1 %1315 }
 0x775   : > { %5522 = vrcp.f32 %v1316_v23 }
 0x778   : > { %v1322_v32 = vpop.xlane.xlu1 %1321 }
 0x77c   : > { %v2519_v51 = vpop.permute.xlu1 %2518 }
 0x77d   : > { %5128 = vmatprep.subr.bf16.mxu0 %v2519_v51 }
 0x77e   : > { %5129 = vmatpush3.bf16.msra.mxu0 %v2519_v51 }
 0x780   : > { %v2513_v26 = vpop.permute.xlu1 %2512 }
 0x782   : > { %v5523_v12 = vpop.eup %5522 }
 0x783   : > { %v1477_v34 = vmul.f32 %v5523_v12, %v7983_v52 }
 0x784   : > { %v2509_v9 = vpop.permute.xlu1 %2508 }
 0x788   : > { %v1318_v7 = vpop.xlane.xlu0 %1317 }
 0x789   : > { %5524 = vrcp.f32 %v1318_v7 }
 0x78a   : > { %5526 = vrcp.f32 %v1322_v32 }
 0x78c   : > { %v1320_v28 = vpop.xlane.xlu0 %1319 }
 0x78d   : > { %5528 = vrcp.f32 %v1320_v28  ;;  %v6762_v43 = vpop.f32.mrf.mxu1 }
 0x78f   : > { %v6764_v60 = vpop.f32.mrf.mxu1 }
 0x790   : > { %v2818_v13 = vpop.permute.xlu0 %2817 }
 0x791   : > { %v6766_v36 = vpop.f32.mrf.mxu1  ;;  %5206 = vmatprep.mubr.msk.bf16.mxu1 %vm1065_vm4, %v2818_v13 }
 0x793   : > { %v6769_v40 = vpop.f32.mrf.mxu1 }
 0x794   : > { %v2820_v30 = vpop.permute.xlu0 %2819 }
 0x795   : > { %v6771_v15 = vpop.f32.mrf.mxu1  ;;  %5207 = vmatmul.mubr.msk.bf16.gmra.mxu1 %vm1065_vm4, %v2820_v30 }
 0x796   : > { %v5525_v35 = vpop.eup %5524 }
 0x797   : > { %v6774_v58 = vpop.f32.mrf.mxu1  ;;  %v1479_v61 = vmul.f32 %v5525_v35, %v7984_v53  ;;  %v5527_v0 = vpop.eup %5526 }
 0x798   : > { %v2517_v57 = vpop.permute.xlu0 %2516  ;;  %v1483_v17 = vmul.f32 %v5527_v0, %v7988_v59 }
 0x799   : > { %v6778_v48 = vpop.f32.mrf.mxu1  ;;  %5130 = vmatprep.subr.bf16.mxu0 %v2517_v57  ;;  %v1490_v1 = vpack.c.bf16 %v1479_v61, %v1477_v34 }
 0x79a   : > { %7985 = vst [vmem:[#allocation14_spill] sm:$0xff] %v6778_v48  ;;  %v5529_v10 = vpop.eup %5528  ;;  %5131 = vmatpush3.bf16.msra.mxu0 %v2517_v57 }
 0x79b   : > { %v6780_v46 = vpop.f32.mrf.mxu1  ;;  %5092 = vmatprep.mubr.msk.bf16.mxu0 %vm1065_vm4, %v1490_v1  ;;  %v1481_v18 = vmul.f32 %v5529_v10, %v7987_v45 }
 0x79c   : > { %7986 = vst [vmem:[#allocation16_spill] sm:$0xff] %v6780_v46  ;;  %v2515_v5 = vpop.permute.xlu0 %2514 }
 0x79d   : > { %v6785_v24 = vpop.f32.mrf.mxu1  ;;  %5132 = vmatprep.subr.bf16.mxu0 %v2515_v5  ;;  %v1491_v27 = vpack.c.bf16 %v1483_v17, %v1481_v18 }
 0x79e   : > { %7989 = vst [vmem:[#allocation11_spill] sm:$0xff] %v6785_v24  ;;  %5133 = vmatpush3.bf16.msra.mxu0 %v2515_v5  ;;  %v7993_v5 = vld [vmem:[#allocation10_spill] sm:$0xff] }
 0x79f   : > { %v6787_v62 = vpop.f32.mrf.mxu1  ;;  %5093 = vmatmul.mubr.msk.bf16.gmra.mxu0 %vm1065_vm4, %v1491_v27  ;;  %5134 = vmatprep.subr.bf16.mxu0 %v2513_v26  ;;  %v7994_v27 = vld [vmem:[#allocation12_spill] sm:$0xff] }
 0x7a0   : > { %7990 = vst [vmem:[#allocation13_spill] sm:$0xff] %v6787_v62  ;;  %v2511_v21 = vpop.permute.xlu0 %2510 }
 0x7a1   : > { %v6790_v19 = vpop.f32.mrf.mxu1 }
 0x7a2   : > { %7991 = vst [vmem:[#allocation15_spill] sm:$0xff] %v6790_v19  ;;  %5135 = vmatpush3.bf16.msra.mxu0 %v2513_v26 }
 0x7a3   : > { %v6792_v22 = vpop.f32.mrf.mxu1  ;;  %5136 = vmatprep.subr.bf16.mxu0 %v2511_v21 }
 0x7a4   : > { %7992 = vst [vmem:[#allocation18_spill] sm:$0xff] %v6792_v22 }
 0x7a5   : > { %v5114_v3 = vpop.f32.mrf.mxu1 }
 0x7a6   : > { %v6798_v8 = vadd.f32 %v6795_v16, %v5114_v3  ;;  %5137 = vmatpush3.bf16.msra.mxu0 %v2511_v21 }
 0x7a7   : > { %v2321_v4 = vpop.f32.mrf.mxu1  ;;  %5138 = vmatprep.subr.bf16.mxu0 %v2509_v9 }
 0x7a8   : > { %v6801_v39 = vadd.f32 %v6795_v16, %v2321_v4  ;;  %2388 = vmax.xlane.f32.xlu1 %v6798_v8 }
 0x7a9   : > { %v5115_v55 = vpop.f32.mrf.mxu1 }
 0x7aa   : > { %v6805_v20 = vadd.f32 %v6795_v16, %v5115_v55  ;;  %2384 = vmax.xlane.f32.xlu0 %v6801_v39  ;;  %5139 = vmatpush3.bf16.msra.mxu0 %v2509_v9 }
 0x7ab   : > { %v2324_v63 = vpop.f32.mrf.mxu1 }
 0x7ac   : > { %2390 = vmax.xlane.f32.xlu1 %v6805_v20  ;;  %v6810_v56 = vadd.f32 %v6795_v16, %v2324_v63 }
 0x7ad   : > { %v5118_v6 = vpop.f32.mrf.mxu1 }
 0x7ae   : > { %v6813_v11 = vadd.f32 %v6795_v16, %v5118_v6 }
 0x7af   : > { %v2337_v47 = vpop.f32.mrf.mxu1 }
 0x7b0   : > { %2386 = vmax.xlane.f32.xlu1 %v6810_v56  ;;  %2396 = vmax.xlane.f32.xlu0 %v6813_v11  ;;  %v6818_v14 = vadd.f32 %v6795_v16, %v2337_v47 }
 0x7b1   : > { %v5119_v50 = vpop.f32.mrf.mxu1 }
 0x7b2   : > { %v6827_v51 = vadd.f32 %v6795_v16, %v5119_v50 }
 0x7b3   : > { %v2340_v29 = vpop.f32.mrf.mxu1 }
 0x7b4   : > { %v6821_v54 = vadd.f32 %v6795_v16, %v2340_v29  ;;  %2392 = vmax.xlane.f32.xlu1 %v6818_v14  ;;  %v6824_v23 = vpop.f32.mrf.mxu0 }
 0x7b5   : > { %v5122_v32 = vpop.f32.mrf.mxu1 }
 0x7b6   : > { %2394 = vmax.xlane.f32.xlu0 %v6821_v54  ;;  %v6830_v7 = vpop.f32.mrf.mxu0  ;;  %v6833_v13 = vadd.f32 %v6795_v16, %v5122_v32 }
 0x7b7   : > { %v2353_v28 = vpop.f32.mrf.mxu1 }
 0x7b8   : > { %2398 = vmax.xlane.f32.xlu1 %v6827_v51  ;;  %v6836_v12 = vpop.f32.mrf.mxu0  ;;  %v6839_v35 = vadd.f32 %v6795_v16, %v2353_v28 }
 0x7b9   : > { %v5123_v30 = vpop.f32.mrf.mxu1 }
 0x7ba   : > { %2404 = vmax.xlane.f32.xlu0 %v6833_v13  ;;  %v2147_v52 = vpop.f32.mrf.mxu0  ;;  %v6850_v57 = vadd.f32 %v6795_v16, %v5123_v30 }
 0x7bb   : > { %v6843_v34 = vadd.f32 %v2147_v52, %v6760_v41  ;;  %v2356_v53 = vpop.f32.mrf.mxu1 }
 0x7bc   : > { %v6846_v61 = vadd.f32 %v6795_v16, %v2356_v53  ;;  %2400 = vmax.xlane.f32.xlu1 %v6839_v35 }
 0x7bd   : > { %v5126_v0 = vpop.f32.mrf.mxu1 }
 0x7be   : > { %2402 = vmax.xlane.f32.xlu0 %v6846_v61  ;;  %v6854_v10 = vadd.f32 %v6795_v16, %v5126_v0 }
 0x7bf   : > { %v2369_v1 = vpop.f32.mrf.mxu1 }
 0x7c0   : > { %2406 = vmax.xlane.f32.xlu1 %v6850_v57  ;;  %v6858_v45 = vadd.f32 %v6795_v16, %v2369_v1 }
 0x7c1   : > { %v5127_v41 = vpop.f32.mrf.mxu1 }
 0x7c2   : > { %2412 = vmax.xlane.f32.xlu0 %v6854_v10  ;;  %v6866_v17 = vadd.f32 %v6795_v16, %v5127_v41 }
 0x7c3   : > { %v2372_v18 = vpop.f32.mrf.mxu1 }
 0x7c4   : > { %v6862_v59 = vadd.f32 %v6795_v16, %v2372_v18  ;;  %2408 = vmax.xlane.f32.xlu1 %v6858_v45 }
 0x7c6   : > { %2410 = vmax.xlane.f32.xlu0 %v6862_v59 }
 0x7c8   : > { %2414 = vmax.xlane.f32.xlu1 %v6866_v17 }
 0x7d9   : > { %2504 = vrot.lane.b32.xlu1 %v7993_v5, %s5822_s19 }
 0x7dc   : > { %2506 = vrot.lane.b32.xlu0 %v7994_v27, %s5822_s19 }
 0x7dd   : > { %3114 = vrot.lane.b32.xlu1 %v6139_v49, %s5823_s23 }
 0x7e0   : > { %3116 = vrot.lane.b32.xlu0 %v6127_v42, %s5823_s23 }
 0x7e1   : > { %3110 = vrot.lane.b32.xlu1 %v6121_v33, %s5823_s23 }
 0x7e4   : > { %3112 = vrot.lane.b32.xlu0 %v6113_v25, %s5823_s23 }
 0x7e5   : > { %3106 = vrot.lane.b32.xlu1 %v6125_v38, %s5823_s23  ;;  %v5196_v26 = vpop.f32.mrf.mxu1 }
 0x7e6   : > { %v6887_v4 = vadd.f32 %v6795_v16, %v5196_v26 }
 0x7e7   : > { %v2919_v21 = vpop.f32.mrf.mxu1 }
 0x7e8   : > { %3108 = vrot.lane.b32.xlu0 %v7976_v2, %s5823_s23  ;;  %v6894_v25 = vadd.f32 %v6795_v16, %v2919_v21 }
 0x7e9   : > { %v5197_v3 = vpop.f32.mrf.mxu1 }
 0x7ea   : > { %v6890_v33 = vadd.f32 %v6795_v16, %v5197_v3 }
 0x7eb   : > { %v2922_v9 = vpop.f32.mrf.mxu1 }
 0x7ec   : > { %v6898_v2 = vadd.f32 %v6795_v16, %v2922_v9 }
 0x7ed   : > { %v5200_v49 = vpop.f32.mrf.mxu1 }
 0x7ee   : > { %v6902_v55 = vadd.f32 %v6795_v16, %v5200_v49 }
 0x7ef   : > { %v2935_v42 = vpop.f32.mrf.mxu1 }
 0x7f0   : > { %v6906_v6 = vadd.f32 %v6795_v16, %v2935_v42 }
 0x7f1   : > { %v5201_v38 = vpop.f32.mrf.mxu1 }
 0x7f2   : > { %v6914_v50 = vadd.f32 %v6795_v16, %v5201_v38 }
 0x7f3   : > { %v2938_v63 = vpop.f32.mrf.mxu1 }
 0x7f4   : > { %v6910_v47 = vadd.f32 %v6795_v16, %v2938_v63 }
 0x807   : > { %2986 = vmax.xlane.f32.xlu0 %v6887_v4 }
 0x809   : > { %2988 = vmax.xlane.f32.xlu1 %v6890_v33 }
 0x80b   : > { %2982 = vmax.xlane.f32.xlu0 %v6894_v25 }
 0x80d   : > { %2984 = vmax.xlane.f32.xlu1 %v6898_v2 }
 0x80f   : > { %2994 = vmax.xlane.f32.xlu0 %v6902_v55 }
 0x811   : > { %2990 = vmax.xlane.f32.xlu1 %v6906_v6 }
 0x813   : > { %2992 = vmax.xlane.f32.xlu0 %v6910_v47 }
 0x815   : > { %2996 = vmax.xlane.f32.xlu1 %v6914_v50 }
 0x819   : > { %v5204_v29 = vpop.f32.mrf.mxu1 }
 0x81a   : > { %v6919_v32 = vadd.f32 %v6795_v16, %v5204_v29 }
 0x81b   : > { %v2951_v28 = vpop.f32.mrf.mxu1 }
 0x81c   : > { %v6922_v30 = vadd.f32 %v6795_v16, %v2951_v28  ;;  %3002 = vmax.xlane.f32.xlu0 %v6919_v32 }
 0x81d   : > { %v5205_v52 = vpop.f32.mrf.mxu1 }
 0x81e   : > { %2998 = vmax.xlane.f32.xlu1 %v6922_v30  ;;  %v6927_v0 = vadd.f32 %v6795_v16, %v5205_v52 }
 0x81f   : > { %v2954_v53 = vpop.f32.mrf.mxu1 }
 0x820   : > { %v6930_v1 = vadd.f32 %v6795_v16, %v2954_v53 }
 0x822   : > { %3000 = vmax.xlane.f32.xlu0 %v6930_v1  ;;  %3004 = vmax.xlane.f32.xlu1 %v6927_v0 }
 0x831   : > { %v2389_v41 = vpop.xlane.xlu1 %2388 }
 0x832   : > { %v2418_v19 = vsub.f32 %v6798_v8, %v2389_v41 }
 0x833   : > { %v2385_v18 = vpop.xlane.xlu0 %2384 }
 0x834   : > { %v2416_v26 = vsub.f32 %v6801_v39, %v2385_v18 }
 0x835   : > { %v2391_v21 = vpop.xlane.xlu1 %2390 }
 0x836   : > { %v2432_v3 = vmul.f32 1.442695, %v2416_v26  ;;  %v2419_v52 = vsub.f32 %v6805_v20, %v2391_v21 }
 0x838   : > { %5530 = vpow2.f32 %v2432_v3  ;;  %v2438_v26 = vmul.f32 1.442695, %v2419_v52 }
 0x839   : > { %v2387_v9 = vpop.xlane.xlu1 %2386  ;;  %v2397_v42 = vpop.xlane.xlu0 %2396 }
 0x83a   : > { %v2417_v49 = vsub.f32 %v6810_v56, %v2387_v9  ;;  %v2436_v9 = vmul.f32 1.442695, %v2418_v19 }
 0x83c   : > { %v2434_v38 = vmul.f32 1.442695, %v2417_v49 }
 0x83d   : > { %v2393_v63 = vpop.xlane.xlu1 %2392 }
 0x83e   : > { %5532 = vpow2.f32 %v2434_v38  ;;  %v2420_v39 = vsub.f32 %v6818_v14, %v2393_v63  ;;  %v2422_v14 = vsub.f32 %v6813_v11, %v2397_v42 }
 0x83f   : > { %v2395_v29 = vpop.xlane.xlu0 %2394  ;;  %5534 = vpow2.f32 %v2438_v26 }
 0x840   : > { %v2421_v53 = vsub.f32 %v6821_v54, %v2395_v29  ;;  %v2440_v49 = vmul.f32 1.442695, %v2420_v39 }
 0x841   : > { %v2399_v28 = vpop.xlane.xlu1 %2398 }
 0x842   : > { %v2442_v62 = vmul.f32 1.442695, %v2421_v53  ;;  %v2423_v38 = vsub.f32 %v6827_v51, %v2399_v28  ;;  %v2444_v28 = vmul.f32 1.442695, %v2422_v14 }
 0x843   : > { %v2405_v22 = vpop.xlane.xlu0 %2404 }
 0x844   : > { %5536 = vpow2.f32 %v2442_v62  ;;  %v2446_v63 = vmul.f32 1.442695, %v2423_v38  ;;  %v2426_v53 = vsub.f32 %v6833_v13, %v2405_v22 }
 0x845   : > { %v2401_v18 = vpop.xlane.xlu1 %2400  ;;  %v6940_v24 = vpop.eup %5530  ;;  %5538 = vpow2.f32 %v2436_v9 }
 0x846   : > { %5540 = vpow2.f32 %v2440_v49  ;;  %v2424_v41 = vsub.f32 %v6839_v35, %v2401_v18  ;;  %v1023_v49 = vld [vmem:[%s5966_s30 + $0x8] sm:$0xf]  ;;  %v2452_v38 = vmul.f32 1.442695, %v2426_v53 }
 0x847   : > { %v2403_v56 = vpop.xlane.xlu0 %2402  ;;  %5542 = vpow2.f32 %v2446_v63 }
 0x848   : > { %v2425_v54 = vsub.f32 %v6846_v61, %v2403_v56  ;;  %v2448_v62 = vmul.f32 1.442695, %v2424_v41 }
 0x849   : > { %v2407_v3 = vpop.xlane.xlu1 %2406 }
 0x84a   : > { %v2450_v51 = vmul.f32 1.442695, %v2425_v54  ;;  %v2427_v61 = vsub.f32 %v6850_v57, %v2407_v3 }
 0x84b   : > { %v6943_v20 = vpop.eup %5532  ;;  %v6946_v8 = vpop.xlane.xlu0 %2412 }
 0x84c   : > { %v2496_v19 = vpack.c.bf16 %v6943_v20, %v6940_v24  ;;  %5544 = vpow2.f32 %v2450_v51  ;;  %v2454_v26 = vmul.f32 1.442695, %v2427_v61  ;;  %v5535_v57 = vpop.eup %5534 }
 0x84d   : > { %v2409_v21 = vpop.xlane.xlu1 %2408  ;;  %5546 = vpow2.f32 %v2444_v28 }
 0x84e   : > { %5144 = vmatprep.mubr.bf16.mxu0 %v2496_v19  ;;  %5548 = vpow2.f32 %v2448_v62  ;;  %v2428_v35 = vsub.f32 %v6858_v45, %v2409_v21  ;;  %v2690_v21 = vsel %vm1982_vm5, %v1023_v49, 0 }
 0x84f   : > { %v2411_v29 = vpop.xlane.xlu0 %2410  ;;  %5550 = vpow2.f32 %v2454_v26 }
 0x850   : > { %v2429_v11 = vsub.f32 %v6862_v59, %v2411_v29  ;;  %v2456_v45 = vmul.f32 1.442695, %v2428_v35  ;;  %v2430_v29 = vsub.f32 %v6854_v10, %v6946_v8 }
 0x851   : > { %v2415_v52 = vpop.xlane.xlu1 %2414  ;;  %v5537_v3 = vpop.eup %5536 }
 0x852   : > { %v2458_v9 = vmul.f32 1.442695, %v2429_v11  ;;  %v5539_v13 = vpop.eup %5538  ;;  %v2431_v19 = vsub.f32 %v6866_v17, %v2415_v52  ;;  %v2460_v8 = vmul.f32 1.442695, %v2430_v29 }
 0x853   : > { %v2507_v42 = vpop.permute.xlu0 %2506  ;;  %v5541_v14 = vpop.eup %5540  ;;  %v2497_v41 = vpack.c.bf16 %v5535_v57, %v5539_v13 }
 0x854   : > { %5140 = vmatprep.subr.bf16.mxu0 %v2507_v42  ;;  %5552 = vpow2.f32 %v2458_v9  ;;  %v2498_v51 = vpack.c.bf16 %v5537_v3, %v5541_v14  ;;  %v2462_v17 = vmul.f32 1.442695, %v2431_v19  ;;  %v5543_v61 = vpop.eup %5542 }
 0x855   : > { %v2505_v39 = vpop.permute.xlu1 %2504  ;;  %5141 = vmatpush3.bf16.msra.mxu0 %v2507_v42  ;;  %v5208_v18 = vpop.f32.mrf.mxu1  ;;  %5554 = vpow2.f32 %v2452_v38 }
 0x856   : > { %v6957_v56 = vadd.f32 %v6795_v16, %v5208_v18  ;;  %5142 = vmatprep.subr.bf16.mxu0 %v2505_v39  ;;  %5556 = vpow2.f32 %v2456_v45 }
 0x857   : > { %v2967_v59 = vpop.f32.mrf.mxu1  ;;  %v6976_v52 = vpop.permute.xlu0 %3116  ;;  %5558 = vpow2.f32 %v2462_v17 }
 0x858   : > { %v6961_v22 = vadd.f32 %v6795_v16, %v2967_v59  ;;  %3010 = vmax.xlane.f32.xlu0 %v6957_v56  ;;  %5560 = vpow2.f32 %v2460_v8 }
 0x859   : > { %5143 = vmatpush3.bf16.msra.mxu0 %v2505_v39  ;;  %v5209_v54 = vpop.f32.mrf.mxu1  ;;  %v5545_v10 = vpop.eup %5544 }
 0x85a   : > { %3006 = vmax.xlane.f32.xlu1 %v6961_v22  ;;  %5330 = vmatprep.subr.msk.bf16.mxu0 %vm1982_vm5, %v1023_v49  ;;  %v6971_v28 = vadd.f32 %v6795_v16, %v5209_v54  ;;  %v5547_v11 = vpop.eup %5546 }
 0x85b   : > { %v2970_v63 = vpop.f32.mrf.mxu1  ;;  %v5549_v42 = vpop.eup %5548 }
 0x85c   : > { %v6974_v62 = vadd.f32 %v6795_v16, %v2970_v63  ;;  %5145 = vmatmul.mubr.bf16.vlgmr.msra.gmra.mxu0 %v2497_v41  ;;  %v2499_v16 = vpack.c.bf16 %v5543_v61, %v5547_v11  ;;  %v2500_v53 = vpack.c.bf16 %v5545_v10, %v5549_v42  ;;  %v5551_v35 = vpop.eup %5550 }
 0x85d   : > { %5148 = vmatprep.mubr.bf16.mxu0 %v2498_v51  ;;  %5161 = vmatpush3.bf16.msra.mxu0 %v2690_v21 }
 0x85e   : > { %3008 = vmax.xlane.f32.xlu0 %v6974_v62  ;;  %3012 = vmax.xlane.f32.xlu1 %v6971_v28 }
 0x85f   : > { %5210 = vmatprep.subr.bf16.mxu0 %v6976_v52 }
 0x861   : > { %v5553_v39 = vpop.eup %5552 }
 0x862   : > { %2468 = vadd.xlane.f32.xlu0 %v5539_v13  ;;  %2464 = vadd.xlane.f32.xlu1 %v6940_v24  ;;  %v5555_v18 = vpop.eup %5554 }
 0x863   : > { %v5557_v26 = vpop.eup %5556  ;;  %v2501_v9 = vpack.c.bf16 %v5551_v35, %v5555_v18 }
 0x864   : > { %5149 = vmatmul.mubr.bf16.gmra.mxu0 %v2499_v16  ;;  %v2502_v59 = vpack.c.bf16 %v5553_v39, %v5557_v26  ;;  %v5559_v24 = vpop.eup %5558 }
 0x865   : > { %5152 = vmatprep.mubr.bf16.mxu0 %v2500_v53  ;;  %v5561_v49 = vpop.eup %5560 }
 0x866   : > { %2466 = vadd.xlane.f32.xlu0 %v6943_v20  ;;  %2470 = vadd.xlane.f32.xlu1 %v5535_v57  ;;  %v2503_v38 = vpack.c.bf16 %v5559_v24, %v5561_v49  ;;  %v6983_v20 = vpop.permute.xlu1 %3114  ;;  %v6985_v57 = vpop.permute.xlu0 %3112 }
 0x86a   : > { %2478 = vadd.xlane.f32.xlu1 %v5543_v61  ;;  %2476 = vadd.xlane.f32.xlu0 %v5547_v11  ;;  %v6987_v13 = vpop.permute.xlu1 %3110  ;;  %v6989_v45 = vpop.permute.xlu0 %3108 }
 0x86c   : > { %5153 = vmatmul.mubr.bf16.gmra.mxu0 %v2501_v9 }
 0x86d   : > { %5156 = vmatprep.mubr.bf16.mxu0 %v2502_v59 }
 0x86e   : > { %2472 = vadd.xlane.f32.xlu0 %v5541_v14  ;;  %2474 = vadd.xlane.f32.xlu1 %v5537_v3  ;;  %v6991_v3 = vpop.permute.xlu1 %3106 }
 0x872   : > { %2486 = vadd.xlane.f32.xlu1 %v5551_v35  ;;  %2484 = vadd.xlane.f32.xlu0 %v5555_v18 }
 0x874   : > { %5157 = vmatmul.mubr.bf16.gmra.mxu0 %v2503_v38 }
 0x876   : > { %2480 = vadd.xlane.f32.xlu0 %v5549_v42  ;;  %2482 = vadd.xlane.f32.xlu1 %v5545_v10 }
 0x87a   : > { %2494 = vadd.xlane.f32.xlu1 %v5559_v24  ;;  %2492 = vadd.xlane.f32.xlu0 %v5561_v49 }
 0x87e   : > { %2488 = vadd.xlane.f32.xlu0 %v5557_v26  ;;  %2490 = vadd.xlane.f32.xlu1 %v5553_v39 }
 0x88f   : > { %3102 = vrot.lane.b32.xlu1 %v7993_v5, %s5823_s23 }
 0x890   : > { %v2987_v54 = vpop.xlane.xlu0 %2986 }
 0x891   : > { %v3016_v14 = vsub.f32 %v6887_v4, %v2987_v54 }
 0x892   : > { %v2989_v19 = vpop.xlane.xlu1 %2988 }
 0x893   : > { %v3034_v41 = vmul.f32 1.442695, %v3016_v14  ;;  %v3017_v21 = vsub.f32 %v6890_v33, %v2989_v19 }
 0x894   : > { %3104 = vrot.lane.b32.xlu0 %v7994_v27, %s5823_s23  ;;  %v2983_v63 = vpop.xlane.xlu0 %2982 }
 0x895   : > { %v3036_v51 = vmul.f32 1.442695, %v3017_v21  ;;  %v3014_v29 = vsub.f32 %v6894_v25, %v2983_v63  ;;  %5562 = vpow2.f32 %v3034_v41 }
 0x896   : > { %v2985_v17 = vpop.xlane.xlu1 %2984 }
 0x897   : > { %5564 = vpow2.f32 %v3036_v51  ;;  %v3030_v61 = vmul.f32 1.442695, %v3014_v29  ;;  %v3015_v5 = vsub.f32 %v6898_v2, %v2985_v17 }
 0x898   : > { %v2995_v10 = vpop.xlane.xlu0 %2994 }
 0x899   : > { %v3032_v8 = vmul.f32 1.442695, %v3015_v5  ;;  %5566 = vpow2.f32 %v3030_v61  ;;  %v3020_v4 = vsub.f32 %v6902_v55, %v2995_v10 }
 0x89a   : > { %v2991_v11 = vpop.xlane.xlu1 %2990 }
 0x89b   : > { %5568 = vpow2.f32 %v3032_v8  ;;  %v3018_v33 = vsub.f32 %v6906_v6, %v2991_v11  ;;  %v3042_v25 = vmul.f32 1.442695, %v3020_v4 }
 0x89c   : > { %v2993_v27 = vpop.xlane.xlu0 %2992 }
 0x89d   : > { %v3038_v42 = vmul.f32 1.442695, %v3018_v33  ;;  %v3019_v16 = vsub.f32 %v6910_v47, %v2993_v27 }
 0x89e   : > { %v2997_v53 = vpop.xlane.xlu1 %2996 }
 0x89f   : > { %v3040_v35 = vmul.f32 1.442695, %v3019_v16  ;;  %v3021_v39 = vsub.f32 %v6914_v50, %v2997_v53  ;;  %5570 = vpow2.f32 %v3038_v42 }
 0x8a1   : > { %5572 = vpow2.f32 %v3040_v35  ;;  %v3044_v2 = vmul.f32 1.442695, %v3021_v39 }
 0x8a2   : > { %5574 = vpow2.f32 %v3042_v25  ;;  %v7005_v18 = vpop.eup %5562 }
 0x8a3   : > { %5576 = vpow2.f32 %v3044_v2 }
 0x8a4   : > { %v7007_v55 = vpop.eup %5564 }
 0x8a5   : > { %v3003_v26 = vpop.xlane.xlu0 %3002 }
 0x8a6   : > { %v3024_v47 = vsub.f32 %v6919_v32, %v3003_v26  ;;  %v7012_v9 = vpop.eup %5566 }
 0x8a7   : > { %v2999_v59 = vpop.xlane.xlu1 %2998 }
 0x8a8   : > { %v7014_v24 = vpop.eup %5568  ;;  %v3022_v50 = vsub.f32 %v6922_v30, %v2999_v59  ;;  %v3050_v38 = vmul.f32 1.442695, %v3024_v47 }
 0x8aa   : > { %v3046_v54 = vmul.f32 1.442695, %v3022_v50  ;;  %5578 = vpow2.f32 %v3050_v38  ;;  %v7061_v50 = vpop.f32.mrf.mxu0 }
 0x8ab   : > { %v3005_v14 = vpop.xlane.xlu1 %3004  ;;  %v3001_v19 = vpop.xlane.xlu0 %3000 }
 0x8ac   : > { %v3025_v41 = vsub.f32 %v6927_v0, %v3005_v14  ;;  %v3023_v21 = vsub.f32 %v6930_v1, %v3001_v19  ;;  %v7021_v63 = vpop.eup %5570  ;;  %5580 = vpow2.f32 %v3046_v54  ;;  %v7065_v38 = vpop.f32.mrf.mxu0 }
 0x8ae   : > { %v7023_v32 = vpop.eup %5572  ;;  %v3052_v51 = vmul.f32 1.442695, %v3025_v41  ;;  %v3048_v29 = vmul.f32 1.442695, %v3023_v21 }
 0x8af   : > { %v7025_v17 = vpop.eup %5574 }
 0x8b0   : > { %v7029_v61 = vpop.eup %5576  ;;  %5582 = vpow2.f32 %v3052_v51 }
 0x8b1   : > { %5584 = vpow2.f32 %v3048_v29 }
 0x8b3   : > { %3064 = vadd.xlane.f32.xlu0 %v7014_v24  ;;  %3062 = vadd.xlane.f32.xlu1 %v7012_v9 }
 0x8b7   : > { %3066 = vadd.xlane.f32.xlu0 %v7005_v18  ;;  %3068 = vadd.xlane.f32.xlu1 %v7007_v55  ;;  %v7037_v1 = vpop.eup %5578 }
 0x8b9   : > { %v7041_v5 = vpop.eup %5580 }
 0x8bb   : > { %3070 = vadd.xlane.f32.xlu0 %v7021_v63  ;;  %3072 = vadd.xlane.f32.xlu1 %v7023_v32 }
 0x8bd   : > { %v7043_v10 = vpop.eup %5582 }
 0x8be   : > { %v7045_v8 = vpop.eup %5584 }
 0x8bf   : > { %3074 = vadd.xlane.f32.xlu0 %v7025_v17  ;;  %3076 = vadd.xlane.f32.xlu1 %v7029_v61 }
 0x8c3   : > { %3078 = vadd.xlane.f32.xlu0 %v7041_v5  ;;  %3080 = vadd.xlane.f32.xlu1 %v7045_v8 }
 0x8c7   : > { %3082 = vadd.xlane.f32.xlu0 %v7037_v1  ;;  %3084 = vadd.xlane.f32.xlu1 %v7043_v10 }
 0x8e1   : > { %v3011_v33 = vpop.xlane.xlu0 %3010 }
 0x8e2   : > { %v3028_v27 = vsub.f32 %v6957_v56, %v3011_v33 }
 0x8e3   : > { %v3007_v42 = vpop.xlane.xlu1 %3006 }
 0x8e4   : > { %v3026_v16 = vsub.f32 %v6961_v22, %v3007_v42  ;;  %v3058_v53 = vmul.f32 1.442695, %v3028_v27 }
 0x8e6   : > { %v3054_v25 = vmul.f32 1.442695, %v3026_v16 }
 0x8e7   : > { %v3013_v35 = vpop.xlane.xlu1 %3012  ;;  %v3009_v39 = vpop.xlane.xlu0 %3008 }
 0x8e8   : > { %5586 = vpow2.f32 %v3054_v25  ;;  %v3029_v2 = vsub.f32 %v6971_v28, %v3013_v35  ;;  %v3027_v26 = vsub.f32 %v6974_v62, %v3009_v39  ;;  %v7074_v62 = vpop.f32.mrf.mxu0 }
 0x8e9   : > { %5588 = vpow2.f32 %v3058_v53 }
 0x8ea   : > { %v3060_v47 = vmul.f32 1.442695, %v3029_v2  ;;  %v3056_v59 = vmul.f32 1.442695, %v3027_v26  ;;  %v7082_v41 = vpop.f32.mrf.mxu0 }
 0x8eb   : > { %v2465_v21 = vpop.xlane.xlu1 %2464  ;;  %v2469_v29 = vpop.xlane.xlu0 %2468 }
 0x8ec   : > { %5590 = vpow2.f32 %v3060_v47  ;;  %v7085_v51 = vpop.f32.mrf.mxu0 }
 0x8ed   : > { %5592 = vpow2.f32 %v3056_v59 }
 0x8ee   : > { %v7087_v33 = vpop.f32.mrf.mxu0  ;;  %5594 = vrcp.f32 %v2465_v21 }
 0x8ef   : > { %7995 = vst [vmem:[#allocation20_spill] sm:$0xff] %v7087_v33  ;;  %v2471_v27 = vpop.xlane.xlu1 %2470  ;;  %v2467_v42 = vpop.xlane.xlu0 %2466 }
 0x8f0   : > { %v7089_v16 = vpop.f32.mrf.mxu0  ;;  %5596 = vrcp.f32 %v2471_v27 }
 0x8f1   : > { %7996 = vst [vmem:[#allocation17_spill] sm:$0xff] %v7089_v16  ;;  %5598 = vrcp.f32 %v2467_v42 }
 0x8f2   : > { %v7091_v53 = vpop.f32.mrf.mxu0  ;;  %5600 = vrcp.f32 %v2469_v29 }
 0x8f3   : > { %v2479_v25 = vpop.xlane.xlu1 %2478  ;;  %7997 = vst [vmem:[#allocation19_spill] sm:$0xff] %v7091_v53  ;;  %v2477_v35 = vpop.xlane.xlu0 %2476 }
 0x8f4   : > { %v7093_v39 = vpop.f32.mrf.mxu0  ;;  %5602 = vrcp.f32 %v2479_v25 }
 0x8f5   : > { %v7063_v56 = vpop.eup %5586  ;;  %7998 = vst [vmem:[#allocation22_spill] sm:$0xff] %v7093_v39 }
 0x8f6   : > { %3086 = vadd.xlane.f32.xlu0 %v7063_v56  ;;  %v7068_v22 = vpop.eup %5588  ;;  %v7095_v26 = vpop.f32.mrf.mxu0 }
 0x8f7   : > { %v2475_v2 = vpop.xlane.xlu1 %2474  ;;  %7999 = vst [vmem:[#allocation24_spill] sm:$0xff] %v7095_v26  ;;  %v2473_v47 = vpop.xlane.xlu0 %2472 }
 0x8f8   : > { %v7097_v59 = vpop.f32.mrf.mxu0  ;;  %5604 = vrcp.f32 %v2475_v2 }
 0x8f9   : > { %v7070_v54 = vpop.eup %5590  ;;  %8000 = vst [vmem:[#allocation21_spill] sm:$0xff] %v7097_v59  ;;  %5606 = vrcp.f32 %v2473_v47 }
 0x8fa   : > { %v7072_v28 = vpop.eup %5592  ;;  %3090 = vadd.xlane.f32.xlu0 %v7068_v22  ;;  %v7099_v4 = vpop.f32.mrf.mxu0  ;;  %5608 = vrcp.f32 %v2477_v35 }
 0x8fb   : > { %3088 = vadd.xlane.f32.xlu1 %v7072_v28  ;;  %v2487_v14 = vpop.xlane.xlu1 %2486  ;;  %v2485_v19 = vpop.xlane.xlu0 %2484  ;;  %8001 = vst [vmem:[#allocation23_spill] sm:$0xff] %v7099_v4 }
 0x8fc   : > { %v5595_v49 = vpop.eup %5594  ;;  %5610 = vrcp.f32 %v2487_v14 }
 0x8fd   : > { %v5597_v21 = vpop.eup %5596 }
 0x8fe   : > { %v5599_v27 = vpop.eup %5598 }
 0x8ff   : > { %3092 = vadd.xlane.f32.xlu1 %v7070_v54  ;;  %v2483_v0 = vpop.xlane.xlu1 %2482  ;;  %v2481_v30 = vpop.xlane.xlu0 %2480 }
 0x900   : > { %v5601_v59 = vpop.eup %5600  ;;  %5612 = vrcp.f32 %v2483_v0 }
 0x901   : > { %5614 = vrcp.f32 %v2481_v30  ;;  %v5603_v48 = vpop.eup %5602 }
 0x902   : > { %5616 = vrcp.f32 %v2485_v19 }
 0x903   : > { %v2495_v29 = vpop.xlane.xlu1 %2494  ;;  %v2493_v25 = vpop.xlane.xlu0 %2492 }
 0x904   : > { %5618 = vrcp.f32 %v2495_v29 }
 0x907   : > { %v2491_v14 = vpop.xlane.xlu1 %2490 }
 0x908   : > { %5620 = vrcp.f32 %v2491_v14 }
 0x91c   : > { %v5146_v11 = vpop.f32.mrf.mxu0 }
 0x91d   : > { %v2630_v2 = vmul.f32 %v5601_v59, %v5146_v11 }
 0x91e   : > { %v2562_v6 = vpop.f32.mrf.mxu0 }
 0x91f   : > { %v2626_v53 = vmul.f32 %v5595_v49, %v2562_v6  ;;  %v2489_v49 = vpop.xlane.xlu0 %2488 }
 0x920   : > { %v5147_v26 = vpop.f32.mrf.mxu0  ;;  %5622 = vrcp.f32 %v2489_v49 }
 0x921   : > { %v2632_v42 = vmul.f32 %v5597_v21, %v5147_v26  ;;  %v5605_v26 = vpop.eup %5604  ;;  %5624 = vrcp.f32 %v2493_v25 }
 0x922   : > { %v2565_v39 = vpop.f32.mrf.mxu0  ;;  %v5607_v6 = vpop.eup %5606 }
 0x923   : > { %v2628_v46 = vmul.f32 %v5599_v27, %v2565_v39  ;;  %v2658_v35 = vpack.c.bf16 %v2632_v42, %v2630_v2 }
 0x924   : > { %v5150_v4 = vpop.f32.mrf.mxu0 }
 0x925   : > { %v2657_v47 = vpack.c.bf16 %v2628_v46, %v2626_v53  ;;  %v5609_v46 = vpop.eup %5608 }
 0x926   : > { %v2578_v16 = vpop.f32.mrf.mxu0  ;;  %v2638_v53 = vmul.f32 %v5609_v46, %v5150_v4 }
 0x927   : > { %5162 = vmatprep.mubr.msk.bf16.mxu0 %vm1065_vm4, %v2657_v47  ;;  %v2634_v11 = vmul.f32 %v5607_v6, %v2578_v16 }
 0x928   : > { %v5151_v33 = vpop.f32.mrf.mxu0  ;;  %5163 = vmatmul.mubr.msk.bf16.vlgmr.msra.gmra.mxu0 %vm1065_vm4, %v2658_v35 }
 0x929   : > { %5211 = vmatpush3.bf16.msra.mxu0 %v6976_v52  ;;  %v2640_v0 = vmul.f32 %v5603_v48, %v5151_v33  ;;  %v5611_v48 = vpop.eup %5610 }
 0x92a   : > { %5212 = vmatprep.subr.bf16.mxu0 %v6983_v20  ;;  %v2581_v30 = vpop.f32.mrf.mxu0  ;;  %v5613_v16 = vpop.eup %5612 }
 0x92b   : > { %v2636_v19 = vmul.f32 %v5605_v26, %v2581_v30  ;;  %v2660_v21 = vpack.c.bf16 %v2640_v0, %v2638_v53  ;;  %v5615_v4 = vpop.eup %5614 }
 0x92c   : > { %v5154_v39 = vpop.f32.mrf.mxu0 }
 0x92d   : > { %v2659_v59 = vpack.c.bf16 %v2636_v19, %v2634_v11  ;;  %5213 = vmatpush3.bf16.msra.mxu0 %v6983_v20  ;;  %v5617_v20 = vpop.eup %5616 }
 0x92e   : > { %5214 = vmatprep.subr.bf16.mxu0 %v6985_v57  ;;  %v2594_v52 = vpop.f32.mrf.mxu0  ;;  %v2646_v2 = vmul.f32 %v5617_v20, %v5154_v39  ;;  %v3105_v39 = vpop.permute.xlu0 %3104 }
 0x92f   : > { %5166 = vmatprep.mubr.msk.bf16.mxu0 %vm1065_vm4, %v2659_v59  ;;  %v2642_v29 = vmul.f32 %v5615_v4, %v2594_v52  ;;  %v8002_v52 = vpack.c.bf16 %v7014_v24, %v7012_v9  ;;  %v8007_v9 = vpack.c.bf16 %v7043_v10, %v7037_v1  ;;  %v1024_v24 = vld [vmem:[%s5966_s30 + $0xc] sm:$0xf]  ;;  %v2156_v10 = vadd.f32 %v6836_v12, %v6758_v37 }
 0x930   : > { %v5155_v33 = vpop.f32.mrf.mxu0  ;;  %5167 = vmatmul.mubr.msk.bf16.gmra.mxu0 %vm1065_vm4, %v2660_v21  ;;  %v2172_v12 = vadd.f32 %v7074_v62, %v6766_v36 }
 0x931   : > { %5215 = vmatpush3.bf16.msra.mxu0 %v6985_v57  ;;  %v2648_v27 = vmul.f32 %v5611_v48, %v5155_v33  ;;  %v5619_v57 = vpop.eup %5618  ;;  %v8003_v48 = vpack.c.bf16 %v7007_v55, %v7005_v18  ;;  %v8005_v33 = vpack.c.bf16 %v7029_v61, %v7025_v17  ;;  %v8008_v18 = vpack.c.bf16 %v7072_v28, %v7063_v56 }
 0x932   : > { %5216 = vmatprep.subr.bf16.mxu0 %v6987_v13  ;;  %v2597_v42 = vpop.f32.mrf.mxu0  ;;  %v5621_v49 = vpop.eup %5620  ;;  %v8009_v55 = vpack.c.bf16 %v7070_v54, %v7068_v22  ;;  %v2145_v61 = vadd.f32 %v6830_v7, %v6756_v31  ;;  %v2161_v7 = vadd.f32 %v7065_v38, %v6764_v60  ;;  %v2185_v60 = vadd.f32 %v7085_v51, %v6771_v15 }
 0x933   : > { %v2644_v25 = vmul.f32 %v5613_v16, %v2597_v42  ;;  %v2662_v26 = vpack.c.bf16 %v2648_v27, %v2646_v2  ;;  %v5623_v0 = vpop.eup %5622  ;;  %v8006_v16 = vpack.c.bf16 %v7045_v8, %v7041_v5 }
 0x934   : > { %v5158_v47 = vpop.f32.mrf.mxu0  ;;  %v5625_v11 = vpop.eup %5624 }
 0x935   : > { %v2661_v35 = vpack.c.bf16 %v2644_v25, %v2642_v29  ;;  %5217 = vmatpush3.bf16.msra.mxu0 %v6987_v13  ;;  %v2654_v53 = vmul.f32 %v5625_v11, %v5158_v47  ;;  %v8010_v47 = vld [vmem:[#allocation20_spill] sm:$0xff]  ;;  %v8015_v11 = vld [vmem:[#allocation11_spill] sm:$0xff] }
 0x936   : > { %5218 = vmatprep.subr.bf16.mxu0 %v6989_v45  ;;  %v2610_v14 = vpop.f32.mrf.mxu0  ;;  %v2177_v36 = vadd.f32 %v8010_v47, %v6774_v58 }
 0x937   : > { %5170 = vmatprep.mubr.msk.bf16.mxu0 %vm1065_vm4, %v2661_v35  ;;  %v2650_v13 = vmul.f32 %v5623_v0, %v2610_v14  ;;  %v8011_v14 = vld [vmem:[#allocation14_spill] sm:$0xff]  ;;  %v8013_v0 = vld [vmem:[#allocation16_spill] sm:$0xff] }
 0x938   : > { %v5159_v6 = vpop.f32.mrf.mxu0  ;;  %5171 = vmatmul.mubr.msk.bf16.gmra.mxu0 %vm1065_vm4, %v2662_v26 }
 0x939   : > { %5219 = vmatpush3.bf16.msra.mxu0 %v6989_v45  ;;  %v2656_v30 = vmul.f32 %v5619_v57, %v5159_v6  ;;  %v3103_v45 = vpop.permute.xlu1 %3102  ;;  %v8012_v57 = vld [vmem:[#allocation17_spill] sm:$0xff] }
 0x93a   : > { %5220 = vmatprep.subr.bf16.mxu0 %v6991_v3  ;;  %v2613_v46 = vpop.f32.mrf.mxu0 }
 0x93b   : > { %v2652_v19 = vmul.f32 %v5621_v49, %v2613_v46  ;;  %v2664_v21 = vpack.c.bf16 %v2656_v30, %v2654_v53  ;;  %v8014_v30 = vld [vmem:[#allocation19_spill] sm:$0xff] }
 0x93c   : > { %v2180_v15 = vadd.f32 %v8014_v30, %v8013_v0 }
 0x93d   : > { %v2663_v59 = vpack.c.bf16 %v2652_v19, %v2650_v13  ;;  %5221 = vmatpush3.bf16.msra.mxu0 %v6991_v3  ;;  %v8004_v3 = vpack.c.bf16 %v7023_v32, %v7021_v63  ;;  %v3288_v63 = vsel %vm1982_vm5, %v1024_v24, 0  ;;  %v2153_v32 = vadd.f32 %v6824_v23, %v6754_v44  ;;  %v3063_v22 = vpop.xlane.xlu1 %3062  ;;  %v3065_v23 = vpop.xlane.xlu0 %3064  ;;  %v8016_v13 = vld [vmem:[#allocation22_spill] sm:$0xff] }
 0x93e   : > { %5222 = vmatprep.subr.bf16.mxu0 %v3105_v39  ;;  %v2169_v44 = vadd.f32 %v7061_v50, %v6762_v43  ;;  %v2164_v43 = vadd.f32 %v7082_v41, %v6769_v40  ;;  %v2188_v40 = vadd.f32 %v8012_v57, %v8011_v14  ;;  %v2201_v58 = vadd.f32 %v8016_v13, %v8015_v11 }
 0x93f   : > { %5174 = vmatprep.mubr.msk.bf16.mxu0 %vm1065_vm4, %v2663_v59  ;;  %5626 = vrcp.f32 %v3063_v22  ;;  %v8017_v59 = vld [vmem:[#allocation13_spill] sm:$0xff] }
 0x940   : > { %5175 = vmatmul.mubr.msk.bf16.gmra.mxu0 %vm1065_vm4, %v2664_v21  ;;  %v8018_v21 = vld [vmem:[#allocation24_spill] sm:$0xff] }
 0x941   : > { %5223 = vmatpush3.bf16.msra.mxu0 %v3105_v39  ;;  %5226 = vmatprep.mubr.bf16.mxu0 %v8002_v52  ;;  %v3069_v42 = vpop.xlane.xlu1 %3068  ;;  %v3067_v50 = vpop.xlane.xlu0 %3066 }
 0x942   : > { %5224 = vmatprep.subr.bf16.mxu0 %v3103_v45  ;;  %5628 = vrcp.f32 %v3069_v42 }
 0x943   : > { %5630 = vrcp.f32 %v3065_v23 }
 0x944   : > { %5632 = vrcp.f32 %v3067_v50 }
 0x945   : > { %5225 = vmatpush3.bf16.msra.mxu0 %v3103_v45  ;;  %v3073_v62 = vpop.xlane.xlu1 %3072  ;;  %v3071_v41 = vpop.xlane.xlu0 %3070  ;;  %v2193_v45 = vadd.f32 %v8018_v21, %v8017_v59 }
 0x946   : > { %5339 = vmatprep.subr.msk.bf16.mxu0 %vm1982_vm5, %v1024_v24  ;;  %5634 = vrcp.f32 %v3073_v62 }
 0x948   : > { %5227 = vmatmul.mubr.bf16.vlgmr.msra.gmra.mxu0 %v8003_v48 }
 0x949   : > { %5230 = vmatprep.mubr.bf16.mxu0 %v8004_v3  ;;  %5243 = vmatpush3.bf16.msra.mxu0 %v3288_v63  ;;  %v3077_v19 = vpop.xlane.xlu1 %3076  ;;  %v3075_v52 = vpop.xlane.xlu0 %3074 }
 0x94a   : > { %5636 = vrcp.f32 %v3077_v19 }
 0x94b   : > { %5638 = vrcp.f32 %v3071_v41 }
 0x94c   : > { %5640 = vrcp.f32 %v3075_v52 }
 0x94d   : > { %v3081_v24 = vpop.xlane.xlu1 %3080 }
 0x94e   : > { %5642 = vrcp.f32 %v3081_v24 }
 0x950   : > { %5231 = vmatmul.mubr.bf16.gmra.mxu0 %v8005_v33  ;;  %v8019_v33 = vld [vmem:[#allocation15_spill] sm:$0xff] }
 0x951   : > { %5234 = vmatprep.mubr.bf16.mxu0 %v8006_v16  ;;  %v8020_v16 = vld [vmem:[#allocation21_spill] sm:$0xff] }
 0x958   : > { %5235 = vmatmul.mubr.bf16.gmra.mxu0 %v8007_v9  ;;  %v2204_v9 = vadd.f32 %v8020_v16, %v8019_v33 }
 0x959   : > { %5238 = vmatprep.mubr.bf16.mxu0 %v8008_v18 }
 0x960   : > { %5239 = vmatmul.mubr.bf16.gmra.mxu0 %v8009_v55 }
 0x9e8   : > { %v5164_v17 = vpop.f32.mrf.mxu0 }
 0x9e9   : > { %v7151_v1 = vadd.f32 %v5164_v17, %v2153_v32  ;;  %v3079_v17 = vpop.xlane.xlu0 %3078 }
 0x9ea   : > { %v2726_v5 = vpop.f32.mrf.mxu0 }
 0x9eb   : > { %v7155_v8 = vadd.f32 %v2726_v5, %v2145_v61 }
 0x9ec   : > { %v5165_v56 = vpop.f32.mrf.mxu0 }
 0x9ed   : > { %v7157_v54 = vadd.f32 %v5165_v56, %v2156_v10  ;;  %v3085_v10 = vpop.xlane.xlu1 %3084  ;;  %v5627_v56 = vpop.eup %5626 }
 0x9ee   : > { %v2729_v28 = vpop.f32.mrf.mxu0  ;;  %5644 = vrcp.f32 %v3085_v10 }
 0x9ef   : > { %v7162_v4 = vadd.f32 %v2729_v28, %v6843_v34  ;;  %v5629_v28 = vpop.eup %5628  ;;  %5646 = vrcp.f32 %v3079_v17 }
 0x9f0   : > { %v5168_v31 = vpop.f32.mrf.mxu0  ;;  %v5631_v23 = vpop.eup %5630 }
 0x9f1   : > { %v7166_v27 = vadd.f32 %v5168_v31, %v2169_v44  ;;  %v3083_v44 = vpop.xlane.xlu0 %3082 }
 0x9f2   : > { %v2742_v37 = vpop.f32.mrf.mxu0  ;;  %5648 = vrcp.f32 %v3083_v44 }
 0x9f3   : > { %v7170_v20 = vadd.f32 %v2742_v37, %v2161_v7  ;;  %v5633_v37 = vpop.eup %5632 }
 0x9f4   : > { %v5169_v29 = vpop.f32.mrf.mxu0 }
 0x9f5   : > { %v7174_v34 = vadd.f32 %v5169_v29, %v2172_v12  ;;  %v3089_v12 = vpop.xlane.xlu1 %3088 }
 0x9f6   : > { %v2745_v25 = vpop.f32.mrf.mxu0 }
 0x9f7   : > { %v7178_v38 = vadd.f32 %v2745_v25, %v2164_v43  ;;  %v3087_v25 = vpop.xlane.xlu0 %3086 }
 0x9f8   : > { %v5172_v2 = vpop.f32.mrf.mxu0  ;;  %5650 = vrcp.f32 %v3087_v25  ;;  %v7222_v25 = vld [vmem:[%s8021_s25] ss:$0 sm:$0xff] }
 0x9f9   : > { %v7182_v35 = vadd.f32 %v5172_v2, %v2185_v60  ;;  %v3093_v14 = vpop.xlane.xlu1 %3092 }
 0x9fa   : > { %v2758_v26 = vpop.f32.mrf.mxu0  ;;  %5652 = vrcp.f32 %v3093_v14 }
 0x9fb   : > { %v7186_v6 = vadd.f32 %v2758_v26, %v2177_v36  ;;  %v5635_v36 = vpop.eup %5634  ;;  %v3091_v0 = vpop.xlane.xlu0 %3090  ;;  %5654 = vrcp.f32 %v3089_v12 }
 0x9fc   : > { %v5173_v49 = vpop.f32.mrf.mxu0  ;;  %v5637_v26 = vpop.eup %5636  ;;  %5656 = vrcp.f32 %v3091_v0 }
 0x9fd   : > { %v7190_v51 = vadd.f32 %v5173_v49, %v2188_v40  ;;  %v5639_v57 = vpop.eup %5638 }
 0x9fe   : > { %v2761_v46 = vpop.f32.mrf.mxu0  ;;  %v5641_v49 = vpop.eup %5640 }
 0x9ff   : > { %v7194_v53 = vadd.f32 %v2761_v46, %v2180_v15 }
 0xa00   : > { %v5176_v39 = vpop.f32.mrf.mxu0 }
 0xa01   : > { %v7198_v48 = vadd.f32 %v5176_v39, %v2201_v58  ;;  %v5643_v39 = vpop.eup %5642 }
 0xa02   : > { %v2774_v3 = vpop.f32.mrf.mxu0  ;;  %v5645_v21 = vpop.eup %5644 }
 0xa03   : > { %v7202_v18 = vadd.f32 %v2774_v3, %v2193_v45  ;;  %v5647_v45 = vpop.eup %5646 }
 0xa04   : > { %v5177_v55 = vpop.f32.mrf.mxu0  ;;  %v5649_v33 = vpop.eup %5648 }
 0xa05   : > { %v7204_v63 = vadd.f32 %v5177_v55, %v2204_v9  ;;  %v5651_v10 = vpop.eup %5650 }
 0xa06   : > { %v7206_v32 = vpop.f32.mrf.mxu0 }
 0xa08   : > { %v5228_v61 = vpop.f32.mrf.mxu0 }
 0xa09   : > { %v3228_v43 = vmul.f32 %v5633_v37, %v5228_v61 }
 0xa0a   : > { %v3160_v5 = vpop.f32.mrf.mxu0 }
 0xa0b   : > { %v3224_v42 = vmul.f32 %v5627_v56, %v3160_v5 }
 0xa0c   : > { %v5229_v22 = vpop.f32.mrf.mxu0 }
 0xa0d   : > { %v3230_v31 = vmul.f32 %v5629_v28, %v5229_v22  ;;  %v5653_v22 = vpop.eup %5652 }
 0xa0e   : > { %v3163_v7 = vpop.f32.mrf.mxu0  ;;  %v5655_v28 = vpop.eup %5654 }
 0xa0f   : > { %v3226_v29 = vmul.f32 %v5631_v23, %v3163_v7  ;;  %v3256_v2 = vpack.c.bf16 %v3230_v31, %v3228_v43  ;;  %v5657_v31 = vpop.eup %5656 }
 0xa10   : > { %v5232_v50 = vpop.f32.mrf.mxu0 }
 0xa11   : > { %v3255_v60 = vpack.c.bf16 %v3226_v29, %v3224_v42  ;;  %v3236_v46 = vmul.f32 %v5641_v49, %v5232_v50 }
 0xa12   : > { %v3176_v47 = vpop.f32.mrf.mxu0 }
 0xa13   : > { %5244 = vmatprep.mubr.msk.bf16.mxu0 %vm1065_vm4, %v3255_v60  ;;  %v3232_v30 = vmul.f32 %v5639_v57, %v3176_v47 }
 0xa14   : > { %v5233_v62 = vpop.f32.mrf.mxu0  ;;  %5245 = vmatmul.mubr.msk.bf16.vlgmr.msra.gmra.mxu0 %vm1065_vm4, %v3256_v2 }
 0xa15   : > { %v3238_v40 = vmul.f32 %v5637_v26, %v5233_v62 }
 0xa16   : > { %v3179_v41 = vpop.f32.mrf.mxu0 }
 0xa17   : > { %v3234_v15 = vmul.f32 %v5635_v36, %v3179_v41  ;;  %v3258_v58 = vpack.c.bf16 %v3238_v40, %v3236_v46 }
 0xa18   : > { %v5236_v11 = vpop.f32.mrf.mxu0 }
 0xa19   : > { %v3257_v13 = vpack.c.bf16 %v3234_v15, %v3232_v30  ;;  %v3244_v55 = vmul.f32 %v5649_v33, %v5236_v11  ;;  %v5756_v15 = vld [vmem:[#allocation2 + $0x10] sm:$0xff]  ;;  %v5757_v11 = vld [vmem:[#allocation2 + $0x8] sm:$0xff]  ;;  %v5759_v33 = vld [vmem:[#allocation2 + $0x20] sm:$0xff] }
 0xa1a   : > { %v3192_v19 = vpop.f32.mrf.mxu0 }
 0xa1b   : > { %5248 = vmatprep.mubr.msk.bf16.mxu0 %vm1065_vm4, %v3257_v13  ;;  %v3240_v16 = vmul.f32 %v5647_v45, %v3192_v19 }
 0xa1c   : > { %v5237_v59 = vpop.f32.mrf.mxu0  ;;  %5249 = vmatmul.mubr.msk.bf16.gmra.mxu0 %vm1065_vm4, %v3258_v58 }
 0xa1d   : > { %v3246_v52 = vmul.f32 %v5645_v21, %v5237_v59 }
 0xa1e   : > { %v3195_v3 = vpop.f32.mrf.mxu0 }
 0xa1f   : > { %v3242_v9 = vmul.f32 %v5643_v39, %v3195_v3  ;;  %v3260_v61 = vpack.c.bf16 %v3246_v52, %v3244_v55  ;;  %v5758_v39 = vld [vmem:[#allocation2 + $0x18] sm:$0xff] }
 0xa20   : > { %v5240_v24 = vpop.f32.mrf.mxu0 }
 0xa21   : > { %v3259_v17 = vpack.c.bf16 %v3242_v9, %v3240_v16  ;;  %v3252_v12 = vmul.f32 %v5657_v31, %v5240_v24  ;;  %v5760_v24 = vld [vmem:[#allocation2 + $0x30] sm:$0xff] }
 0xa22   : > { %v3208_v5 = vpop.f32.mrf.mxu0 }
 0xa23   : > { %5252 = vmatprep.mubr.msk.bf16.mxu0 %vm1065_vm4, %v3259_v17  ;;  %v3248_v7 = vmul.f32 %v5651_v10, %v3208_v5 }
 0xa24   : > { %v5241_v56 = vpop.f32.mrf.mxu0  ;;  %5253 = vmatmul.mubr.msk.bf16.gmra.mxu0 %vm1065_vm4, %v3260_v61 }
 0xa25   : > { %v3254_v44 = vmul.f32 %v5653_v22, %v5241_v56  ;;  %v5761_v22 = vld [vmem:[#allocation2 + $0x28] sm:$0xff] }
 0xa26   : > { %v3211_v23 = vpop.f32.mrf.mxu0 }
 0xa27   : > { %v3250_v37 = vmul.f32 %v5655_v28, %v3211_v23  ;;  %v3262_v29 = vpack.c.bf16 %v3254_v44, %v3252_v12  ;;  %v5762_v12 = vld [vmem:[#allocation2 + $0x38] sm:$0xff] }
 0xa29   : > { %v3261_v42 = vpack.c.bf16 %v3250_v37, %v3248_v7 }
 0xa2b   : > { %5256 = vmatprep.mubr.msk.bf16.mxu0 %vm1065_vm4, %v3261_v42 }
 0xa2c   : > { %5257 = vmatmul.mubr.msk.bf16.gmra.mxu0 %vm1065_vm4, %v3262_v29 }
 0xad4   : > { %v5246_v43 = vpop.f32.mrf.mxu0 }
 0xad5   : > { %v3389_v50 = vadd.f32 %v5246_v43, %v7151_v1  ;;  %v5755_v1 = vld [vmem:[#allocation2] sm:$0xff] }
 0xad6   : > { %v3324_v60 = vpop.f32.mrf.mxu0  ;;  %v5763_v43 = vld [vmem:[#allocation2 + $0x40] sm:$0xff] }
 0xad7   : > { %v3387_v2 = vadd.f32 %v3324_v60, %v7155_v8  ;;  %v3412_v36 = vadd.f32 %v7222_v25, %v3389_v50 }
 0xad8   : > { %v5247_v47 = vpop.f32.mrf.mxu0 }
 0xad9   : > { %v3410_v62 = vadd.f32 %v7222_v25, %v3387_v2  ;;  %v3390_v26 = vadd.f32 %v5247_v47, %v7157_v54  ;;  %v7236_v46 = vadd.f32 %v5756_v15, %v3412_v36  ;;  %v5764_v47 = vld [vmem:[#allocation2 + $0x50] sm:$0xff] }
 0xada   : > { %v3327_v14 = vpop.f32.mrf.mxu0 }
 0xadb   : > { %v3388_v57 = vadd.f32 %v3327_v14, %v7162_v4  ;;  %v7229_v40 = vadd.f32 %v5755_v1, %v3410_v62  ;;  %v3413_v41 = vadd.f32 %v7222_v25, %v3390_v26  ;;  %v3450_v45 = vsel %vm876_vm3, %v7236_v46, 0.0 }
 0xadc   : > { %v5250_v49 = vpop.f32.mrf.mxu0 }
 0xadd   : > { %v3411_v0 = vadd.f32 %v7222_v25, %v3388_v57  ;;  %v3393_v8 = vadd.f32 %v5250_v49, %v7166_v27  ;;  %v3444_v30 = vsel %vm876_vm3, %v7229_v40, 0.0  ;;  %v7242_v59 = vadd.f32 %v5758_v39, %v3413_v41  ;;  %v8023_v57 = vld [vmem:[#allocation23_spill] sm:$0xff] }
 0xade   : > { %3445 = vadd.xlane.f32.xlu0 %v3444_v30  ;;  %v3340_v54 = vpop.f32.mrf.mxu0 }
 0xadf   : > { %v3391_v4 = vadd.f32 %v3340_v54, %v7170_v20  ;;  %v7239_v13 = vadd.f32 %v5757_v11, %v3411_v0  ;;  %v3416_v58 = vadd.f32 %v7222_v25, %v3393_v8  ;;  %v3453_v55 = vsel %vm876_vm3, %v7242_v59, 0.0  ;;  %v5765_v0 = vld [vmem:[#allocation2 + $0x48] sm:$0xff]  ;;  %v5766_v54 = vld [vmem:[#allocation2 + $0x58] sm:$0xff] }
 0xae0   : > { %v5251_v19 = vpop.f32.mrf.mxu0 }
 0xae1   : > { %v3414_v27 = vadd.f32 %v7222_v25, %v3391_v4  ;;  %v3394_v21 = vadd.f32 %v5251_v19, %v7174_v34  ;;  %v3447_v52 = vsel %vm876_vm3, %v7239_v13, 0.0  ;;  %v7255_v34 = vadd.f32 %v5760_v24, %v3416_v58 }
 0xae2   : > { %3451 = vadd.xlane.f32.xlu0 %v3450_v45  ;;  %3448 = vadd.xlane.f32.xlu1 %v3447_v52  ;;  %v3343_v20 = vpop.f32.mrf.mxu0 }
 0xae3   : > { %v3392_v3 = vadd.f32 %v3343_v20, %v7178_v38  ;;  %v7251_v16 = vadd.f32 %v5759_v33, %v3414_v27  ;;  %v3417_v17 = vadd.f32 %v7222_v25, %v3394_v21  ;;  %v3462_v31 = vsel %vm876_vm3, %v7255_v34, 0.0  ;;  %v5767_v27 = vld [vmem:[#allocation2 + $0x60] sm:$0xff] }
 0xae4   : > { %v5254_v9 = vpop.f32.mrf.mxu0 }
 0xae5   : > { %v3415_v61 = vadd.f32 %v7222_v25, %v3392_v3  ;;  %v3397_v5 = vadd.f32 %v5254_v9, %v7182_v35  ;;  %v3456_v10 = vsel %vm876_vm3, %v7251_v16, 0.0  ;;  %v7272_v42 = vadd.f32 %v5762_v12, %v3417_v17  ;;  %v5768_v3 = vld [vmem:[#allocation2 + $0x70] sm:$0xff]  ;;  %v5769_v9 = vld [vmem:[#allocation2 + $0x68] sm:$0xff] }
 0xae6   : > { %3454 = vadd.xlane.f32.xlu1 %v3453_v55  ;;  %3457 = vadd.xlane.f32.xlu0 %v3456_v10  ;;  %v3356_v38 = vpop.f32.mrf.mxu0 }
 0xae7   : > { %v3395_v56 = vadd.f32 %v3356_v38, %v7186_v6  ;;  %v7263_v28 = vadd.f32 %v5761_v22, %v3415_v61  ;;  %v3420_v44 = vadd.f32 %v7222_v25, %v3397_v5  ;;  %v3465_v26 = vsel %vm876_vm3, %v7272_v42, 0.0  ;;  %v5770_v61 = vld [vmem:[#allocation2 + $0x78] sm:$0xff] }
 0xae8   : > { %v5255_v23 = vpop.f32.mrf.mxu0 }
 0xae9   : > { %v3418_v7 = vadd.f32 %v7222_v25, %v3395_v56  ;;  %v3398_v35 = vadd.f32 %v5255_v23, %v7190_v51  ;;  %v3459_v37 = vsel %vm876_vm3, %v7263_v28, 0.0  ;;  %v7278_v36 = vadd.f32 %v5764_v47, %v3420_v44 }
 0xaea   : > { %3463 = vadd.xlane.f32.xlu0 %v3462_v31  ;;  %3460 = vadd.xlane.f32.xlu1 %v3459_v37  ;;  %v3359_v6 = vpop.f32.mrf.mxu0 }
 0xaeb   : > { %v3396_v29 = vadd.f32 %v3359_v6, %v7194_v53  ;;  %v7275_v50 = vadd.f32 %v5763_v43, %v3418_v7  ;;  %v3421_v60 = vadd.f32 %v7222_v25, %v3398_v35  ;;  %v8022_v53 = vld [vmem:[#allocation18_spill] sm:$0xff]  ;;  %v3474_v15 = vsel %vm876_vm3, %v7278_v36, 0.0 }
 0xaec   : > { %v5258_v2 = vpop.f32.mrf.mxu0  ;;  %v2196_v1 = vadd.f32 %v8023_v57, %v8022_v53 }
 0xaed   : > { %v3419_v51 = vadd.f32 %v7222_v25, %v3396_v29  ;;  %v3401_v62 = vadd.f32 %v5258_v2, %v7198_v48  ;;  %v3468_v14 = vsel %vm876_vm3, %v7275_v50, 0.0  ;;  %v7294_v4 = vadd.f32 %v5766_v54, %v3421_v60 }
 0xaee   : > { %3466 = vadd.xlane.f32.xlu1 %v3465_v26  ;;  %3469 = vadd.xlane.f32.xlu0 %v3468_v14  ;;  %v3372_v41 = vpop.f32.mrf.mxu0  ;;  %v2802_v30 = vadd.f32 %v7206_v32, %v2196_v1 }
 0xaef   : > { %v3399_v49 = vadd.f32 %v3372_v41, %v7202_v18  ;;  %v7289_v8 = vadd.f32 %v5765_v0, %v3419_v51  ;;  %v3424_v11 = vadd.f32 %v7222_v25, %v3401_v62  ;;  %v3477_v45 = vsel %vm876_vm3, %v7294_v4, 0.0 }
 0xaf0   : > { %v5259_v48 = vpop.f32.mrf.mxu0 }
 0xaf1   : > { %v3422_v58 = vadd.f32 %v7222_v25, %v3399_v49  ;;  %v3402_v19 = vadd.f32 %v5259_v48, %v7204_v63  ;;  %v3471_v18 = vsel %vm876_vm3, %v7289_v8, 0.0  ;;  %v7309_v33 = vadd.f32 %v5768_v3, %v3424_v11 }
 0xaf2   : > { %3475 = vadd.xlane.f32.xlu0 %v3474_v15  ;;  %3472 = vadd.xlane.f32.xlu1 %v3471_v18  ;;  %v3375_v39 = vpop.f32.mrf.mxu0 }
 0xaf3   : > { %v3400_v32 = vadd.f32 %v3375_v39, %v2802_v30  ;;  %v7301_v21 = vadd.f32 %v5767_v27, %v3422_v58  ;;  %v3425_v52 = vadd.f32 %v7222_v25, %v3402_v19  ;;  %v3486_v24 = vsel %vm876_vm3, %v7309_v33, 0.0 }
 0xaf5   : > { %v3423_v20 = vadd.f32 %v7222_v25, %v3400_v32  ;;  %v3480_v63 = vsel %vm876_vm3, %v7301_v21, 0.0  ;;  %v7317_v5 = vadd.f32 %v5770_v61, %v3425_v52  ;;  %v5396_v52 = vld [vmem:[%s5983_s3 + $0x8] sm:$0xff]  }
 0xaf6   : > { %3478 = vadd.xlane.f32.xlu1 %v3477_v45  ;;  %3481 = vadd.xlane.f32.xlu0 %v3480_v63 }
 0xaf7   : > { %v7311_v55 = vadd.f32 %v5769_v9, %v3423_v20  ;;  %v3489_v25 = vsel %vm876_vm3, %v7317_v5, 0.0  ;;  %5260 = vmatprep.subr.bf16.mxu1 %v5396_v52 }
 0xaf8   : > { %5261 = vmatpush3.bf16.msra.mxu1 %v5396_v52 }
 0xaf9   : > { %v3483_v17 = vsel %vm876_vm3, %v7311_v55, 0.0 }
 0xafa   : > { %3487 = vadd.xlane.f32.xlu0 %v3486_v24  ;;  %3484 = vadd.xlane.f32.xlu1 %v3483_v17 }
 0xafe   : > { %3490 = vadd.xlane.f32.xlu1 %v3489_v25 }
 0xb67   : > { %v3446_v10 = vpop.xlane.xlu0 %3445 }
 0xb68   : > { %v3493_v38 = vmul.f32 0.03125, %v3446_v10 }
 0xb6a   : > { %v7322_v56 = vsub.f32 %v7229_v40, %v3493_v38 }
 0xb6b   : > { %v3449_v22 = vpop.xlane.xlu1 %3448  ;;  %v3452_v44 = vpop.xlane.xlu0 %3451 }
 0xb6c   : > { %v3494_v23 = vmul.f32 0.03125, %v3449_v22  ;;  %v3495_v31 = vmul.f32 0.03125, %v3452_v44  ;;  %v3525_v7 = vmul.f32 %v7322_v56, %v7322_v56 }
 0xb6e   : > { %v7327_v35 = vsub.f32 %v7239_v13, %v3494_v23  ;;  %v7330_v37 = vsub.f32 %v7236_v46, %v3495_v31  ;;  %v3541_v12 = vsel %vm876_vm3, %v3525_v7, 0.0 }
 0xb6f   : > { %v3455_v6 = vpop.xlane.xlu1 %3454  ;;  %3542 = vadd.xlane.f32.xlu0 %v3541_v12  ;;  %v3458_v29 = vpop.xlane.xlu0 %3457 }
 0xb70   : > { %v3496_v40 = vmul.f32 0.03125, %v3455_v6  ;;  %v3497_v43 = vmul.f32 0.03125, %v3458_v29  ;;  %v3526_v60 = vmul.f32 %v7327_v35, %v7327_v35  ;;  %v3527_v2 = vmul.f32 %v7330_v37, %v7330_v37 }
 0xb72   : > { %v7338_v47 = vsub.f32 %v7242_v59, %v3496_v40  ;;  %v7341_v13 = vsub.f32 %v7251_v16, %v3497_v43  ;;  %v3544_v46 = vsel %vm876_vm3, %v3526_v60, 0.0  ;;  %v3547_v51 = vsel %vm876_vm3, %v3527_v2, 0.0 }
 0xb73   : > { %v3461_v62 = vpop.xlane.xlu1 %3460  ;;  %3545 = vadd.xlane.f32.xlu1 %v3544_v46  ;;  %3548 = vadd.xlane.f32.xlu0 %v3547_v51  ;;  %v3464_v26 = vpop.xlane.xlu0 %3463 }
 0xb74   : > { %v3498_v14 = vmul.f32 0.03125, %v3461_v62  ;;  %v3499_v53 = vmul.f32 0.03125, %v3464_v26  ;;  %v3528_v57 = vmul.f32 %v7338_v47, %v7338_v47  ;;  %v3529_v59 = vmul.f32 %v7341_v13, %v7341_v13 }
 0xb76   : > { %v7350_v1 = vsub.f32 %v7263_v28, %v3498_v14  ;;  %v7353_v16 = vsub.f32 %v7255_v34, %v3499_v53  ;;  %v3550_v41 = vsel %vm876_vm3, %v3528_v57, 0.0  ;;  %v3553_v49 = vsel %vm876_vm3, %v3529_v59, 0.0  ;;  %v5397_v14 = vld [vmem:[%s5983_s3] sm:$0xff]  }
 0xb77   : > { %v3467_v0 = vpop.xlane.xlu1 %3466  ;;  %3551 = vadd.xlane.f32.xlu1 %v3550_v41  ;;  %3554 = vadd.xlane.f32.xlu0 %v3553_v49  ;;  %v3470_v30 = vpop.xlane.xlu0 %3469 }
 0xb78   : > { %v3500_v48 = vmul.f32 0.03125, %v3467_v0  ;;  %v3501_v15 = vmul.f32 0.03125, %v3470_v30  ;;  %v3530_v54 = vmul.f32 %v7350_v1, %v7350_v1  ;;  %v3531_v28 = vmul.f32 %v7353_v16, %v7353_v16  ;;  %5262 = vmatprep.subr.bf16.mxu1 %v5397_v14 }
 0xb79   : > { %5263 = vmatpush3.bf16.msra.mxu1 %v5397_v14 }
 0xb7a   : > { %v7362_v34 = vsub.f32 %v7272_v42, %v3500_v48  ;;  %v7365_v11 = vsub.f32 %v7275_v50, %v3501_v15  ;;  %v3556_v58 = vsel %vm876_vm3, %v3530_v54, 0.0  ;;  %v3559_v19 = vsel %vm876_vm3, %v3531_v28, 0.0 }
 0xb7b   : > { %v3473_v18 = vpop.xlane.xlu1 %3472  ;;  %3557 = vadd.xlane.f32.xlu1 %v3556_v58  ;;  %3560 = vadd.xlane.f32.xlu0 %v3559_v19  ;;  %v3476_v39 = vpop.xlane.xlu0 %3475 }
 0xb7c   : > { %v3502_v32 = vmul.f32 0.03125, %v3473_v18  ;;  %v3503_v27 = vmul.f32 0.03125, %v3476_v39  ;;  %v3532_v45 = vmul.f32 %v7362_v34, %v7362_v34  ;;  %v3533_v42 = vmul.f32 %v7365_v11, %v7365_v11 }
 0xb7e   : > { %v7375_v50 = vsub.f32 %v7289_v8, %v3502_v32  ;;  %v7378_v20 = vsub.f32 %v7278_v36, %v3503_v27  ;;  %v3562_v63 = vsel %vm876_vm3, %v3532_v45, 0.0  ;;  %v3565_v3 = vsel %vm876_vm3, %v3533_v42, 0.0 }
 0xb7f   : > { %v3479_v9 = vpop.xlane.xlu1 %3478  ;;  %3563 = vadd.xlane.f32.xlu1 %v3562_v63  ;;  %3566 = vadd.xlane.f32.xlu0 %v3565_v3  ;;  %v3482_v24 = vpop.xlane.xlu0 %3481 }
 0xb80   : > { %v3504_v17 = vmul.f32 0.03125, %v3479_v9  ;;  %v3505_v61 = vmul.f32 0.03125, %v3482_v24  ;;  %v3534_v25 = vmul.f32 %v7375_v50, %v7375_v50  ;;  %v3535_v8 = vmul.f32 %v7378_v20, %v7378_v20 }
 0xb82   : > { %v7387_v36 = vsub.f32 %v7294_v4, %v3504_v17  ;;  %v7390_v10 = vsub.f32 %v7301_v21, %v3505_v61  ;;  %v3568_v38 = vsel %vm876_vm3, %v3534_v25, 0.0  ;;  %v3571_v22 = vsel %vm876_vm3, %v3535_v8, 0.0 }
 0xb83   : > { %3569 = vadd.xlane.f32.xlu1 %v3568_v38  ;;  %v3485_v44 = vpop.xlane.xlu1 %3484  ;;  %3572 = vadd.xlane.f32.xlu0 %v3571_v22  ;;  %v3488_v23 = vpop.xlane.xlu0 %3487 }
 0xb84   : > { %v3506_v31 = vmul.f32 0.03125, %v3485_v44  ;;  %v3507_v7 = vmul.f32 0.03125, %v3488_v23  ;;  %v3536_v12 = vmul.f32 %v7387_v36, %v7387_v36  ;;  %v3537_v4 = vmul.f32 %v7390_v10, %v7390_v10  ;;  %v7425_v44 = vld [vmem:[%s8024_s22] ss:$0 sm:$0xff] }
 0xb86   : > { %v7399_v6 = vsub.f32 %v7311_v55, %v3506_v31  ;;  %v7402_v21 = vsub.f32 %v7309_v33, %v3507_v7  ;;  %v3574_v29 = vsel %vm876_vm3, %v3536_v12, 0.0  ;;  %v3577_v40 = vsel %vm876_vm3, %v3537_v4, 0.0 }
 0xb87   : > { %3575 = vadd.xlane.f32.xlu1 %v3574_v29  ;;  %v3491_v43 = vpop.xlane.xlu1 %3490  ;;  %3578 = vadd.xlane.f32.xlu0 %v3577_v40 }
 0xb88   : > { %v3508_v60 = vmul.f32 0.03125, %v3491_v43  ;;  %v3538_v2 = vmul.f32 %v7399_v6, %v7399_v6  ;;  %v3539_v46 = vmul.f32 %v7402_v21, %v7402_v21 }
 0xb8a   : > { %v7411_v55 = vsub.f32 %v7317_v5, %v3508_v60  ;;  %v3580_v33 = vsel %vm876_vm3, %v3538_v2, 0.0  ;;  %v3583_v51 = vsel %vm876_vm3, %v3539_v46, 0.0 }
 0xb8b   : > { %3581 = vadd.xlane.f32.xlu1 %v3580_v33  ;;  %3584 = vadd.xlane.f32.xlu0 %v3583_v51  ;;  %v7435_v51 = vld [vmem:[%s8026_s27] ss:$0 sm:$0xff] }
 0xb8c   : > { %v3540_v62 = vmul.f32 %v7411_v55, %v7411_v55 }
 0xb8e   : > { %v3586_v26 = vsel %vm876_vm3, %v3540_v62, 0.0 }
 0xb8f   : > { %3587 = vadd.xlane.f32.xlu1 %v3586_v26 }
 0xbf8   : > { %v3543_v53 = vpop.xlane.xlu0 %3542 }
 0xbf9   : > { %v3589_v57 = vmul.f32 0.03125, %v3543_v53 }
 0xbfb   : > { %v3605_v59 = vadd.f32 1e-05, %v3589_v57 }
 0xbfc   : > { %v3546_v5 = vpop.xlane.xlu1 %3545  ;;  %v3549_v41 = vpop.xlane.xlu0 %3548 }
 0xbfd   : > { %5658 = vrsqrt.f32 %v3605_v59  ;;  %v3590_v49 = vmul.f32 0.03125, %v3546_v5  ;;  %v3591_v0 = vmul.f32 0.03125, %v3549_v41 }
 0xbff   : > { %v3606_v30 = vadd.f32 1e-05, %v3590_v49  ;;  %v3607_v48 = vadd.f32 1e-05, %v3591_v0 }
 0xc00   : > { %v3552_v15 = vpop.xlane.xlu1 %3551  ;;  %v3555_v54 = vpop.xlane.xlu0 %3554 }
 0xc01   : > { %5660 = vrsqrt.f32 %v3606_v30  ;;  %v3592_v28 = vmul.f32 0.03125, %v3552_v15  ;;  %v3593_v58 = vmul.f32 0.03125, %v3555_v54 }
 0xc02   : > { %5662 = vrsqrt.f32 %v3607_v48 }
 0xc03   : > { %v3608_v19 = vadd.f32 1e-05, %v3592_v28  ;;  %v3609_v18 = vadd.f32 1e-05, %v3593_v58 }
 0xc04   : > { %v3558_v39 = vpop.xlane.xlu1 %3557  ;;  %v3561_v32 = vpop.xlane.xlu0 %3560 }
 0xc05   : > { %5664 = vrsqrt.f32 %v3608_v19  ;;  %v3594_v27 = vmul.f32 0.03125, %v3558_v39  ;;  %v3595_v45 = vmul.f32 0.03125, %v3561_v32 }
 0xc06   : > { %5666 = vrsqrt.f32 %v3609_v18 }
 0xc07   : > { %v3610_v42 = vadd.f32 1e-05, %v3594_v27  ;;  %v3611_v52 = vadd.f32 1e-05, %v3595_v45 }
 0xc08   : > { %v3564_v63 = vpop.xlane.xlu1 %3563  ;;  %v3567_v3 = vpop.xlane.xlu0 %3566 }
 0xc09   : > { %5668 = vrsqrt.f32 %v3610_v42  ;;  %v3596_v9 = vmul.f32 0.03125, %v3564_v63  ;;  %v3597_v24 = vmul.f32 0.03125, %v3567_v3 }
 0xc0a   : > { %v5659_v17 = vpop.eup %5658  ;;  %5670 = vrsqrt.f32 %v3611_v52 }
 0xc0b   : > { %v3612_v61 = vadd.f32 1e-05, %v3596_v9  ;;  %v3613_v25 = vadd.f32 1e-05, %v3597_v24  ;;  %v3637_v22 = vmul.f32 %v5659_v17, %v7322_v56 }
 0xc0c   : > { %v3570_v8 = vpop.xlane.xlu1 %3569  ;;  %v3573_v38 = vpop.xlane.xlu0 %3572 }
 0xc0d   : > { %5672 = vrsqrt.f32 %v3612_v61  ;;  %v3598_v23 = vmul.f32 0.03125, %v3570_v8  ;;  %v3599_v31 = vmul.f32 0.03125, %v3573_v38  ;;  %v3659_v2 = vmul.f32 %v7425_v44, %v3637_v22 }
 0xc0e   : > { %v5661_v7 = vpop.eup %5660  ;;  %5674 = vrsqrt.f32 %v3613_v25 }
 0xc0f   : > { %v5663_v12 = vpop.eup %5662  ;;  %v3614_v4 = vadd.f32 1e-05, %v3598_v23  ;;  %v3615_v29 = vadd.f32 1e-05, %v3599_v31  ;;  %v3638_v40 = vmul.f32 %v5661_v7, %v7327_v35  ;;  %v7444_v49 = vadd.f32 %v7435_v51, %v3659_v2 }
 0xc10   : > { %v3639_v43 = vmul.f32 %v5663_v12, %v7330_v37  ;;  %v3576_v56 = vpop.xlane.xlu1 %3575  ;;  %v3579_v60 = vpop.xlane.xlu0 %3578 }
 0xc11   : > { %5676 = vrsqrt.f32 %v3614_v4  ;;  %v3600_v46 = vmul.f32 0.03125, %v3576_v56  ;;  %v3601_v33 = vmul.f32 0.03125, %v3579_v60  ;;  %v3660_v62 = vmul.f32 %v7425_v44, %v3638_v40 }
 0xc12   : > { %v5665_v26 = vpop.eup %5664  ;;  %v3661_v35 = vmul.f32 %v7425_v44, %v3639_v43  ;;  %5678 = vrsqrt.f32 %v3615_v29 }
 0xc13   : > { %v5667_v37 = vpop.eup %5666  ;;  %v3640_v14 = vmul.f32 %v5665_v26, %v7338_v47  ;;  %v3616_v53 = vadd.f32 1e-05, %v3600_v46  ;;  %v3617_v57 = vadd.f32 1e-05, %v3601_v33  ;;  %v7441_v59 = vadd.f32 %v7435_v51, %v3660_v62 }
 0xc14   : > { %v3582_v5 = vpop.xlane.xlu1 %3581  ;;  %v3585_v41 = vpop.xlane.xlu0 %3584  ;;  %v3641_v0 = vmul.f32 %v5667_v37, %v7341_v13  ;;  %v7451_v28 = vadd.f32 %v7435_v51, %v3661_v35 }
 0xc15   : > { %v3662_v30 = vmul.f32 %v7425_v44, %v3640_v14  ;;  %5680 = vrsqrt.f32 %v3616_v53  ;;  %v3602_v48 = vmul.f32 0.03125, %v3582_v5  ;;  %v3603_v15 = vmul.f32 0.03125, %v3585_v41 }
 0xc16   : > { %v5669_v54 = vpop.eup %5668  ;;  %5682 = vrsqrt.f32 %v3617_v57  ;;  %v3697_v47 = vpack.c.bf16 %v7441_v59, %v7444_v49  ;;  %v3663_v58 = vmul.f32 %v7425_v44, %v3641_v0 }
 0xc17   : > { %v5671_v19 = vpop.eup %5670  ;;  %v3618_v18 = vadd.f32 1e-05, %v3602_v48  ;;  %v3619_v39 = vadd.f32 1e-05, %v3603_v15  ;;  %v7455_v13 = vadd.f32 %v7435_v51, %v3662_v30  ;;  %v3642_v32 = vmul.f32 %v5669_v54, %v7350_v1 }
 0xc18   : > { %5264 = vmatprep.mubr.msk.bf16.mxu1 %vm876_vm3, %v3697_v47  ;;  %v3588_v27 = vpop.xlane.xlu1 %3587  ;;  %v3643_v45 = vmul.f32 %v5671_v19, %v7353_v16  ;;  %v7464_v9 = vadd.f32 %v7435_v51, %v3663_v58  ;;  %v5398_v47 = vld [vmem:[%s5997_s20 + $0x18] sm:$0xff]   ;;  %v5399_v58 = vld [vmem:[%s5997_s20 + $0x10] sm:$0xff]   ;;  %v5401_v19 = vld [vmem:[%s5997_s20] sm:$0xff]  }
 0xc19   : > { %5684 = vrsqrt.f32 %v3618_v18  ;;  %v3604_v42 = vmul.f32 0.03125, %v3588_v27  ;;  %v3698_v52 = vpack.c.bf16 %v7455_v13, %v7451_v28  ;;  %v3664_v63 = vmul.f32 %v7425_v44, %v3642_v32  ;;  %5280 = vmatprep.subr.bf16.mxu0 %v5398_v47 }
 0xc1a   : > { %v5673_v3 = vpop.eup %5672  ;;  %5686 = vrsqrt.f32 %v3619_v39  ;;  %v3665_v61 = vmul.f32 %v7425_v44, %v3643_v45  ;;  %5281 = vmatpush3.bf16.msra.mxu0 %v5398_v47 }
 0xc1b   : > { %v5675_v24 = vpop.eup %5674  ;;  %v3620_v17 = vadd.f32 1e-05, %v3604_v42  ;;  %5265 = vmatmul.mubr.msk.bf16.vlgmr.msra.gmra.mxu1 %vm876_vm3, %v3698_v52  ;;  %v7468_v1 = vadd.f32 %v7435_v51, %v3664_v63  ;;  %v3644_v16 = vmul.f32 %v5673_v3, %v7362_v34  ;;  %5282 = vmatprep.subr.bf16.mxu0 %v5399_v58 }
 0xc1c   : > { %v3645_v25 = vmul.f32 %v5675_v24, %v7365_v11  ;;  %v7478_v31 = vadd.f32 %v7435_v51, %v3665_v61 }
 0xc1d   : > { %5688 = vrsqrt.f32 %v3620_v17  ;;  %v3699_v8 = vpack.c.bf16 %v7468_v1, %v7464_v9  ;;  %v3666_v38 = vmul.f32 %v7425_v44, %v3644_v16 }
 0xc1e   : > { %v5677_v22 = vpop.eup %5676  ;;  %v3667_v11 = vmul.f32 %v7425_v44, %v3645_v25  ;;  %5283 = vmatpush3.bf16.msra.mxu0 %v5399_v58 }
 0xc1f   : > { %v5679_v23 = vpop.eup %5678  ;;  %5268 = vmatprep.mubr.msk.bf16.mxu1 %vm876_vm3, %v3699_v8  ;;  %v7481_v7 = vadd.f32 %v7435_v51, %v3666_v38  ;;  %v3646_v34 = vmul.f32 %v5677_v22, %v7375_v50 }
 0xc20   : > { %v3647_v12 = vmul.f32 %v5679_v23, %v7378_v20  ;;  %v7491_v56 = vadd.f32 %v7435_v51, %v3667_v11 }
 0xc21   : > { %v3700_v4 = vpack.c.bf16 %v7481_v7, %v7478_v31  ;;  %v3668_v29 = vmul.f32 %v7425_v44, %v3646_v34 }
 0xc22   : > { %v5681_v40 = vpop.eup %5680  ;;  %v3669_v2 = vmul.f32 %v7425_v44, %v3647_v12 }
 0xc23   : > { %v5683_v43 = vpop.eup %5682  ;;  %5269 = vmatmul.mubr.msk.bf16.gmra.mxu1 %vm876_vm3, %v3700_v4  ;;  %v7494_v60 = vadd.f32 %v7435_v51, %v3668_v29  ;;  %v3648_v50 = vmul.f32 %v5681_v40, %v7387_v36 }
 0xc24   : > { %v3649_v20 = vmul.f32 %v5683_v43, %v7390_v10  ;;  %v7504_v35 = vadd.f32 %v7435_v51, %v3669_v2 }
 0xc25   : > { %v3701_v46 = vpack.c.bf16 %v7494_v60, %v7491_v56  ;;  %v3670_v33 = vmul.f32 %v7425_v44, %v3648_v50 }
 0xc26   : > { %v5685_v62 = vpop.eup %5684  ;;  %v3671_v14 = vmul.f32 %v7425_v44, %v3649_v20 }
 0xc27   : > { %v5687_v26 = vpop.eup %5686  ;;  %5272 = vmatprep.mubr.msk.bf16.mxu1 %vm876_vm3, %v3701_v46  ;;  %v7507_v37 = vadd.f32 %v7435_v51, %v3670_v33  ;;  %v3650_v36 = vmul.f32 %v5685_v62, %v7399_v6 }
 0xc28   : > { %v3651_v10 = vmul.f32 %v5687_v26, %v7402_v21  ;;  %v7517_v41 = vadd.f32 %v7435_v51, %v3671_v14 }
 0xc29   : > { %v3702_v53 = vpack.c.bf16 %v7507_v37, %v7504_v35  ;;  %v3672_v57 = vmul.f32 %v7425_v44, %v3650_v36 }
 0xc2a   : > { %v5689_v5 = vpop.eup %5688  ;;  %v3673_v21 = vmul.f32 %v7425_v44, %v3651_v10 }
 0xc2b   : > { %5273 = vmatmul.mubr.msk.bf16.gmra.mxu1 %vm876_vm3, %v3702_v53  ;;  %v7520_v0 = vadd.f32 %v7435_v51, %v3672_v57  ;;  %v3652_v6 = vmul.f32 %v5689_v5, %v7411_v55 }
 0xc2c   : > { %v7529_v15 = vadd.f32 %v7435_v51, %v3673_v21 }
 0xc2d   : > { %v3703_v30 = vpack.c.bf16 %v7520_v0, %v7517_v41  ;;  %v3674_v48 = vmul.f32 %v7425_v44, %v3652_v6  ;;  %v5400_v44 = vld [vmem:[%s5997_s20 + $0x8] sm:$0xff]  }
 0xc2e   : > { %5284 = vmatprep.subr.bf16.mxu0 %v5400_v44 }
 0xc2f   : > { %5276 = vmatprep.mubr.msk.bf16.mxu1 %vm876_vm3, %v3703_v30  ;;  %v7532_v54 = vadd.f32 %v7435_v51, %v3674_v48  ;;  %5285 = vmatpush3.bf16.msra.mxu0 %v5400_v44  ;;  %v7546_v51 = vld [vmem:[%s8028_s0] ss:$0 sm:$0xff] }
 0xc30   : > { %5286 = vmatprep.subr.bf16.mxu0 %v5401_v19 }
 0xc31   : > { %v3704_v55 = vpack.c.bf16 %v7532_v54, %v7529_v15 }
 0xc33   : > { %5277 = vmatmul.mubr.msk.bf16.gmra.mxu1 %vm876_vm3, %v3704_v55  ;;  %5287 = vmatpush3.bf16.msra.mxu0 %v5401_v19 }
 0xcdb   : > { %v5266_v18 = vpop.f32.mrf.mxu1 }
 0xcdc   : > { %v3795_v39 = vadd.f32 %v5266_v18, %v7546_v51 }
 0xcdd   : > { %v3786_v32 = vpop.f32.mrf.mxu1 }
 0xcde   : > { %v3787_v27 = vadd.f32 %v7546_v51, %v3786_v32  ;;  %v3867_v45 = vmul.f32 0.70710677, %v3795_v39  ;;  %v3851_v32 = vmul.f32 0.5, %v3795_v39 }
 0xcdf   : > { %v5267_v42 = vpop.f32.mrf.mxu1 }
 0xce0   : > { %v3865_v52 = vmul.f32 0.70710677, %v3787_v27  ;;  %v3798_v63 = vadd.f32 %v5267_v42, %v7546_v51  ;;  %v3849_v10 = vmul.f32 0.5, %v3787_v27 }
 0xce1   : > { %v3789_v3 = vpop.f32.mrf.mxu1 }
 0xce2   : > { %5690 = verf.f32 %v3865_v52  ;;  %v3868_v24 = vmul.f32 0.70710677, %v3798_v63  ;;  %v3790_v17 = vadd.f32 %v7546_v51, %v3789_v3  ;;  %v3852_v55 = vmul.f32 0.5, %v3798_v63 }
 0xce3   : > { %5692 = verf.f32 %v3867_v45  ;;  %v5270_v16 = vpop.f32.mrf.mxu1 }
 0xce4   : > { %5694 = verf.f32 %v3868_v24  ;;  %v3866_v61 = vmul.f32 0.70710677, %v3790_v17  ;;  %v7553_v25 = vadd.f32 %v5270_v16, %v7546_v51  ;;  %v3850_v44 = vmul.f32 0.5, %v3790_v17 }
 0xce5   : > { %v3802_v8 = vpop.f32.mrf.mxu1 }
 0xce6   : > { %5696 = verf.f32 %v3866_v61  ;;  %v7556_v38 = vadd.f32 %v7546_v51, %v3802_v8  ;;  %v3871_v22 = vmul.f32 0.70710677, %v7553_v25 }
 0xce7   : > { %v5271_v23 = vpop.f32.mrf.mxu1 }
 0xce8   : > { %v3869_v34 = vmul.f32 0.70710677, %v7556_v38  ;;  %v3814_v11 = vadd.f32 %v5271_v23, %v7546_v51 }
 0xce9   : > { %v3805_v12 = vpop.f32.mrf.mxu1 }
 0xcea   : > { %5698 = verf.f32 %v3869_v34  ;;  %v3872_v4 = vmul.f32 0.70710677, %v3814_v11  ;;  %v7562_v29 = vadd.f32 %v7546_v51, %v3805_v12 }
 0xceb   : > { %5700 = verf.f32 %v3871_v22  ;;  %v5274_v40 = vpop.f32.mrf.mxu1 }
 0xcec   : > { %5702 = verf.f32 %v3872_v4  ;;  %v3870_v43 = vmul.f32 0.70710677, %v7562_v29  ;;  %v7566_v50 = vadd.f32 %v5274_v40, %v7546_v51 }
 0xced   : > { %v3818_v2 = vpop.f32.mrf.mxu1 }
 0xcee   : > { %5704 = verf.f32 %v3870_v43  ;;  %v3875_v20 = vmul.f32 0.70710677, %v7566_v50  ;;  %v7570_v33 = vadd.f32 %v7546_v51, %v3818_v2 }
 0xcef   : > { %v5691_v46 = vpop.eup %5690  ;;  %v5275_v62 = vpop.f32.mrf.mxu1 }
 0xcf0   : > { %v5693_v26 = vpop.eup %5692  ;;  %v7573_v36 = vadd.f32 %v5275_v62, %v7546_v51  ;;  %v3873_v53 = vmul.f32 0.70710677, %v7570_v33  ;;  %v3897_v5 = vadd.f32 1.0, %v5691_v46  ;;  %5706 = verf.f32 %v3875_v20 }
 0xcf1   : > { %v5695_v14 = vpop.eup %5694  ;;  %v3821_v57 = vpop.f32.mrf.mxu1  ;;  %v3899_v48 = vadd.f32 1.0, %v5693_v26  ;;  %v3856_v62 = vmul.f32 0.5, %v3814_v11 }
 0xcf2   : > { %v3900_v6 = vadd.f32 1.0, %v5695_v14  ;;  %v3876_v21 = vmul.f32 0.70710677, %v7573_v36  ;;  %5708 = verf.f32 %v3873_v53  ;;  %v3822_v47 = vadd.f32 %v7546_v51, %v3821_v57 }
 0xcf3   : > { %v5697_v30 = vpop.eup %5696  ;;  %v5278_v58 = vpop.f32.mrf.mxu1  ;;  %v3913_v52 = vmul.f32 %v3897_v5, %v3849_v10  ;;  %v3915_v16 = vmul.f32 %v3899_v48, %v3851_v32  ;;  %v3853_v14 = vmul.f32 0.5, %v7556_v38  ;;  %v3854_v10 = vmul.f32 0.5, %v7562_v29 }
 0xcf4   : > { %v3898_v19 = vadd.f32 1.0, %v5697_v30  ;;  %5710 = verf.f32 %v3876_v21  ;;  %v7579_v18 = vadd.f32 %v5278_v58, %v7546_v51  ;;  %v3916_v27 = vmul.f32 %v3900_v6, %v3852_v55 }
 0xcf5   : > { %v3874_v45 = vmul.f32 0.70710677, %v3822_v47  ;;  %v3834_v42 = vpop.f32.mrf.mxu1  ;;  %v3855_v57 = vmul.f32 0.5, %v7553_v25  ;;  %v3860_v25 = vmul.f32 0.5, %v7573_v36 }
 0xcf6   : > { %v3914_v3 = vmul.f32 %v3898_v19, %v3850_v44  ;;  %v3879_v63 = vmul.f32 0.70710677, %v7579_v18  ;;  %v7583_v61 = vadd.f32 %v7546_v51, %v3834_v42  ;;  %v3930_v34 = vpack.c.bf16 %v3916_v27, %v3915_v16 }
 0xcf7   : > { %v5699_v24 = vpop.eup %5698  ;;  %5712 = verf.f32 %v3874_v45  ;;  %v5279_v17 = vpop.f32.mrf.mxu1  ;;  %v3857_v27 = vmul.f32 0.5, %v7570_v33  ;;  %v3858_v45 = vmul.f32 0.5, %v3822_v47 }
 0xcf8   : > { %v5701_v8 = vpop.eup %5700  ;;  %v3929_v22 = vpack.c.bf16 %v3914_v3, %v3913_v52  ;;  %v3846_v23 = vadd.f32 %v5279_v17, %v7546_v51  ;;  %v3877_v12 = vmul.f32 0.70710677, %v7583_v61  ;;  %v3901_v40 = vadd.f32 1.0, %v5699_v24 }
 0xcf9   : > { %v5703_v39 = vpop.eup %5702  ;;  %v3837_v4 = vpop.f32.mrf.mxu1  ;;  %5714 = verf.f32 %v3879_v63  ;;  %v3903_v46 = vadd.f32 1.0, %v5701_v8  ;;  %v3859_v52 = vmul.f32 0.5, %v7566_v50  ;;  %v3861_v50 = vmul.f32 0.5, %v7583_v61 }
 0xcfa   : > { %v3904_v43 = vadd.f32 1.0, %v5703_v39  ;;  %v3880_v2 = vmul.f32 0.70710677, %v3846_v23  ;;  %5288 = vmatprep.mubr.msk.bf16.mxu0 %vm3976_vm6, %v3929_v22  ;;  %5716 = verf.f32 %v3877_v12  ;;  %v3838_v26 = vadd.f32 %v7546_v51, %v3837_v4 }
 0xcfb   : > { %v5705_v20 = vpop.eup %5704  ;;  %5289 = vmatmul.mubr.msk.bf16.vlgmr.msra.gmra.mxu0 %vm3976_vm6, %v3930_v34  ;;  %v3917_v21 = vmul.f32 %v3901_v40, %v3853_v14  ;;  %v3919_v55 = vmul.f32 %v3903_v46, %v3855_v57  ;;  %v3864_v47 = vmul.f32 0.5, %v3846_v23  ;;  %v7609_v23 = vld [vmem:[%s724_s18] ss:$0 sm:$0xff] }
 0xcfc   : > { %v3902_v53 = vadd.f32 1.0, %v5705_v20  ;;  %5718 = verf.f32 %v3880_v2  ;;  %v3920_v5 = vmul.f32 %v3904_v43, %v3856_v62  ;;  %v3878_v6 = vmul.f32 0.70710677, %v3838_v26 }
 0xcfd   : > { %v5707_v48 = vpop.eup %5706  ;;  %v3862_v40 = vmul.f32 0.5, %v3838_v26  ;;  %v3863_v2 = vmul.f32 0.5, %v7579_v18 }
 0xcfe   : > { %v3918_v30 = vmul.f32 %v3902_v53, %v3854_v10  ;;  %5720 = verf.f32 %v3878_v6  ;;  %v3932_v44 = vpack.c.bf16 %v3920_v5, %v3919_v55  ;;  %v3907_v32 = vadd.f32 1.0, %v5707_v48 }
 0xcff   : > { %v5709_v11 = vpop.eup %5708 }
 0xd00   : > { %v3931_v58 = vpack.c.bf16 %v3918_v30, %v3917_v21  ;;  %v3905_v38 = vadd.f32 1.0, %v5709_v11  ;;  %v3923_v8 = vmul.f32 %v3907_v32, %v3859_v52 }
 0xd01   : > { %v5711_v51 = vpop.eup %5710 }
 0xd02   : > { %v3908_v19 = vadd.f32 1.0, %v5711_v51  ;;  %5292 = vmatprep.mubr.msk.bf16.mxu0 %vm3976_vm6, %v3931_v58  ;;  %v3921_v16 = vmul.f32 %v3905_v38, %v3857_v27 }
 0xd03   : > { %5293 = vmatmul.mubr.msk.bf16.gmra.mxu0 %vm3976_vm6, %v3932_v44 }
 0xd04   : > { %v5713_v29 = vpop.eup %5712  ;;  %v3924_v3 = vmul.f32 %v3908_v19, %v3860_v25 }
 0xd05   : > { %v3906_v42 = vadd.f32 1.0, %v5713_v29 }
 0xd06   : > { %v5715_v24 = vpop.eup %5714  ;;  %v3934_v34 = vpack.c.bf16 %v3924_v3, %v3923_v8 }
 0xd07   : > { %v3922_v63 = vmul.f32 %v3906_v42, %v3858_v45  ;;  %v5717_v17 = vpop.eup %5716  ;;  %v3911_v33 = vadd.f32 1.0, %v5715_v24 }
 0xd08   : > { %v3909_v4 = vadd.f32 1.0, %v5717_v17 }
 0xd09   : > { %v5719_v22 = vpop.eup %5718  ;;  %v3933_v39 = vpack.c.bf16 %v3922_v63, %v3921_v16  ;;  %v3927_v14 = vmul.f32 %v3911_v33, %v3863_v2 }
 0xd0a   : > { %v3912_v12 = vadd.f32 1.0, %v5719_v22  ;;  %v3925_v46 = vmul.f32 %v3909_v4, %v3861_v50 }
 0xd0b   : > { %5296 = vmatprep.mubr.msk.bf16.mxu0 %vm3976_vm6, %v3933_v39  ;;  %v5721_v36 = vpop.eup %5720 }
 0xd0c   : > { %5297 = vmatmul.mubr.msk.bf16.gmra.mxu0 %vm3976_vm6, %v3934_v34  ;;  %v3910_v43 = vadd.f32 1.0, %v5721_v36  ;;  %v3928_v20 = vmul.f32 %v3912_v12, %v3864_v47 }
 0xd0e   : > { %v3926_v62 = vmul.f32 %v3910_v43, %v3862_v40  ;;  %v3936_v53 = vpack.c.bf16 %v3928_v20, %v3927_v14 }
 0xd10   : > { %v3935_v10 = vpack.c.bf16 %v3926_v62, %v3925_v46 }
 0xd12   : > { %5300 = vmatprep.mubr.msk.bf16.mxu0 %vm3976_vm6, %v3935_v10 }
 0xd14   : > { %5301 = vmatmul.mubr.msk.bf16.gmra.mxu0 %vm3976_vm6, %v3936_v53 }
 0xdbb   : > { %v5290_v61 = vpop.f32.mrf.mxu0 }
 0xdbc   : > { %v4044_v26 = vadd.f32 %v5290_v61, %v7609_v23 }
 0xdbd   : > { %v4035_v18 = vpop.f32.mrf.mxu0 }
 0xdbe   : > { %v7613_v57 = vadd.f32 %v4044_v26, %v7451_v28  ;;  %v4036_v5 = vadd.f32 %v7609_v23, %v4035_v18 }
 0xdbf   : > { %v5291_v6 = vpop.f32.mrf.mxu0 }
 0xdc0   : > { %v7617_v21 = vadd.f32 %v4036_v5, %v7444_v49  ;;  %v4047_v30 = vadd.f32 %v5291_v6, %v7609_v23  ;;  %v4122_v48 = vsel %vm876_vm3, %v7613_v57, 0.0 }
 0xdc1   : > { %4123 = vadd.xlane.f32.xlu0 %v4122_v48  ;;  %v4038_v55 = vpop.f32.mrf.mxu0 }
 0xdc2   : > { %v7623_v11 = vadd.f32 %v4047_v30, %v7455_v13  ;;  %v4039_v58 = vadd.f32 %v7609_v23, %v4038_v55  ;;  %v4116_v19 = vsel %vm876_vm3, %v7617_v21, 0.0 }
 0xdc3   : > { %v5294_v28 = vpop.f32.mrf.mxu0 }
 0xdc4   : > { %v7627_v51 = vadd.f32 %v4039_v58, %v7441_v59  ;;  %v4060_v44 = vadd.f32 %v5294_v28, %v7609_v23  ;;  %v4125_v49 = vsel %vm876_vm3, %v7623_v11, 0.0 }
 0xdc5   : > { %4126 = vadd.xlane.f32.xlu1 %v4125_v49  ;;  %4117 = vadd.xlane.f32.xlu0 %v4116_v19  ;;  %v4051_v38 = vpop.f32.mrf.mxu0 }
 0xdc6   : > { %v7635_v13 = vadd.f32 %v4060_v44, %v7478_v31  ;;  %v4052_v29 = vadd.f32 %v7609_v23, %v4051_v38  ;;  %v4119_v27 = vsel %vm876_vm3, %v7627_v51, 0.0 }
 0xdc7   : > { %v5295_v32 = vpop.f32.mrf.mxu0 }
 0xdc8   : > { %v7639_v59 = vadd.f32 %v4052_v29, %v7464_v9  ;;  %v4063_v25 = vadd.f32 %v5295_v32, %v7609_v23  ;;  %v4134_v45 = vsel %vm876_vm3, %v7635_v13, 0.0 }
 0xdc9   : > { %4120 = vadd.xlane.f32.xlu1 %v4119_v27  ;;  %4135 = vadd.xlane.f32.xlu0 %v4134_v45  ;;  %v4054_v42 = vpop.f32.mrf.mxu0 }
 0xdca   : > { %v7647_v31 = vadd.f32 %v4063_v25, %v7481_v7  ;;  %v4055_v52 = vadd.f32 %v7609_v23, %v4054_v42  ;;  %v4128_v16 = vsel %vm876_vm3, %v7639_v59, 0.0 }
 0xdcc   : > { %v7651_v3 = vadd.f32 %v4055_v52, %v7468_v1  ;;  %v5298_v9 = vpop.f32.mrf.mxu0  ;;  %v4137_v24 = vsel %vm876_vm3, %v7647_v31, 0.0 }
 0xdcd   : > { %v4076_v63 = vadd.f32 %v5298_v9, %v7609_v23  ;;  %4138 = vadd.xlane.f32.xlu1 %v4137_v24  ;;  %4129 = vadd.xlane.f32.xlu0 %v4128_v16 }
 0xdce   : > { %v4067_v17 = vpop.f32.mrf.mxu0  ;;  %v4131_v1 = vsel %vm876_vm3, %v7651_v3, 0.0 }
 0xdcf   : > { %v7659_v7 = vadd.f32 %v4076_v63, %v7504_v35  ;;  %v4068_v8 = vadd.f32 %v7609_v23, %v4067_v17 }
 0xdd0   : > { %v5299_v22 = vpop.f32.mrf.mxu0 }
 0xdd1   : > { %v7665_v39 = vadd.f32 %v4068_v8, %v7491_v56  ;;  %v4079_v34 = vadd.f32 %v5299_v22, %v7609_v23  ;;  %4132 = vadd.xlane.f32.xlu1 %v4131_v1  ;;  %v4146_v12 = vsel %vm876_vm3, %v7659_v7, 0.0 }
 0xdd2   : > { %4147 = vadd.xlane.f32.xlu0 %v4146_v12  ;;  %v4070_v4 = vpop.f32.mrf.mxu0 }
 0xdd3   : > { %v7671_v35 = vadd.f32 %v4079_v34, %v7507_v37  ;;  %v4071_v36 = vadd.f32 %v7609_v23, %v4070_v4  ;;  %v4140_v50 = vsel %vm876_vm3, %v7665_v39, 0.0 }
 0xdd4   : > { %v5302_v33 = vpop.f32.mrf.mxu0 }
 0xdd5   : > { %v7675_v47 = vadd.f32 %v4071_v36, %v7494_v60  ;;  %v4149_v56 = vsel %vm876_vm3, %v7671_v35, 0.0  ;;  %v4092_v43 = vadd.f32 %v5302_v33, %v7609_v23 }
 0xdd6   : > { %4150 = vadd.xlane.f32.xlu1 %v4149_v56  ;;  %4141 = vadd.xlane.f32.xlu0 %v4140_v50  ;;  %v4083_v40 = vpop.f32.mrf.mxu0 }
 0xdd7   : > { %v4084_v37 = vadd.f32 %v7609_v23, %v4083_v40  ;;  %v4143_v60 = vsel %vm876_vm3, %v7675_v47, 0.0  ;;  %v7689_v62 = vadd.f32 %v4092_v43, %v7529_v15 }
 0xdd8   : > { %v5303_v2 = vpop.f32.mrf.mxu0 }
 0xdd9   : > { %v7684_v20 = vadd.f32 %v4084_v37, %v7517_v41  ;;  %v4095_v14 = vadd.f32 %v5303_v2, %v7609_v23  ;;  %v4158_v15 = vsel %vm876_vm3, %v7689_v62, 0.0 }
 0xdda   : > { %4144 = vadd.xlane.f32.xlu1 %v4143_v60  ;;  %v4086_v46 = vpop.f32.mrf.mxu0 }
 0xddb   : > { %v4087_v10 = vadd.f32 %v7609_v23, %v4086_v46  ;;  %v4152_v53 = vsel %vm876_vm3, %v7684_v20, 0.0  ;;  %v7699_v41 = vadd.f32 %v4095_v14, %v7532_v54 }
 0xddc   : > { %4153 = vadd.xlane.f32.xlu0 %v4152_v53 }
 0xddd   : > { %v7696_v61 = vadd.f32 %v4087_v10, %v7520_v0  ;;  %v4161_v23 = vsel %vm876_vm3, %v7699_v41, 0.0 }
 0xddf   : > { %v4155_v26 = vsel %vm876_vm3, %v7696_v61, 0.0 }
 0xde0   : > { %4156 = vadd.xlane.f32.xlu1 %v4155_v26  ;;  %4159 = vadd.xlane.f32.xlu0 %v4158_v15 }
 0xde4   : > { %4162 = vadd.xlane.f32.xlu1 %v4161_v23 }
 0xe4a   : > { %v4124_v18 = vpop.xlane.xlu0 %4123 }
 0xe4b   : > { %v4166_v5 = vmul.f32 0.03125, %v4124_v18 }
 0xe4d   : > { %v7708_v0 = vsub.f32 %v7613_v57, %v4166_v5 }
 0xe4e   : > { %v4127_v6 = vpop.xlane.xlu1 %4126  ;;  %v4118_v54 = vpop.xlane.xlu0 %4117 }
 0xe4f   : > { %v4167_v30 = vmul.f32 0.03125, %v4127_v6  ;;  %v4164_v48 = vmul.f32 0.03125, %v4118_v54  ;;  %v4198_v55 = vmul.f32 %v7708_v0, %v7708_v0 }
 0xe51   : > { %v7713_v58 = vsub.f32 %v7623_v11, %v4167_v30  ;;  %v7716_v28 = vsub.f32 %v7617_v21, %v4164_v48  ;;  %v4218_v44 = vsel %vm876_vm3, %v4198_v55, 0.0 }
 0xe52   : > { %v4121_v49 = vpop.xlane.xlu1 %4120  ;;  %4219 = vadd.xlane.f32.xlu0 %v4218_v44  ;;  %v4136_v19 = vpop.xlane.xlu0 %4135 }
 0xe53   : > { %v4165_v57 = vmul.f32 0.03125, %v4121_v49  ;;  %v4170_v38 = vmul.f32 0.03125, %v4136_v19  ;;  %v4199_v29 = vmul.f32 %v7713_v58, %v7713_v58  ;;  %v4196_v32 = vmul.f32 %v7716_v28, %v7716_v28 }
 0xe55   : > { %v7724_v25 = vsub.f32 %v7627_v51, %v4165_v57  ;;  %v7727_v11 = vsub.f32 %v7635_v13, %v4170_v38  ;;  %v4221_v21 = vsel %vm876_vm3, %v4199_v29, 0.0  ;;  %v4212_v27 = vsel %vm876_vm3, %v4196_v32, 0.0 }
 0xe56   : > { %v4139_v45 = vpop.xlane.xlu1 %4138  ;;  %4222 = vadd.xlane.f32.xlu1 %v4221_v21  ;;  %4213 = vadd.xlane.f32.xlu0 %v4212_v27  ;;  %v4130_v42 = vpop.xlane.xlu0 %4129 }
 0xe57   : > { %v4171_v52 = vmul.f32 0.03125, %v4139_v45  ;;  %v4168_v9 = vmul.f32 0.03125, %v4130_v42  ;;  %v4197_v24 = vmul.f32 %v7724_v25, %v7724_v25  ;;  %v4202_v51 = vmul.f32 %v7727_v11, %v7727_v11 }
 0xe59   : > { %v7736_v16 = vsub.f32 %v7647_v31, %v4171_v52  ;;  %v7739_v13 = vsub.f32 %v7639_v59, %v4168_v9  ;;  %v4215_v63 = vsel %vm876_vm3, %v4197_v24, 0.0  ;;  %v4230_v17 = vsel %vm876_vm3, %v4202_v51, 0.0 }
 0xe5a   : > { %v4133_v8 = vpop.xlane.xlu1 %4132  ;;  %4216 = vadd.xlane.f32.xlu1 %v4215_v63  ;;  %4231 = vadd.xlane.f32.xlu0 %v4230_v17 }
 0xe5b   : > { %v4169_v22 = vmul.f32 0.03125, %v4133_v8  ;;  %v4148_v1 = vpop.xlane.xlu0 %4147  ;;  %v4203_v34 = vmul.f32 %v7736_v16, %v7736_v16  ;;  %v4200_v12 = vmul.f32 %v7739_v13, %v7739_v13 }
 0xe5c   : > { %v4174_v31 = vmul.f32 0.03125, %v4148_v1 }
 0xe5d   : > { %v7748_v4 = vsub.f32 %v7651_v3, %v4169_v22  ;;  %v4233_v59 = vsel %vm876_vm3, %v4203_v34, 0.0  ;;  %v4224_v36 = vsel %vm876_vm3, %v4200_v12, 0.0 }
 0xe5e   : > { %v7753_v33 = vsub.f32 %v7659_v7, %v4174_v31  ;;  %4234 = vadd.xlane.f32.xlu1 %v4233_v59  ;;  %4225 = vadd.xlane.f32.xlu0 %v4224_v36 }
 0xe5f   : > { %v4151_v56 = vpop.xlane.xlu1 %4150  ;;  %v4142_v50 = vpop.xlane.xlu0 %4141  ;;  %v4201_v40 = vmul.f32 %v7748_v4, %v7748_v4 }
 0xe60   : > { %v4175_v43 = vmul.f32 0.03125, %v4151_v56  ;;  %v4172_v37 = vmul.f32 0.03125, %v4142_v50  ;;  %v4206_v3 = vmul.f32 %v7753_v33, %v7753_v33 }
 0xe61   : > { %v4227_v2 = vsel %vm876_vm3, %v4201_v40, 0.0 }
 0xe62   : > { %v7761_v60 = vsub.f32 %v7671_v35, %v4175_v43  ;;  %v7764_v7 = vsub.f32 %v7665_v39, %v4172_v37  ;;  %4228 = vadd.xlane.f32.xlu1 %v4227_v2  ;;  %v4242_v46 = vsel %vm876_vm3, %v4206_v3, 0.0 }
 0xe63   : > { %v4145_v14 = vpop.xlane.xlu1 %4144  ;;  %4243 = vadd.xlane.f32.xlu0 %v4242_v46 }
 0xe64   : > { %v4173_v10 = vmul.f32 0.03125, %v4145_v14  ;;  %v4207_v53 = vmul.f32 %v7761_v60, %v7761_v60  ;;  %v4204_v26 = vmul.f32 %v7764_v7, %v7764_v7 }
 0xe65   : > { %v4154_v15 = vpop.xlane.xlu0 %4153 }
 0xe66   : > { %v7772_v23 = vsub.f32 %v7675_v47, %v4173_v10  ;;  %v4176_v35 = vmul.f32 0.03125, %v4154_v15  ;;  %v4245_v39 = vsel %vm876_vm3, %v4207_v53, 0.0  ;;  %v4236_v18 = vsel %vm876_vm3, %v4204_v26, 0.0  ;;  %v7808_v10 = vld [vmem:[%s727_s17] ss:$0 sm:$0xff] }
 0xe67   : > { %4246 = vadd.xlane.f32.xlu1 %v4245_v39  ;;  %4237 = vadd.xlane.f32.xlu0 %v4236_v18 }
 0xe68   : > { %v7777_v5 = vsub.f32 %v7684_v20, %v4176_v35  ;;  %v4205_v6 = vmul.f32 %v7772_v23, %v7772_v23  ;;  %v7816_v35 = vld [vmem:[%s730_s10] ss:$0 sm:$0xff] }
 0xe69   : > { %v4157_v54 = vpop.xlane.xlu1 %4156  ;;  %v4160_v30 = vpop.xlane.xlu0 %4159 }
 0xe6a   : > { %v4177_v48 = vmul.f32 0.03125, %v4157_v54  ;;  %v4178_v55 = vmul.f32 0.03125, %v4160_v30  ;;  %v4239_v47 = vsel %vm876_vm3, %v4205_v6, 0.0  ;;  %v4208_v44 = vmul.f32 %v7777_v5, %v7777_v5 }
 0xe6b   : > { %4240 = vadd.xlane.f32.xlu1 %v4239_v47 }
 0xe6c   : > { %v7785_v49 = vsub.f32 %v7696_v61, %v4177_v48  ;;  %v7788_v19 = vsub.f32 %v7689_v62, %v4178_v55  ;;  %v4248_v20 = vsel %vm876_vm3, %v4208_v44, 0.0 }
 0xe6d   : > { %v4163_v57 = vpop.xlane.xlu1 %4162  ;;  %4249 = vadd.xlane.f32.xlu0 %v4248_v20 }
 0xe6e   : > { %v4179_v38 = vmul.f32 0.03125, %v4163_v57  ;;  %v4209_v29 = vmul.f32 %v7785_v49, %v7785_v49  ;;  %v4210_v32 = vmul.f32 %v7788_v19, %v7788_v19 }
 0xe70   : > { %v7796_v21 = vsub.f32 %v7699_v41, %v4179_v38  ;;  %v4251_v61 = vsel %vm876_vm3, %v4209_v29, 0.0  ;;  %v4254_v27 = vsel %vm876_vm3, %v4210_v32, 0.0 }
 0xe71   : > { %4252 = vadd.xlane.f32.xlu1 %v4251_v61  ;;  %4255 = vadd.xlane.f32.xlu0 %v4254_v27 }
 0xe72   : > { %v4211_v62 = vmul.f32 %v7796_v21, %v7796_v21 }
 0xe74   : > { %v4257_v45 = vsel %vm876_vm3, %v4211_v62, 0.0 }
 0xe75   : > { %4258 = vadd.xlane.f32.xlu1 %v4257_v45 }
 0xedb   : > { %v4220_v42 = vpop.xlane.xlu0 %4219 }
 0xedc   : > { %v4262_v52 = vmul.f32 0.03125, %v4220_v42 }
 0xede   : > { %v4278_v9 = vadd.f32 1e-05, %v4262_v52 }
 0xedf   : > { %v4223_v24 = vpop.xlane.xlu1 %4222  ;;  %v4214_v51 = vpop.xlane.xlu0 %4213 }
 0xee0   : > { %5722 = vrsqrt.f32 %v4278_v9  ;;  %v4263_v41 = vmul.f32 0.03125, %v4223_v24  ;;  %v4260_v63 = vmul.f32 0.03125, %v4214_v51 }
 0xee2   : > { %v4279_v17 = vadd.f32 1e-05, %v4263_v41  ;;  %v4276_v8 = vadd.f32 1e-05, %v4260_v63 }
 0xee3   : > { %v4217_v22 = vpop.xlane.xlu1 %4216  ;;  %v4232_v1 = vpop.xlane.xlu0 %4231 }
 0xee4   : > { %5724 = vrsqrt.f32 %v4279_v17  ;;  %v4261_v34 = vmul.f32 0.03125, %v4217_v22  ;;  %v4266_v12 = vmul.f32 0.03125, %v4232_v1 }
 0xee5   : > { %5726 = vrsqrt.f32 %v4276_v8 }
 0xee6   : > { %v4277_v31 = vadd.f32 1e-05, %v4261_v34  ;;  %v4282_v59 = vadd.f32 1e-05, %v4266_v12 }
 0xee7   : > { %v4235_v36 = vpop.xlane.xlu1 %4234  ;;  %v4226_v56 = vpop.xlane.xlu0 %4225 }
 0xee8   : > { %5728 = vrsqrt.f32 %v4277_v31  ;;  %v4267_v50 = vmul.f32 0.03125, %v4235_v36  ;;  %v4264_v40 = vmul.f32 0.03125, %v4226_v56 }
 0xee9   : > { %5730 = vrsqrt.f32 %v4282_v59 }
 0xeea   : > { %v4283_v43 = vadd.f32 1e-05, %v4267_v50  ;;  %v4280_v37 = vadd.f32 1e-05, %v4264_v40 }
 0xeeb   : > { %v4229_v3 = vpop.xlane.xlu1 %4228 }
 0xeec   : > { %5732 = vrsqrt.f32 %v4283_v43  ;;  %v4265_v2 = vmul.f32 0.03125, %v4229_v3  ;;  %v4244_v46 = vpop.xlane.xlu0 %4243 }
 0xeed   : > { %v5723_v14 = vpop.eup %5722  ;;  %5734 = vrsqrt.f32 %v4280_v37  ;;  %v4270_v53 = vmul.f32 0.03125, %v4244_v46 }
 0xeee   : > { %v4310_v26 = vmul.f32 %v5723_v14, %v7708_v0  ;;  %v4281_v15 = vadd.f32 1e-05, %v4265_v2 }
 0xeef   : > { %v4286_v39 = vadd.f32 1e-05, %v4270_v53 }
 0xef0   : > { %v4332_v18 = vmul.f32 %v7808_v10, %v4310_v26  ;;  %5736 = vrsqrt.f32 %v4281_v15  ;;  %v4247_v6 = vpop.xlane.xlu1 %4246  ;;  %v4238_v54 = vpop.xlane.xlu0 %4237 }
 0xef1   : > { %v5725_v30 = vpop.eup %5724  ;;  %5738 = vrsqrt.f32 %v4286_v39  ;;  %v4271_v48 = vmul.f32 0.03125, %v4247_v6  ;;  %v4268_v55 = vmul.f32 0.03125, %v4238_v54 }
 0xef2   : > { %v5727_v47 = vpop.eup %5726  ;;  %v4354_v0 = vadd.f32 %v7816_v35, %v4332_v18  ;;  %v4311_v44 = vmul.f32 %v5725_v30, %v7713_v58 }
 0xef3   : > { %v4308_v20 = vmul.f32 %v5727_v47, %v7716_v28  ;;  %v4287_v57 = vadd.f32 1e-05, %v4271_v48  ;;  %v4284_v38 = vadd.f32 1e-05, %v4268_v55 }
 0xef4   : > { %4370 = vst.msk [vmem:[#allocation2 + $0x10] sm:$0xff] %vm876_vm3, %v4354_v0  ;;  %v4333_v29 = vmul.f32 %v7808_v10, %v4311_v44  ;;  %v4241_v32 = vpop.xlane.xlu1 %4240 }
 0xef5   : > { %v5729_v61 = vpop.eup %5728  ;;  %v4330_v27 = vmul.f32 %v7808_v10, %v4308_v20  ;;  %5740 = vrsqrt.f32 %v4287_v57  ;;  %v4269_v62 = vmul.f32 0.03125, %v4241_v32 }
 0xef6   : > { %v5731_v45 = vpop.eup %5730  ;;  %v4355_v42 = vadd.f32 %v7816_v35, %v4333_v29  ;;  %v4309_v58 = vmul.f32 %v5729_v61, %v7724_v25  ;;  %5742 = vrsqrt.f32 %v4284_v38  ;;  %v4250_v28 = vpop.xlane.xlu0 %4249 }
 0xef7   : > { %v4352_v52 = vadd.f32 %v7816_v35, %v4330_v27  ;;  %v4314_v9 = vmul.f32 %v5731_v45, %v7727_v11  ;;  %v4285_v24 = vadd.f32 1e-05, %v4269_v62  ;;  %v4272_v51 = vmul.f32 0.03125, %v4250_v28 }
 0xef8   : > { %4371 = vst.msk [vmem:[#allocation2 + $0x18] sm:$0xff] %vm876_vm3, %v4355_v42  ;;  %v4331_v41 = vmul.f32 %v7808_v10, %v4309_v58 }
 0xef9   : > { %v5733_v63 = vpop.eup %5732  ;;  %4368 = vst.msk [vmem:[#allocation2] sm:$0xff] %vm876_vm3, %v4352_v52  ;;  %v4336_v17 = vmul.f32 %v7808_v10, %v4314_v9  ;;  %5744 = vrsqrt.f32 %v4285_v24  ;;  %v4288_v25 = vadd.f32 1e-05, %v4272_v51 }
 0xefa   : > { %4385 = vst.msk [vmem:[%s6010_s9] sm:$0x3] %vm4384_vm7, %v4352_v52  ;;  %v5735_v8 = vpop.eup %5734  ;;  %v4353_v22 = vadd.f32 %v7816_v35, %v4331_v41  ;;  %v4315_v1 = vmul.f32 %v5733_v63, %v7736_v16  ;;  %v4253_v11 = vpop.xlane.xlu1 %4252 }
 0xefb   : > { %v4256_v34 = vpop.xlane.xlu0 %4255  ;;  %v4358_v12 = vadd.f32 %v7816_v35, %v4336_v17  ;;  %v4312_v31 = vmul.f32 %v5735_v8, %v7739_v13  ;;  %5746 = vrsqrt.f32 %v4288_v25  ;;  %v4273_v59 = vmul.f32 0.03125, %v4253_v11 }
 0xefc   : > { %4369 = vst.msk [vmem:[#allocation2 + $0x8] sm:$0xff] %vm876_vm3, %v4353_v22  ;;  %v4337_v36 = vmul.f32 %v7808_v10, %v4315_v1  ;;  %v4274_v56 = vmul.f32 0.03125, %v4256_v34 }
 0xefd   : > { %v5737_v50 = vpop.eup %5736  ;;  %4374 = vst.msk [vmem:[#allocation2 + $0x30] sm:$0xff] %vm876_vm3, %v4358_v12  ;;  %v4334_v40 = vmul.f32 %v7808_v10, %v4312_v31  ;;  %v4289_v43 = vadd.f32 1e-05, %v4273_v59 }
 0xefe   : > { %v5739_v16 = vpop.eup %5738  ;;  %v4359_v37 = vadd.f32 %v7816_v35, %v4337_v36  ;;  %v4313_v3 = vmul.f32 %v5737_v50, %v7748_v4  ;;  %v4290_v2 = vadd.f32 1e-05, %v4274_v56  ;;  %v4259_v13 = vpop.xlane.xlu1 %4258 }
 0xeff   : > { %v4356_v46 = vadd.f32 %v7816_v35, %v4334_v40  ;;  %v4318_v14 = vmul.f32 %v5739_v16, %v7753_v33  ;;  %5748 = vrsqrt.f32 %v4289_v43  ;;  %v4275_v53 = vmul.f32 0.03125, %v4259_v13 }
 0xf00   : > { %4375 = vst.msk [vmem:[#allocation2 + $0x38] sm:$0xff] %vm876_vm3, %v4359_v37  ;;  %v4335_v26 = vmul.f32 %v7808_v10, %v4313_v3  ;;  %5750 = vrsqrt.f32 %v4290_v2 }
 0xf01   : > { %4372 = vst.msk [vmem:[#allocation2 + $0x20] sm:$0xff] %vm876_vm3, %v4356_v46  ;;  %v4340_v15 = vmul.f32 %v7808_v10, %v4318_v14  ;;  %v4291_v39 = vadd.f32 1e-05, %v4275_v53 }
 0xf02   : > { %v5741_v18 = vpop.eup %5740  ;;  %v4357_v4 = vadd.f32 %v7816_v35, %v4335_v26 }
 0xf03   : > { %v5743_v6 = vpop.eup %5742  ;;  %v4362_v54 = vadd.f32 %v7816_v35, %v4340_v15  ;;  %v4319_v33 = vmul.f32 %v5741_v18, %v7761_v60  ;;  %5752 = vrsqrt.f32 %v4291_v39 }
 0xf04   : > { %4373 = vst.msk [vmem:[#allocation2 + $0x28] sm:$0xff] %vm876_vm3, %v4357_v4  ;;  %v4316_v30 = vmul.f32 %v5743_v6, %v7764_v7 }
 0xf05   : > { %4378 = vst.msk [vmem:[#allocation2 + $0x50] sm:$0xff] %vm876_vm3, %v4362_v54  ;;  %v4341_v48 = vmul.f32 %v7808_v10, %v4319_v33 }
 0xf06   : > { %v5745_v55 = vpop.eup %5744  ;;  %v4338_v47 = vmul.f32 %v7808_v10, %v4316_v30 }
 0xf07   : > { %v4363_v0 = vadd.f32 %v7816_v35, %v4341_v48  ;;  %v4317_v44 = vmul.f32 %v5745_v55, %v7772_v23 }
 0xf08   : > { %v5747_v20 = vpop.eup %5746  ;;  %v4360_v57 = vadd.f32 %v7816_v35, %v4338_v47 }
 0xf09   : > { %4379 = vst.msk [vmem:[#allocation2 + $0x58] sm:$0xff] %vm876_vm3, %v4363_v0  ;;  %v4339_v60 = vmul.f32 %v7808_v10, %v4317_v44  ;;  %v4320_v7 = vmul.f32 %v5747_v20, %v7777_v5 }
 0xf0a   : > { %4376 = vst.msk [vmem:[#allocation2 + $0x40] sm:$0xff] %vm876_vm3, %v4360_v57 }
 0xf0b   : > { %v4361_v38 = vadd.f32 %v7816_v35, %v4339_v60  ;;  %v4342_v29 = vmul.f32 %v7808_v10, %v4320_v7 }
 0xf0c   : > { %v5749_v32 = vpop.eup %5748 }
 0xf0d   : > { %v5751_v61 = vpop.eup %5750  ;;  %4377 = vst.msk [vmem:[#allocation2 + $0x48] sm:$0xff] %vm876_vm3, %v4361_v38  ;;  %v4364_v23 = vadd.f32 %v7816_v35, %v4342_v29  ;;  %v4321_v27 = vmul.f32 %v5749_v32, %v7785_v49 }
 0xf0e   : > { %v4322_v62 = vmul.f32 %v5751_v61, %v7788_v19 }
 0xf0f   : > { %4380 = vst.msk [vmem:[#allocation2 + $0x60] sm:$0xff] %vm876_vm3, %v4364_v23  ;;  %v4343_v5 = vmul.f32 %v7808_v10, %v4321_v27 }
 0xf10   : > { %v5753_v45 = vpop.eup %5752  ;;  %v4344_v42 = vmul.f32 %v7808_v10, %v4322_v62 }
 0xf11   : > { %v4365_v58 = vadd.f32 %v7816_v35, %v4343_v5  ;;  %v4323_v28 = vmul.f32 %v5753_v45, %v7796_v21 }
 0xf12   : > { %v4366_v52 = vadd.f32 %v7816_v35, %v4344_v42 }
 0xf13   : > { %4381 = vst.msk [vmem:[#allocation2 + $0x68] sm:$0xff] %vm876_vm3, %v4365_v58  ;;  %v4345_v9 = vmul.f32 %v7808_v10, %v4323_v28 }
 0xf14   : > { %4382 = vst.msk [vmem:[#allocation2 + $0x70] sm:$0xff] %vm876_vm3, %v4366_v52 }
 0xf15   : > { %v4367_v49 = vadd.f32 %v7816_v35, %v4345_v9 }
 0xf17   : > { %4383 = vst.msk [vmem:[#allocation2 + $0x78] sm:$0xff] %vm876_vm3, %v4367_v49 }
 0xf18 PF: > { %s8030_s9 = sld [smem:[#allocation6_spill]] }
 0xf19   : > { %s8031_s21 = sld [smem:[#allocation4_spill]] }
 0xf1a   : > { %s8032_s22 = sld [smem:[#allocation5_spill]] }
 0xf1b   : > { %s8033_s23 = sld [smem:[#allocation7_spill]] }
 0xf1c   : > { %s8034_s24 = sld [smem:[#allocation8_spill]] }
 0xf1e   : > { %s26_s25 = sadd.s32 1, %s8030_s9  }
 0xf1f   : > { %p23_p8 = scmp.ge.s32.totalorder %s26_s25, 6  }
 0xf21   :  { %25 = sbr.rel (!%p23_p8) target bundleno = 12 (0xc), region = 157 }

</bundles_post_ra>
